<compile_context>
chip_gen: v6e
topology: v6e:2x2x1
jax: 0.10.0
libtpu: 0.0.40
codegen_flags: <defaults>
</compile_context>

<pallas_src>
import functools
import math

import jax
import jax.numpy as jnp
from jax import lax
from jax.experimental import pallas as pl
from jax.experimental.pallas import tpu as pltpu

_MASK_VALUE = -1e30          # finite "-inf": exp() underflows to exactly 0


# ---------------------------------------------------------------------------
# Small static helpers
# ---------------------------------------------------------------------------
def _vmem_limit_bytes():
    """Generation-aware scoped-VMEM budget (~48 MiB on v7x, ~96 MiB on v5e/v6e)."""
    try:
        cap = int(getattr(pltpu.get_tpu_info(), "vmem_capacity_bytes"))
        return max(32 << 20, min((cap * 3) // 4, 112 << 20))
    except Exception:
        return 48 << 20      # safe default on every generation


def _row_tile(n, target):
    """Row-tile for the projection kernels: large (MXU M-fill), divides n, multiple of 8,
    and -- when possible -- leaves >= 2 grid steps so v7x's two TensorCores both get work."""
    t = min(target, n)
    if n // t < 2 and n >= 256 and n % 2 == 0 and (n // 2) % 8 == 0:
        t = n // 2
    while t > 8 and (n % t or t % 8):
        t //= 2
    if n % t or t % 8:
        t = n                # full extent is always a legal block dim
    return t


def _seq_tile(t_len, target):
    bt = min(target, t_len)
    while bt > 8 and (t_len % bt or bt % 8):
        bt //= 2
    if t_len % bt or bt % 8:
        bt = t_len
    return bt


def _head_group(num_heads, head_dim):
    """Smallest divisor G of num_heads whose packed width G*head_dim is lane-dense (mult of 128)."""
    for g in range(1, num_heads + 1):
        if num_heads % g == 0 and (g * head_dim) % 128 == 0:
            return g
    return num_heads         # fallback: whole packed width == full array dim (always legal)


# ---------------------------------------------------------------------------
# Kernel 1: fused Q/K/V projection over flattened (B*T) rows
# ---------------------------------------------------------------------------
def _qkv_proj_kernel(x_ref, wq_ref, wk_ref, wv_ref, q_ref, k_ref, v_ref):
    # Three separate lane-dense MXU matmuls: same total weight pushes as one fused dot, but the
    # live f32 intermediate is 3x smaller and each result is cast + stored immediately.
    x = x_ref[...]
    q_ref[...] = jnp.dot(x, wq_ref[...], preferred_element_type=jnp.float32).astype(q_ref.dtype)
    k_ref[...] = jnp.dot(x, wk_ref[...], preferred_element_type=jnp.float32).astype(k_ref.dtype)
    v_ref[...] = jnp.dot(x, wv_ref[...], preferred_element_type=jnp.float32).astype(v_ref.dtype)


def _qkv_proj(x2, wq, wk, wv, *, block_rows, vmem_limit):
    n, d_in = x2.shape
    d_out = wq.shape[1]
    tp = _row_tile(n, block_rows)
    out_sds = jax.ShapeDtypeStruct((n, d_out), x2.dtype)
    w_spec = pl.BlockSpec((d_in, d_out), lambda i: (0, 0))          # weights stay VMEM-resident
    return pl.pallas_call(
        _qkv_proj_kernel,
        out_shape=(out_sds, out_sds, out_sds),
        grid_spec=pltpu.PrefetchScalarGridSpec(
            num_scalar_prefetch=0,
            grid=(n // tp,),
            in_specs=[pl.BlockSpec((tp, d_in), lambda i: (i, 0)), w_spec, w_spec, w_spec],
            out_specs=[pl.BlockSpec((tp, d_out), lambda i: (i, 0)),
                       pl.BlockSpec((tp, d_out), lambda i: (i, 0)),
                       pl.BlockSpec((tp, d_out), lambda i: (i, 0))],
        ),
        compiler_params=pltpu.CompilerParams(
            dimension_semantics=("parallel",),
            vmem_limit_bytes=vmem_limit,
        ),
    )(x2, wq, wk, wv)


# ---------------------------------------------------------------------------
# Kernel 2: flash attention, packed head layout, lower-triangle-only grid
# ---------------------------------------------------------------------------
def _flash_kernel(qi_ref, ki_ref, q_ref, k_ref, v_ref, o_ref,
                  m_ref, l_ref, acc_ref, *, group, head_dim, masked, last_kv):
    p = pl.program_id(2)
    qi = qi_ref[p]
    ki = ki_ref[p]

    @pl.when(ki == 0)
    def _init():
        m_ref[...] = jnp.full_like(m_ref, -jnp.inf)
        l_ref[...] = jnp.zeros_like(l_ref)
        acc_ref[...] = jnp.zeros_like(acc_ref)

    def _accumulate(apply_causal_mask):
        q = q_ref[0]                                   # (bq, group*head_dim)
        k = k_ref[0]
        v = v_ref[0]
        bq, bk = q.shape[0], k.shape[0]
        if apply_causal_mask:
            # Only built for the diagonal tile (bq == bk, aligned tiles).
            row = lax.broadcasted_iota(jnp.int32, (bq, bk), 0)
            col = lax.broadcasted_iota(jnp.int32, (bq, bk), 1)
            keep = col <= row
        # Static unroll over the heads sharing this lane-dense block (group is 1 or 2 typically).
        for g in range(group):
            sl = slice(g * head_dim, (g + 1) * head_dim)
            # Contract the last dims of both operands: no explicit k.T (no XLU transpose pass).
            s = lax.dot_general(q[:, sl], k[:, sl],
                                dimension_numbers=(((1,), (1,)), ((), ())),
                                preferred_element_type=jnp.float32)     # (bq, bk)
            if apply_causal_mask:
                s = jnp.where(keep, s, _MASK_VALUE)
            m_prev = m_ref[g]
            m_new = jnp.maximum(m_prev, jnp.max(s, axis=-1, keepdims=True))
            alpha = jnp.exp(m_prev - m_new)
            pmat = jnp.exp(s - m_new)
            l_ref[g] = alpha * l_ref[g] + jnp.sum(pmat, axis=-1, keepdims=True)
            acc_ref[g] = alpha * acc_ref[g] + jnp.dot(
                pmat.astype(v.dtype), v[:, sl], preferred_element_type=jnp.float32)
            m_ref[g] = m_new

    if masked:
        @pl.when(ki < qi)              # strictly below the diagonal: no mask needed
        def _below():
            _accumulate(apply_causal_mask=False)

        @pl.when(ki == qi)             # single diagonal tile gets the iota mask
        def _diag():
            _accumulate(apply_causal_mask=True)
        is_last = ki == qi             # pairs are enumerated ki = 0..qi
    else:
        _accumulate(apply_causal_mask=False)
        is_last = ki == last_kv

    @pl.when(is_last)
    def _finalize():
        outs = []
        for g in range(group):
            l = l_ref[g]
            inv = pl.reciprocal(l, approx=True)      # EUP, not a VALU divide
            inv = inv * (2.0 - l * inv)              # one Newton step -> ~f32-exact
            outs.append(acc_ref[g] * inv)
        res = outs[0] if group == 1 else jnp.concatenate(outs, axis=-1)
        o_ref[0] = res.astype(o_ref.dtype)           # one lane-dense store of the whole block


def _flash_attention(q, k, v, *, num_heads, head_dim, group, masked,
                     block_q, block_k, vmem_limit):
    B, T, Dh = q.shape
    gd = group * head_dim              # block lane width (multiple of 128 or == Dh)
    hg = num_heads // group
    bq = _seq_tile(T, min(block_q, block_k))   # square tiles: causal diagonal logic needs bq == bk
    nq = nk = T // bq

    # Flattened (q_tile, kv_tile) schedule: for masked attention only the lower triangle exists,
    # so no grid step is ever a dead no-op.  kv advances innermost -> accumulator carries.
    if masked:
        pairs = [(i, j) for i in range(nq) for j in range(i + 1)]
    else:
        pairs = [(i, j) for i in range(nq) for j in range(nk)]
    qi_arr = jnp.asarray([p[0] for p in pairs], dtype=jnp.int32)
    ki_arr = jnp.asarray([p[1] for p in pairs], dtype=jnp.int32)

    q_map = lambda b, h, p, qi, ki: (b, qi[p], h)
    kv_map = lambda b, h, p, qi, ki: (b, ki[p], h)

    return pl.pallas_call(
        functools.partial(_flash_kernel, group=group, head_dim=head_dim,
                          masked=masked, last_kv=nk - 1),
        out_shape=jax.ShapeDtypeStruct((B, T, Dh), q.dtype),
        grid_spec=pltpu.PrefetchScalarGridSpec(
            num_scalar_prefetch=2,
            grid=(B, hg, len(pairs)),
            in_specs=[
                pl.BlockSpec((1, bq, gd), q_map),
                pl.BlockSpec((1, bq, gd), kv_map),
                pl.BlockSpec((1, bq, gd), kv_map),
            ],
            out_specs=pl.BlockSpec((1, bq, gd), q_map),
            scratch_shapes=[
                pltpu.VMEM((group, bq, 1), jnp.float32),          # running row max  m
                pltpu.VMEM((group, bq, 1), jnp.float32),          # running denom    l
                pltpu.VMEM((group, bq, head_dim), jnp.float32),   # output accumulator
            ],
        ),
        compiler_params=pltpu.CompilerParams(
            # batch / head-group axes parallel (v7x megacore); flattened tile-pair axis serial.
            dimension_semantics=("parallel", "parallel", "arbitrary"),
            vmem_limit_bytes=vmem_limit,
        ),
    )(qi_arr, ki_arr, q, k, v)


# ---------------------------------------------------------------------------
# Kernel 3: output projection (the packed layout already IS the concat of heads)
# ---------------------------------------------------------------------------
def _out_proj_kernel(x_ref, w_ref, b_ref, o_ref):
    acc = jnp.dot(x_ref[...], w_ref[...], preferred_element_type=jnp.float32)
    o_ref[...] = (acc + b_ref[...]).astype(o_ref.dtype)


def _out_proj(x2, w, b, *, out_dtype, block_rows, vmem_limit):
    n, d_in = x2.shape
    d_out = w.shape[1]
    tp = _row_tile(n, block_rows)
    return pl.pallas_call(
        _out_proj_kernel,
        out_shape=jax.ShapeDtypeStruct((n, d_out), out_dtype),
        grid_spec=pltpu.PrefetchScalarGridSpec(
            num_scalar_prefetch=0,
            grid=(n // tp,),
            in_specs=[
                pl.BlockSpec((tp, d_in), lambda i: (i, 0)),
                pl.BlockSpec((d_in, d_out), lambda i: (0, 0)),
                pl.BlockSpec((1, d_out), lambda i: (0, 0)),
            ],
            out_specs=pl.BlockSpec((tp, d_out), lambda i: (i, 0)),
        ),
        compiler_params=pltpu.CompilerParams(
            dimension_semantics=("parallel",),
            vmem_limit_bytes=vmem_limit,
        ),
    )(x2, w, b)


# ---------------------------------------------------------------------------
# Full MultiHeadAttention forward
# ---------------------------------------------------------------------------
@functools.partial(jax.jit, static_argnames=("d_model", "masked", "block_rows",
                                              "block_q", "block_k", "compute_dtype"))
def multi_head_attention_forward(x, wq, wk, wv, wo, bo, *, d_model, masked=True,
                                 block_rows=256, block_q=256, block_k=256,
                                 compute_dtype=jnp.bfloat16):
    """x: (B, T, d_model).
    wq/wk/wv: (H, d_model, head_dim)  per-head projection weights (x @ w), no bias.
    wo: (H*head_dim, d_model), bo: (d_model,)  output projection (x @ wo + bo).
    """
    B, T, D = x.shape
    H, _, Hd = wq.shape
    Dh = H * Hd                       # width of the packed (concatenated) head layout
    out_dtype = x.dtype
    cdt = compute_dtype
    vmem_limit = _vmem_limit_bytes()
    group = _head_group(H, Hd)

    # Fold the score scale into Wq (the module divides by sqrt(d_model), NOT sqrt(head_dim)).
    scale = 1.0 / math.sqrt(float(d_model))

    def pack(w, s=1.0):
        # (H, D, Hd) -> (D, H*Hd): head h occupies columns [h*Hd, (h+1)*Hd) (== torch.cat order).
        return (jnp.transpose(w, (1, 0, 2)).reshape(D, Dh) * s).astype(cdt)

    wq_p, wk_p, wv_p = pack(wq, scale), pack(wk), pack(wv)
    wo_p = wo.astype(cdt)
    bo_p = bo.astype(jnp.float32).reshape(1, -1)

    # 1) fused Q/K/V projection over flattened (B*T) rows (bigger M tiles when T is short).
    x2 = x.astype(cdt).reshape(B * T, D)
    q2, k2, v2 = _qkv_proj(x2, wq_p, wk_p, wv_p, block_rows=block_rows, vmem_limit=vmem_limit)

    # 2) flash attention in the packed (B, T, H*Hd) layout (no head padding, no transposes).
    attn = _flash_attention(q2.reshape(B, T, Dh), k2.reshape(B, T, Dh), v2.reshape(B, T, Dh),
                            num_heads=H, head_dim=Hd, group=group, masked=masked,
                            block_q=block_q, block_k=block_k, vmem_limit=vmem_limit)

    # 3) output projection; packed attn is already the concat of heads.
    out2 = _out_proj(attn.reshape(B * T, Dh), wo_p, bo_p, out_dtype=out_dtype,
                     block_rows=block_rows, vmem_limit=vmem_limit)
    return out2.reshape(B, T, wo.shape[1])


# ---------------------------------------------------------------------------
# Pure-JAX reference mirroring the PyTorch forward
# ---------------------------------------------------------------------------
def reference_mha(x, wq, wk, wv, wo, bo, *, d_model, masked=True):
    H = wq.shape[0]
    T = x.shape[1]
    outs = []
    for h in range(H):
        q = x @ wq[h]
        k = x @ wk[h]
        v = x @ wv[h]
        w = jnp.einsum("btd,bsd->bts", q, k) / jnp.sqrt(jnp.float32(d_model))
        if masked:
            w = jnp.where(jnp.tril(jnp.ones((T, T), dtype=bool)), w, -jnp.inf)
        w = jax.nn.softmax(w, axis=-1)
        outs.append(w @ v)
    return jnp.concatenate(outs, axis=-1) @ wo + bo


if __name__ == "__main__":
    def run_case(name, B, T, d_model, num_heads, masked, key, *,
                 compute_dtype=jnp.bfloat16, atol=5e-2, rtol=5e-2, **blocks):
        H = num_heads
        Hd = d_model // H
        kx, kq, kk, kv, ko, kb = jax.random.split(key, 6)
        x = jax.random.normal(kx, (B, T, d_model), jnp.float32)
        wq = jax.random.normal(kq, (H, d_model, Hd), jnp.float32) * 0.05
        wk = jax.random.normal(kk, (H, d_model, Hd), jnp.float32) * 0.05
        wv = jax.random.normal(kv, (H, d_model, Hd), jnp.float32) * 0.05
        wo = jax.random.normal(ko, (H * Hd, d_model), jnp.float32) * 0.05
        bo = jax.random.normal(kb, (d_model,), jnp.float32) * 0.05

        out = multi_head_attention_forward(x, wq, wk, wv, wo, bo, d_model=d_model,
                                           masked=masked, compute_dtype=compute_dtype, **blocks)
        out = jax.block_until_ready(out)

        ref = reference_mha(x, wq, wk, wv, wo, bo, d_model=d_model, masked=masked)
        assert out.shape == ref.shape, (name, out.shape, ref.shape)
        max_err = float(jnp.max(jnp.abs(out.astype(jnp.float32) - ref)))
        bound = atol + rtol * float(jnp.max(jnp.abs(ref)))
        assert max_err <= bound, (name, max_err, bound)

    root = jax.random.PRNGKey(0)
    k1, k2, k3, k4 = jax.random.split(root, 4)
    # Multi-tile causal, head_dim=128 (group=1), bf16 compute path.
    run_case("hd128_bf16", B=2, T=256, d_model=256, num_heads=2, masked=True, key=k1,
             block_q=128, block_k=128)
    # head_dim=64: two heads share one 128-lane tile (group=2), multi-tile causal, bf16.
    run_case("hd64_grouped", B=2, T=128, d_model=128, num_heads=2, masked=True, key=k2,
             block_q=64, block_k=64)
    # Exact-math check on the f32 opt-in path.
    run_case("f32_exact", B=1, T=128, d_model=128, num_heads=2, masked=True, key=k3,
             compute_dtype=jnp.float32, atol=5e-4, rtol=5e-4)
    # Unmasked (encoder-style) path.
    run_case("unmasked", B=1, T=128, d_model=128, num_heads=2, masked=False, key=k4,
             block_q=64, block_k=64)

    print("KERNEL_OK")
</pallas_src>

<mosaic_0001>
module attributes {stable_mosaic.version = 11 : i64} {
  func.func @_qkv_proj_kernel(%arg0: i32, %arg1: memref<256x256xbf16, #tpu.memory_space<vmem>>, %arg2: memref<256x256xbf16, #tpu.memory_space<vmem>>, %arg3: memref<256x256xbf16, #tpu.memory_space<vmem>>, %arg4: memref<256x256xbf16, #tpu.memory_space<vmem>>, %arg5: memref<256x256xbf16, #tpu.memory_space<vmem>>, %arg6: memref<256x256xbf16, #tpu.memory_space<vmem>>, %arg7: memref<256x256xbf16, #tpu.memory_space<vmem>>) attributes {dimension_semantics = [#tpu.dimension_semantics<parallel>], iteration_bounds = array<i64: 2>, scalar_prefetch = 0 : i64, scratch_operands = 0 : i64, tpu.core_type = #tpu.core_type<tc>, window_params = [{transform_indices = @transform_0, window_bounds = array<i64: 256, 256>}, {pipeline_mode = #tpu.pipeline_mode<synchronous>, transform_indices = @transform_1, window_bounds = array<i64: 256, 256>}, {pipeline_mode = #tpu.pipeline_mode<synchronous>, transform_indices = @transform_2, window_bounds = array<i64: 256, 256>}, {pipeline_mode = #tpu.pipeline_mode<synchronous>, transform_indices = @transform_3, window_bounds = array<i64: 256, 256>}, {transform_indices = @transform_4, window_bounds = array<i64: 256, 256>}, {transform_indices = @transform_5, window_bounds = array<i64: 256, 256>}, {transform_indices = @transform_6, window_bounds = array<i64: 256, 256>}]} {
    %c0 = arith.constant 0 : index
    %c0_0 = arith.constant 0 : index
    %0 = vector.load %arg1[%c0, %c0_0] : memref<256x256xbf16, #tpu.memory_space<vmem>>, vector<256x256xbf16>
    %c0_1 = arith.constant 0 : index
    %c0_2 = arith.constant 0 : index
    %1 = vector.load %arg2[%c0_1, %c0_2] : memref<256x256xbf16, #tpu.memory_space<vmem>>, vector<256x256xbf16>
    %cst = arith.constant dense<0.000000e+00> : vector<256x256xf32>
    %2 = tpu.matmul %0, %1, %cst {dimension_numbers = #tpu.dot_dimension_numbers<[1], [0], [0], [1], [0, 0, 1, 1], [], []>} : vector<256x256xbf16>, vector<256x256xbf16>, vector<256x256xf32> -> vector<256x256xf32>
    %3 = arith.truncf %2 : vector<256x256xf32> to vector<256x256xbf16>
    %c0_3 = arith.constant 0 : index
    %c0_4 = arith.constant 0 : index
    %4 = vector.load %arg5[%c0_3, %c0_4] : memref<256x256xbf16, #tpu.memory_space<vmem>>, vector<256x256xbf16>
    tpu.vector_store %arg5[%c0_3, %c0_4], %3 {strides = array<i32>} : memref<256x256xbf16, #tpu.memory_space<vmem>>, vector<256x256xbf16>,
    %c0_5 = arith.constant 0 : index
    %c0_6 = arith.constant 0 : index
    %5 = vector.load %arg3[%c0_5, %c0_6] : memref<256x256xbf16, #tpu.memory_space<vmem>>, vector<256x256xbf16>
    %cst_7 = arith.constant dense<0.000000e+00> : vector<256x256xf32>
    %6 = tpu.matmul %0, %5, %cst_7 {dimension_numbers = #tpu.dot_dimension_numbers<[1], [0], [0], [1], [0, 0, 1, 1], [], []>} : vector<256x256xbf16>, vector<256x256xbf16>, vector<256x256xf32> -> vector<256x256xf32>
    %7 = arith.truncf %6 : vector<256x256xf32> to vector<256x256xbf16>
    %c0_8 = arith.constant 0 : index
    %c0_9 = arith.constant 0 : index
    %8 = vector.load %arg6[%c0_8, %c0_9] : memref<256x256xbf16, #tpu.memory_space<vmem>>, vector<256x256xbf16>
    tpu.vector_store %arg6[%c0_8, %c0_9], %7 {strides = array<i32>} : memref<256x256xbf16, #tpu.memory_space<vmem>>, vector<256x256xbf16>,
    %c0_10 = arith.constant 0 : index
    %c0_11 = arith.constant 0 : index
    %9 = vector.load %arg4[%c0_10, %c0_11] : memref<256x256xbf16, #tpu.memory_space<vmem>>, vector<256x256xbf16>
    %cst_12 = arith.constant dense<0.000000e+00> : vector<256x256xf32>
    %10 = tpu.matmul %0, %9, %cst_12 {dimension_numbers = #tpu.dot_dimension_numbers<[1], [0], [0], [1], [0, 0, 1, 1], [], []>} : vector<256x256xbf16>, vector<256x256xbf16>, vector<256x256xf32> -> vector<256x256xf32>
    %11 = arith.truncf %10 : vector<256x256xf32> to vector<256x256xbf16>
    %c0_13 = arith.constant 0 : index
    %c0_14 = arith.constant 0 : index
    %12 = vector.load %arg7[%c0_13, %c0_14] : memref<256x256xbf16, #tpu.memory_space<vmem>>, vector<256x256xbf16>
    tpu.vector_store %arg7[%c0_13, %c0_14], %11 {strides = array<i32>} : memref<256x256xbf16, #tpu.memory_space<vmem>>, vector<256x256xbf16>,
    return
  }
  func.func @transform_0(%arg0: i32) -> (i32, i32) {
    %c0_i32 = arith.constant 0 : i32
    %c0_i32_0 = arith.constant 0 : i32
    return %arg0, %c0_i32 : i32, i32
  }
  func.func @transform_1(%arg0: i32) -> (i32, i32) {
    %c0_i32 = arith.constant 0 : i32
    %c0_i32_0 = arith.constant 0 : i32
    %c0_i32_1 = arith.constant 0 : i32
    return %c0_i32, %c0_i32_0 : i32, i32
  }
  func.func @transform_2(%arg0: i32) -> (i32, i32) {
    %c0_i32 = arith.constant 0 : i32
    %c0_i32_0 = arith.constant 0 : i32
    %c0_i32_1 = arith.constant 0 : i32
    return %c0_i32, %c0_i32_0 : i32, i32
  }
  func.func @transform_3(%arg0: i32) -> (i32, i32) {
    %c0_i32 = arith.constant 0 : i32
    %c0_i32_0 = arith.constant 0 : i32
    %c0_i32_1 = arith.constant 0 : i32
    return %c0_i32, %c0_i32_0 : i32, i32
  }
  func.func @transform_4(%arg0: i32) -> (i32, i32) {
    %c0_i32 = arith.constant 0 : i32
    %c0_i32_0 = arith.constant 0 : i32
    return %arg0, %c0_i32 : i32, i32
  }
  func.func @transform_5(%arg0: i32) -> (i32, i32) {
    %c0_i32 = arith.constant 0 : i32
    %c0_i32_0 = arith.constant 0 : i32
    return %arg0, %c0_i32 : i32, i32
  }
  func.func @transform_6(%arg0: i32) -> (i32, i32) {
    %c0_i32 = arith.constant 0 : i32
    %c0_i32_0 = arith.constant 0 : i32
    return %arg0, %c0_i32 : i32, i32
  }
}

module attributes {stable_mosaic.version = 11 : i64} {
  func.func @_flash_kernel(%arg0: i32, %arg1: i32, %arg2: i32, %arg3: memref<3xi32, #tpu.memory_space<smem>>, %arg4: memref<3xi32, #tpu.memory_space<smem>>, %arg5: memref<1x128x128xbf16, #tpu.memory_space<vmem>>, %arg6: memref<1x128x128xbf16, #tpu.memory_space<vmem>>, %arg7: memref<1x128x128xbf16, #tpu.memory_space<vmem>>, %arg8: memref<1x128x128xbf16, #tpu.memory_space<vmem>>, %arg9: memref<1x128x1xf32, #tpu.memory_space<vmem>>, %arg10: memref<1x128x1xf32, #tpu.memory_space<vmem>>, %arg11: memref<1x128x128xf32, #tpu.memory_space<vmem>>) attributes {dimension_semantics = [#tpu.dimension_semantics<parallel>, #tpu.dimension_semantics<parallel>, #tpu.dimension_semantics<arbitrary>], iteration_bounds = array<i64: 2, 2, 3>, scalar_prefetch = 2 : i64, scratch_operands = 3 : i64, tpu.core_type = #tpu.core_type<tc>, window_params = [{transform_indices = @transform_0, window_bounds = array<i64: 1, 128, 128>}, {transform_indices = @transform_1, window_bounds = array<i64: 1, 128, 128>}, {transform_indices = @transform_2, window_bounds = array<i64: 1, 128, 128>}, {transform_indices = @transform_3, window_bounds = array<i64: 1, 128, 128>}]} {
    %0 = arith.index_cast %arg2 : i32 to index
    %1 = memref.load %arg3[%0] : memref<3xi32, #tpu.memory_space<smem>>
    %2 = arith.index_cast %arg2 : i32 to index
    %3 = memref.load %arg4[%2] : memref<3xi32, #tpu.memory_space<smem>>
    %c0_i32 = arith.constant 0 : i32
    %4 = arith.cmpi eq, %3, %c0_i32 : i32
    %5 = arith.extui %4 : i1 to i32
    %c0_i32_0 = arith.constant 0 : i32
    %6 = arith.cmpi ne, %5, %c0_i32_0 : i32
    scf.if %6 {
      %cst = arith.constant 0xFF800000 : f32
      %16 = vector.broadcast %cst : f32 to vector<1x128x1xf32>
      %c0 = arith.constant 0 : index
      %c0_4 = arith.constant 0 : index
      %c0_5 = arith.constant 0 : index
      %17 = vector.load %arg9[%c0, %c0_4, %c0_5] : memref<1x128x1xf32, #tpu.memory_space<vmem>>, vector<1x128x1xf32>
      tpu.vector_store %arg9[%c0, %c0_4, %c0_5], %16 {strides = array<i32>} : memref<1x128x1xf32, #tpu.memory_space<vmem>>, vector<1x128x1xf32>,
      %cst_6 = arith.constant 0.000000e+00 : f32
      %18 = vector.broadcast %cst_6 : f32 to vector<1x128x1xf32>
      %c0_7 = arith.constant 0 : index
      %c0_8 = arith.constant 0 : index
      %c0_9 = arith.constant 0 : index
      %19 = vector.load %arg10[%c0_7, %c0_8, %c0_9] : memref<1x128x1xf32, #tpu.memory_space<vmem>>, vector<1x128x1xf32>
      tpu.vector_store %arg10[%c0_7, %c0_8, %c0_9], %18 {strides = array<i32>} : memref<1x128x1xf32, #tpu.memory_space<vmem>>, vector<1x128x1xf32>,
      %cst_10 = arith.constant 0.000000e+00 : f32
      %20 = vector.broadcast %cst_10 : f32 to vector<1x128x128xf32>
      %c0_11 = arith.constant 0 : index
      %c0_12 = arith.constant 0 : index
      %c0_13 = arith.constant 0 : index
      %21 = vector.load %arg11[%c0_11, %c0_12, %c0_13] : memref<1x128x128xf32, #tpu.memory_space<vmem>>, vector<1x128x128xf32>
      tpu.vector_store %arg11[%c0_11, %c0_12, %c0_13], %20 {strides = array<i32>} : memref<1x128x128xf32, #tpu.memory_space<vmem>>, vector<1x128x128xf32>,
    } else {
    }
    %7 = arith.cmpi slt, %3, %1 : i32
    %8 = arith.extui %7 : i1 to i32
    %c0_i32_1 = arith.constant 0 : i32
    %9 = arith.cmpi ne, %8, %c0_i32_1 : i32
    scf.if %9 {
      %c0 = arith.constant 0 : index
      %c0_4 = arith.constant 0 : index
      %c0_5 = arith.constant 0 : index
      %16 = vector.load %arg5[%c0, %c0_4, %c0_5] : memref<1x128x128xbf16, #tpu.memory_space<vmem>>, vector<1x128x128xbf16>
      %17 = vector.shape_cast %16 : vector<1x128x128xbf16> to vector<128x128xbf16>
      %c0_6 = arith.constant 0 : index
      %c0_7 = arith.constant 0 : index
      %c0_8 = arith.constant 0 : index
      %18 = vector.load %arg6[%c0_6, %c0_7, %c0_8] : memref<1x128x128xbf16, #tpu.memory_space<vmem>>, vector<1x128x128xbf16>
      %19 = vector.shape_cast %18 : vector<1x128x128xbf16> to vector<128x128xbf16>
      %c0_9 = arith.constant 0 : index
      %c0_10 = arith.constant 0 : index
      %c0_11 = arith.constant 0 : index
      %20 = vector.load %arg7[%c0_9, %c0_10, %c0_11] : memref<1x128x128xbf16, #tpu.memory_space<vmem>>, vector<1x128x128xbf16>
      %21 = vector.shape_cast %20 : vector<1x128x128xbf16> to vector<128x128xbf16>
      %cst = arith.constant dense<0.000000e+00> : vector<128x128xf32>
      %22 = tpu.matmul %17, %19, %cst {dimension_numbers = #tpu.dot_dimension_numbers<[1], [1], [0], [0], [0, 0, 1, 0], [], []>} : vector<128x128xbf16>, vector<128x128xbf16>, vector<128x128xf32> -> vector<128x128xf32>
      %c0_12 = arith.constant 0 : index
      %c0_13 = arith.constant 0 : index
      %c0_14 = arith.constant 0 : index
      %23 = vector.load %arg9[%c0_12, %c0_13, %c0_14] : memref<1x128x1xf32, #tpu.memory_space<vmem>>, vector<1x128x1xf32>
      %24 = vector.shape_cast %23 : vector<1x128x1xf32> to vector<128x1xf32>
      %cst_15 = arith.constant dense<0xFF800000> : vector<128xf32>
      %25 = vector.multi_reduction <maximumf>, %22, %cst_15 [1] : vector<128x128xf32> to vector<128xf32>
      %26 = vector.shape_cast %25 : vector<128xf32> to vector<128x1xf32>
      %27 = arith.maximumf %24, %26 : vector<128x1xf32>
      %28 = arith.subf %24, %27 : vector<128x1xf32>
      %29 = math.exp %28 : vector<128x1xf32>
      %30 = vector.broadcast %27 : vector<128x1xf32> to vector<128x128xf32>
      %31 = arith.subf %22, %30 : vector<128x128xf32>
      %32 = math.exp %31 : vector<128x128xf32>
      %c0_16 = arith.constant 0 : index
      %c0_17 = arith.constant 0 : index
      %c0_18 = arith.constant 0 : index
      %33 = vector.load %arg10[%c0_16, %c0_17, %c0_18] : memref<1x128x1xf32, #tpu.memory_space<vmem>>, vector<1x128x1xf32>
      %34 = vector.shape_cast %33 : vector<1x128x1xf32> to vector<128x1xf32>
      %35 = arith.mulf %29, %34 : vector<128x1xf32>
      %cst_19 = arith.constant dense<0.000000e+00> : vector<128xf32>
      %36 = vector.multi_reduction <add>, %32, %cst_19 [1] : vector<128x128xf32> to vector<128xf32>
      %37 = vector.shape_cast %36 : vector<128xf32> to vector<128x1xf32>
      %38 = arith.addf %35, %37 : vector<128x1xf32>
      %c0_20 = arith.constant 0 : index
      %c0_21 = arith.constant 0 : index
      %c0_22 = arith.constant 0 : index
      %39 = vector.load %arg10[%c0_20, %c0_21, %c0_22] : memref<1x128x1xf32, #tpu.memory_space<vmem>>, vector<1x128x1xf32>
      %40 = vector.shape_cast %39 : vector<1x128x1xf32> to vector<128x1xf32>
      %41 = vector.shape_cast %38 : vector<128x1xf32> to vector<1x128x1xf32>
      tpu.vector_store %arg10[%c0_20, %c0_21, %c0_22], %41 {strides = array<i32>} : memref<1x128x1xf32, #tpu.memory_space<vmem>>, vector<1x128x1xf32>,
      %c0_23 = arith.constant 0 : index
      %c0_24 = arith.constant 0 : index
      %c0_25 = arith.constant 0 : index
      %42 = vector.load %arg11[%c0_23, %c0_24, %c0_25] : memref<1x128x128xf32, #tpu.memory_space<vmem>>, vector<1x128x128xf32>
      %43 = vector.shape_cast %42 : vector<1x128x128xf32> to vector<128x128xf32>
      %44 = vector.broadcast %29 : vector<128x1xf32> to vector<128x128xf32>
      %45 = arith.mulf %44, %43 : vector<128x128xf32>
      %46 = arith.truncf %32 : vector<128x128xf32> to vector<128x128xbf16>
      %cst_26 = arith.constant dense<0.000000e+00> : vector<128x128xf32>
      %47 = tpu.matmul %46, %21, %cst_26 {dimension_numbers = #tpu.dot_dimension_numbers<[1], [0], [0], [1], [0, 0, 1, 1], [], []>} : vector<128x128xbf16>, vector<128x128xbf16>, vector<128x128xf32> -> vector<128x128xf32>
      %48 = arith.addf %45, %47 : vector<128x128xf32>
      %c0_27 = arith.constant 0 : index
      %c0_28 = arith.constant 0 : index
      %c0_29 = arith.constant 0 : index
      %49 = vector.load %arg11[%c0_27, %c0_28, %c0_29] : memref<1x128x128xf32, #tpu.memory_space<vmem>>, vector<1x128x128xf32>
      %50 = vector.shape_cast %49 : vector<1x128x128xf32> to vector<128x128xf32>
      %51 = vector.shape_cast %48 : vector<128x128xf32> to vector<1x128x128xf32>
      tpu.vector_store %arg11[%c0_27, %c0_28, %c0_29], %51 {strides = array<i32>} : memref<1x128x128xf32, #tpu.memory_space<vmem>>, vector<1x128x128xf32>,
      %c0_30 = arith.constant 0 : index
      %c0_31 = arith.constant 0 : index
      %c0_32 = arith.constant 0 : index
      %52 = vector.load %arg9[%c0_30, %c0_31, %c0_32] : memref<1x128x1xf32, #tpu.memory_space<vmem>>, vector<1x128x1xf32>
      %53 = vector.shape_cast %52 : vector<1x128x1xf32> to vector<128x1xf32>
      %54 = vector.shape_cast %27 : vector<128x1xf32> to vector<1x128x1xf32>
      tpu.vector_store %arg9[%c0_30, %c0_31, %c0_32], %54 {strides = array<i32>} : memref<1x128x1xf32, #tpu.memory_space<vmem>>, vector<1x128x1xf32>,
    } else {
    }
    %10 = arith.cmpi eq, %3, %1 : i32
    %11 = arith.extui %10 : i1 to i32
    %c0_i32_2 = arith.constant 0 : i32
    %12 = arith.cmpi ne, %11, %c0_i32_2 : i32
    scf.if %12 {
      %c0 = arith.constant 0 : index
      %c0_4 = arith.constant 0 : index
      %c0_5 = arith.constant 0 : index
      %16 = vector.load %arg5[%c0, %c0_4, %c0_5] : memref<1x128x128xbf16, #tpu.memory_space<vmem>>, vector<1x128x128xbf16>
      %17 = vector.shape_cast %16 : vector<1x128x128xbf16> to vector<128x128xbf16>
      %c0_6 = arith.constant 0 : index
      %c0_7 = arith.constant 0 : index
      %c0_8 = arith.constant 0 : index
      %18 = vector.load %arg6[%c0_6, %c0_7, %c0_8] : memref<1x128x128xbf16, #tpu.memory_space<vmem>>, vector<1x128x128xbf16>
      %19 = vector.shape_cast %18 : vector<1x128x128xbf16> to vector<128x128xbf16>
      %c0_9 = arith.constant 0 : index
      %c0_10 = arith.constant 0 : index
      %c0_11 = arith.constant 0 : index
      %20 = vector.load %arg7[%c0_9, %c0_10, %c0_11] : memref<1x128x128xbf16, #tpu.memory_space<vmem>>, vector<1x128x128xbf16>
      %21 = vector.shape_cast %20 : vector<1x128x128xbf16> to vector<128x128xbf16>
      %22 = tpu.iota {dimensions = array<i32: 0>} : vector<128x128xi32>
      %23 = tpu.iota {dimensions = array<i32: 1>} : vector<128x128xi32>
      %24 = arith.cmpi sle, %23, %22 : vector<128x128xi32>
      %cst = arith.constant dense<0.000000e+00> : vector<128x128xf32>
      %25 = tpu.matmul %17, %19, %cst {dimension_numbers = #tpu.dot_dimension_numbers<[1], [1], [0], [0], [0, 0, 1, 0], [], []>} : vector<128x128xbf16>, vector<128x128xbf16>, vector<128x128xf32> -> vector<128x128xf32>
      %cst_12 = arith.constant -1.000000e+30 : f32
      %26 = vector.broadcast %cst_12 : f32 to vector<128x128xf32>
      %27 = arith.select %24, %25, %26 : vector<128x128xi1>, vector<128x128xf32>
      %c0_13 = arith.constant 0 : index
      %c0_14 = arith.constant 0 : index
      %c0_15 = arith.constant 0 : index
      %28 = vector.load %arg9[%c0_13, %c0_14, %c0_15] : memref<1x128x1xf32, #tpu.memory_space<vmem>>, vector<1x128x1xf32>
      %29 = vector.shape_cast %28 : vector<1x128x1xf32> to vector<128x1xf32>
      %cst_16 = arith.constant dense<0xFF800000> : vector<128xf32>
      %30 = vector.multi_reduction <maximumf>, %27, %cst_16 [1] : vector<128x128xf32> to vector<128xf32>
      %31 = vector.shape_cast %30 : vector<128xf32> to vector<128x1xf32>
      %32 = arith.maximumf %29, %31 : vector<128x1xf32>
      %33 = arith.subf %29, %32 : vector<128x1xf32>
      %34 = math.exp %33 : vector<128x1xf32>
      %35 = vector.broadcast %32 : vector<128x1xf32> to vector<128x128xf32>
      %36 = arith.subf %27, %35 : vector<128x128xf32>
      %37 = math.exp %36 : vector<128x128xf32>
      %c0_17 = arith.constant 0 : index
      %c0_18 = arith.constant 0 : index
      %c0_19 = arith.constant 0 : index
      %38 = vector.load %arg10[%c0_17, %c0_18, %c0_19] : memref<1x128x1xf32, #tpu.memory_space<vmem>>, vector<1x128x1xf32>
      %39 = vector.shape_cast %38 : vector<1x128x1xf32> to vector<128x1xf32>
      %40 = arith.mulf %34, %39 : vector<128x1xf32>
      %cst_20 = arith.constant dense<0.000000e+00> : vector<128xf32>
      %41 = vector.multi_reduction <add>, %37, %cst_20 [1] : vector<128x128xf32> to vector<128xf32>
      %42 = vector.shape_cast %41 : vector<128xf32> to vector<128x1xf32>
      %43 = arith.addf %40, %42 : vector<128x1xf32>
      %c0_21 = arith.constant 0 : index
      %c0_22 = arith.constant 0 : index
      %c0_23 = arith.constant 0 : index
      %44 = vector.load %arg10[%c0_21, %c0_22, %c0_23] : memref<1x128x1xf32, #tpu.memory_space<vmem>>, vector<1x128x1xf32>
      %45 = vector.shape_cast %44 : vector<1x128x1xf32> to vector<128x1xf32>
      %46 = vector.shape_cast %43 : vector<128x1xf32> to vector<1x128x1xf32>
      tpu.vector_store %arg10[%c0_21, %c0_22, %c0_23], %46 {strides = array<i32>} : memref<1x128x1xf32, #tpu.memory_space<vmem>>, vector<1x128x1xf32>,
      %c0_24 = arith.constant 0 : index
      %c0_25 = arith.constant 0 : index
      %c0_26 = arith.constant 0 : index
      %47 = vector.load %arg11[%c0_24, %c0_25, %c0_26] : memref<1x128x128xf32, #tpu.memory_space<vmem>>, vector<1x128x128xf32>
      %48 = vector.shape_cast %47 : vector<1x128x128xf32> to vector<128x128xf32>
      %49 = vector.broadcast %34 : vector<128x1xf32> to vector<128x128xf32>
      %50 = arith.mulf %49, %48 : vector<128x128xf32>
      %51 = arith.truncf %37 : vector<128x128xf32> to vector<128x128xbf16>
      %cst_27 = arith.constant dense<0.000000e+00> : vector<128x128xf32>
      %52 = tpu.matmul %51, %21, %cst_27 {dimension_numbers = #tpu.dot_dimension_numbers<[1], [0], [0], [1], [0, 0, 1, 1], [], []>} : vector<128x128xbf16>, vector<128x128xbf16>, vector<128x128xf32> -> vector<128x128xf32>
      %53 = arith.addf %50, %52 : vector<128x128xf32>
      %c0_28 = arith.constant 0 : index
      %c0_29 = arith.constant 0 : index
      %c0_30 = arith.constant 0 : index
      %54 = vector.load %arg11[%c0_28, %c0_29, %c0_30] : memref<1x128x128xf32, #tpu.memory_space<vmem>>, vector<1x128x128xf32>
      %55 = vector.shape_cast %54 : vector<1x128x128xf32> to vector<128x128xf32>
      %56 = vector.shape_cast %53 : vector<128x128xf32> to vector<1x128x128xf32>
      tpu.vector_store %arg11[%c0_28, %c0_29, %c0_30], %56 {strides = array<i32>} : memref<1x128x128xf32, #tpu.memory_space<vmem>>, vector<1x128x128xf32>,
      %c0_31 = arith.constant 0 : index
      %c0_32 = arith.constant 0 : index
      %c0_33 = arith.constant 0 : index
      %57 = vector.load %arg9[%c0_31, %c0_32, %c0_33] : memref<1x128x1xf32, #tpu.memory_space<vmem>>, vector<1x128x1xf32>
      %58 = vector.shape_cast %57 : vector<1x128x1xf32> to vector<128x1xf32>
      %59 = vector.shape_cast %32 : vector<128x1xf32> to vector<1x128x1xf32>
      tpu.vector_store %arg9[%c0_31, %c0_32, %c0_33], %59 {strides = array<i32>} : memref<1x128x1xf32, #tpu.memory_space<vmem>>, vector<1x128x1xf32>,
    } else {
    }
    %13 = arith.cmpi eq, %3, %1 : i32
    %14 = arith.extui %13 : i1 to i32
    %c0_i32_3 = arith.constant 0 : i32
    %15 = arith.cmpi ne, %14, %c0_i32_3 : i32
    scf.if %15 {
      %c0 = arith.constant 0 : index
      %c0_4 = arith.constant 0 : index
      %c0_5 = arith.constant 0 : index
      %16 = vector.load %arg10[%c0, %c0_4, %c0_5] : memref<1x128x1xf32, #tpu.memory_space<vmem>>, vector<1x128x1xf32>
      %17 = vector.shape_cast %16 : vector<1x128x1xf32> to vector<128x1xf32>
      %18 = tpu.reciprocal %17 {approx = true} : vector<128x1xf32> -> vector<128x1xf32>
      %19 = arith.mulf %17, %18 : vector<128x1xf32>
      %cst = arith.constant 2.000000e+00 : f32
      %20 = vector.broadcast %cst : f32 to vector<128x1xf32>
      %21 = arith.subf %20, %19 : vector<128x1xf32>
      %22 = arith.mulf %18, %21 : vector<128x1xf32>
      %c0_6 = arith.constant 0 : index
      %c0_7 = arith.constant 0 : index
      %c0_8 = arith.constant 0 : index
      %23 = vector.load %arg11[%c0_6, %c0_7, %c0_8] : memref<1x128x128xf32, #tpu.memory_space<vmem>>, vector<1x128x128xf32>
      %24 = vector.shape_cast %23 : vector<1x128x128xf32> to vector<128x128xf32>
      %25 = vector.broadcast %22 : vector<128x1xf32> to vector<128x128xf32>
      %26 = arith.mulf %24, %25 : vector<128x128xf32>
      %27 = arith.truncf %26 : vector<128x128xf32> to vector<128x128xbf16>
      %c0_9 = arith.constant 0 : index
      %c0_10 = arith.constant 0 : index
      %c0_11 = arith.constant 0 : index
      %28 = vector.load %arg8[%c0_9, %c0_10, %c0_11] : memref<1x128x128xbf16, #tpu.memory_space<vmem>>, vector<1x128x128xbf16>
      %29 = vector.shape_cast %28 : vector<1x128x128xbf16> to vector<128x128xbf16>
      %30 = vector.shape_cast %27 : vector<128x128xbf16> to vector<1x128x128xbf16>
      tpu.vector_store %arg8[%c0_9, %c0_10, %c0_11], %30 {strides = array<i32>} : memref<1x128x128xbf16, #tpu.memory_space<vmem>>, vector<1x128x128xbf16>,
    } else {
    }
    return
  }
  func.func @transform_0(%arg0: i32, %arg1: i32, %arg2: i32, %arg3: memref<3xi32, #tpu.memory_space<smem>>, %arg4: memref<3xi32, #tpu.memory_space<smem>>) -> (i32, i32, i32) {
    %0 = arith.index_cast %arg2 : i32 to index
    %1 = memref.load %arg3[%0] : memref<3xi32, #tpu.memory_space<smem>>
    %c0_i32 = arith.constant 0 : i32
    return %arg0, %1, %arg1 : i32, i32, i32
  }
  func.func @transform_1(%arg0: i32, %arg1: i32, %arg2: i32, %arg3: memref<3xi32, #tpu.memory_space<smem>>, %arg4: memref<3xi32, #tpu.memory_space<smem>>) -> (i32, i32, i32) {
    %0 = arith.index_cast %arg2 : i32 to index
    %1 = memref.load %arg4[%0] : memref<3xi32, #tpu.memory_space<smem>>
    %c0_i32 = arith.constant 0 : i32
    return %arg0, %1, %arg1 : i32, i32, i32
  }
  func.func @transform_2(%arg0: i32, %arg1: i32, %arg2: i32, %arg3: memref<3xi32, #tpu.memory_space<smem>>, %arg4: memref<3xi32, #tpu.memory_space<smem>>) -> (i32, i32, i32) {
    %0 = arith.index_cast %arg2 : i32 to index
    %1 = memref.load %arg4[%0] : memref<3xi32, #tpu.memory_space<smem>>
    %c0_i32 = arith.constant 0 : i32
    return %arg0, %1, %arg1 : i32, i32, i32
  }
  func.func @transform_3(%arg0: i32, %arg1: i32, %arg2: i32, %arg3: memref<3xi32, #tpu.memory_space<smem>>, %arg4: memref<3xi32, #tpu.memory_space<smem>>) -> (i32, i32, i32) {
    %0 = arith.index_cast %arg2 : i32 to index
    %1 = memref.load %arg3[%0] : memref<3xi32, #tpu.memory_space<smem>>
    %c0_i32 = arith.constant 0 : i32
    return %arg0, %1, %arg1 : i32, i32, i32
  }
}

module attributes {stable_mosaic.version = 11 : i64} {
  func.func @_out_proj_kernel(%arg0: i32, %arg1: memref<256x256xbf16, #tpu.memory_space<vmem>>, %arg2: memref<256x256xbf16, #tpu.memory_space<vmem>>, %arg3: memref<1x256xf32, #tpu.memory_space<vmem>>, %arg4: memref<256x256xf32, #tpu.memory_space<vmem>>) attributes {dimension_semantics = [#tpu.dimension_semantics<parallel>], iteration_bounds = array<i64: 2>, scalar_prefetch = 0 : i64, scratch_operands = 0 : i64, tpu.core_type = #tpu.core_type<tc>, window_params = [{transform_indices = @transform_0, window_bounds = array<i64: 256, 256>}, {pipeline_mode = #tpu.pipeline_mode<synchronous>, transform_indices = @transform_1, window_bounds = array<i64: 256, 256>}, {pipeline_mode = #tpu.pipeline_mode<synchronous>, transform_indices = @transform_2, window_bounds = array<i64: 1, 256>}, {transform_indices = @transform_3, window_bounds = array<i64: 256, 256>}]} {
    %c0 = arith.constant 0 : index
    %c0_0 = arith.constant 0 : index
    %0 = vector.load %arg1[%c0, %c0_0] : memref<256x256xbf16, #tpu.memory_space<vmem>>, vector<256x256xbf16>
    %c0_1 = arith.constant 0 : index
    %c0_2 = arith.constant 0 : index
    %1 = vector.load %arg2[%c0_1, %c0_2] : memref<256x256xbf16, #tpu.memory_space<vmem>>, vector<256x256xbf16>
    %cst = arith.constant dense<0.000000e+00> : vector<256x256xf32>
    %2 = tpu.matmul %0, %1, %cst {dimension_numbers = #tpu.dot_dimension_numbers<[1], [0], [0], [1], [0, 0, 1, 1], [], []>} : vector<256x256xbf16>, vector<256x256xbf16>, vector<256x256xf32> -> vector<256x256xf32>
    %c0_3 = arith.constant 0 : index
    %c0_4 = arith.constant 0 : index
    %3 = vector.load %arg3[%c0_3, %c0_4] : memref<1x256xf32, #tpu.memory_space<vmem>>, vector<1x256xf32>
    %4 = vector.broadcast %3 : vector<1x256xf32> to vector<256x256xf32>
    %5 = arith.addf %2, %4 : vector<256x256xf32>
    %c0_5 = arith.constant 0 : index
    %c0_6 = arith.constant 0 : index
    %6 = vector.load %arg4[%c0_5, %c0_6] : memref<256x256xf32, #tpu.memory_space<vmem>>, vector<256x256xf32>
    tpu.vector_store %arg4[%c0_5, %c0_6], %5 {strides = array<i32>} : memref<256x256xf32, #tpu.memory_space<vmem>>, vector<256x256xf32>,
    return
  }
  func.func @transform_0(%arg0: i32) -> (i32, i32) {
    %c0_i32 = arith.constant 0 : i32
    %c0_i32_0 = arith.constant 0 : i32
    return %arg0, %c0_i32 : i32, i32
  }
  func.func @transform_1(%arg0: i32) -> (i32, i32) {
    %c0_i32 = arith.constant 0 : i32
    %c0_i32_0 = arith.constant 0 : i32
    %c0_i32_1 = arith.constant 0 : i32
    return %c0_i32, %c0_i32_0 : i32, i32
  }
  func.func @transform_2(%arg0: i32) -> (i32, i32) {
    %c0_i32 = arith.constant 0 : i32
    %c0_i32_0 = arith.constant 0 : i32
    %c0_i32_1 = arith.constant 0 : i32
    return %c0_i32, %c0_i32_0 : i32, i32
  }
  func.func @transform_3(%arg0: i32) -> (i32, i32) {
    %c0_i32 = arith.constant 0 : i32
    %c0_i32_0 = arith.constant 0 : i32
    return %arg0, %c0_i32 : i32, i32
  }
}

</mosaic_0001>

<bundles_post_ra>
// kernel: multi_head_attention_forward.5
= control target key start
LH: loop header
LB: loop body
LE: loop exit
PB: predicated region body
PF: predicated region fallthrough
CT: control target
= control target key end

     0   :  { %8 = vsyncpa [#allocation3], 0  ;;  %s1613_s0 = inlined_call_operand.vmem [shape: bf16[512,256], index: 0, kind: input, shape index: {}]   ;;  %s1614_s1 = inlined_call_operand.vmem [shape: bf16[256,256], index: 1, kind: input, shape index: {}]   ;;  %s1615_s2 = inlined_call_operand.vmem [shape: f32[1,256], index: 2, kind: input, shape index: {}]   ;;  %s1616_s3 = inlined_call_operand.hbm [shape: f32[512,256], index: 3, kind: output, shape index: {}]  }
   0x1   :  { %10 = vsyncpa [#allocation3 + $0x1], 0  ;;  %s1240_s12 = smov 0   ;;  %s1242_s13 = smov 0  }
   0x2   :  { %s1244_s14 = smov 0   ;;  %s1246_s15 = smov 0  }
   0x3 LB: > { %s1261_s16 = sadd.s32 4294967295, %s1215_s15   ;;  %s905_s17 = sadd.s32 4294967294, %s1215_s15   ;;  %s1215_s15 = sphi %s1246_s15, %s1622_s15   ;;  %s1211_s14 = sphi %s1244_s14, %s1621_s14   ;;  %s1207_s13 = sphi %s1242_s13, %s1620_s13   ;;  %s1203_s12 = sphi %s1240_s12, %s1619_s12  }
   0x4   : > { %s1265_s18 = sadd.s32 1, %s1215_s15   ;;  %s91_s19 = sadd.s32 1, %s1211_s14 }
   0x5   : > { %s88_s20 = ssub.s32 %s1215_s15, %s1265_s18  ;;  %p101_p0 = scmp.ne.s32.totalorder %s1211_s14, %s1207_s13 }
   0x6   : > { %p89_p1 = scmp.eq.s32.totalorder %s88_s20, 0  ;;  %p102_p2 = scmp.eq.s32.totalorder %s1261_s16, 1 }
   0x7   : > { %p107_p3 = scmp.ne.s32.totalorder %s1207_s13, %s1203_s12  ;;  %p108_p4 = scmp.eq.s32.totalorder %s905_s17, 1 }
   0x8   : > { %s1276_s21 = scalar_select %p89_p1, %s1211_s14, %s91_s19  }
   0x9   : > { %p1278_p5 = por %p102_p2, %p101_p0  ;;  %p1282_p6 = por %p108_p4, %p107_p3 }
   0xa   : > { %p908_p7 = scmp.ge.s32.totalorder %s1215_s15, 1  ;;  %p142_p8 = scmp.lt.s32.totalorder %s1215_s15, 3 }
   0xc   : > { %p143_p9 = pnand %p908_p7, %p142_p8 }
   0xd   : > { %s910_s7 = sshll.u32 (!%p143_p9), %s1261_s16, 5  ;;  %s164_s20 = sand.u32 (!%p143_p9), 1, %s1207_s13  }
   0xe   : > { %146 = sbr.rel (%p143_p9) target bundleno = 355 (0x163), region = 32  ;;  %p168_p10 = scmp.lt.s32.totalorder (!%p143_p9), %s910_s7, 63 }
   0xf   : > { %s909_s26 = sshll.u32 (!%p143_p9), %s164_s20, 9  ;;  %s985_s27 = sshll.u32 (!%p143_p9), %s1261_s16, 13 }
  0x10   : > { %s1561_s4 = scalar_lea.hbm (!%p143_p9), %s1616_s3, %s985_s27  ;;  %s1573_s16 = scalar_lea.sflag (!%p143_p9), [#allocation3], %s164_s20 }
  0x11   : > { %s1217_s6 = smov (!%p143_p9), [#allocation2]  }
  0x12   : > { %s1159_s9 = sshll.u32 (!%p143_p9), %s1217_s6, 4  ;;  %s1160_s9 = int_to_ptr.vmem [resolvable:$false] %s1159_s9 }
  0x13   : > { %v1059_v0 = vld [vmem:[%s1614_s1 + $0x74] ss:$8 sps:$4 sm:$0xff]   ;;  %v1061_v1 = vld [vmem:[%s1614_s1 + $0x70] ss:$8 sps:$4 sm:$0xff]   ;;  %v1062_v2 = vld [vmem:[%s1614_s1 + $0x64] ss:$8 sps:$4 sm:$0xff]  }
  0x14   : > { %571 = vmatprep.subr.bf16.mxu0 %v1059_v0  ;;  %986 = vmatprep.subr.bf16.mxu1 %v1059_v0  ;;  %v1064_v3 = vld [vmem:[%s1614_s1 + $0x60] ss:$8 sps:$4 sm:$0xff]   ;;  %v1065_v4 = vld [vmem:[%s1614_s1 + $0x54] ss:$8 sps:$4 sm:$0xff]   ;;  %v1067_v5 = vld [vmem:[%s1614_s1 + $0x50] ss:$8 sps:$4 sm:$0xff]   ;;  %v241_v0 = vlaneseq }
  0x15   : > { %572 = vmatpush1.bf16.msra.mxu0 %v1061_v1  ;;  %1002 = vmatpush1.bf16.msra.mxu1 %v1061_v1  ;;  %v1068_v6 = vld [vmem:[%s1614_s1 + $0x44] ss:$8 sps:$4 sm:$0xff]   ;;  %v1070_v7 = vld [vmem:[%s1614_s1 + $0x40] ss:$8 sps:$4 sm:$0xff]   ;;  %v1071_v8 = vld [vmem:[%s1614_s1 + $0x34] ss:$8 sps:$4 sm:$0xff]  }
  0x16   : > { %573 = vmatprep.subr.bf16.mxu0 %v1062_v2  ;;  %987 = vmatprep.subr.bf16.mxu1 %v1062_v2  ;;  %s1624_s7 = smov (!%p168_p10, %s910_s7), 63  ;;  %v1073_v9 = vld [vmem:[%s1614_s1 + $0x30] ss:$8 sps:$4 sm:$0xff]   ;;  %v1074_v10 = vld [vmem:[%s1614_s1 + $0x24] ss:$8 sps:$4 sm:$0xff]   ;;  %v242_v1 = vshrl.u32 %v241_v0, 7 }
  0x17   : > { %s983_s29 = sshll.u32 %s1624_s7, 3  ;;  %v1076_v11 = vld [vmem:[%s1614_s1 + $0x20] ss:$8 sps:$4 sm:$0xff]   ;;  %v1077_v12 = vld [vmem:[%s1614_s1 + $0x14] ss:$8 sps:$4 sm:$0xff]   ;;  %s1161_s10 = scalar_lea.vmem %s1160_s9, 16384 }
  0x18   : > { %s1328_s8 = scalar_lea.vmem %s1613_s0, %s983_s29  ;;  %v1079_v14 = vld [vmem:[%s1614_s1 + $0x10] ss:$8 sps:$4 sm:$0xff]   ;;  %v1080_v16 = vld [vmem:[%s1614_s1 + $0x4] ss:$8 sps:$4 sm:$0xff]   ;;  %v1082_v17 = vld [vmem:[%s1614_s1] ss:$8 sps:$4 sm:$0xff]  }
  0x19   : > { %574 = vmatpush1.bf16.msra.mxu0 %v1064_v3  ;;  %1003 = vmatpush1.bf16.msra.mxu1 %v1064_v3  ;;  %v1109_v13 = vld [vmem:[%s1328_s8 + $0x4] ss:$8 sps:$4 sm:$0xff]   ;;  %v1083_v18 = vld [vmem:[%s1614_s1 + $0xf4] ss:$8 sps:$4 sm:$0xff]   ;;  %v1085_v19 = vld [vmem:[%s1614_s1 + $0xf0] ss:$8 sps:$4 sm:$0xff]  }
  0x1a   : > { %575 = vmatprep.subr.bf16.mxu0 %v1065_v4  ;;  %988 = vmatprep.subr.bf16.mxu1 %v1065_v4  ;;  %v1112_v15 = vld [vmem:[%s1328_s8 + $0x84] ss:$8 sps:$4 sm:$0xff]   ;;  %v1088_v21 = vld [vmem:[%s1614_s1 + $0xe0] ss:$8 sps:$4 sm:$0xff]   ;;  %v1089_v22 = vld [vmem:[%s1614_s1 + $0xd4] ss:$8 sps:$4 sm:$0xff]  }
  0x1b   : > { %603 = vmatprep.mubr.bf16.mxu0 %v1109_v13  ;;  %683 = vmatprep.mubr.bf16.mxu1 %v1112_v15  ;;  %v1086_v20 = vld [vmem:[%s1614_s1 + $0xe4] ss:$8 sps:$4 sm:$0xff]   ;;  %v1091_v23 = vld [vmem:[%s1614_s1 + $0xd0] ss:$8 sps:$4 sm:$0xff]   ;;  %v1094_v25 = vld [vmem:[%s1614_s1 + $0xc0] ss:$8 sps:$4 sm:$0xff]  }
  0x1c   : > { %v1092_v24 = vld [vmem:[%s1614_s1 + $0xc4] ss:$8 sps:$4 sm:$0xff]   ;;  %v1095_v26 = vld [vmem:[%s1614_s1 + $0xb4] ss:$8 sps:$4 sm:$0xff]   ;;  %v1097_v27 = vld [vmem:[%s1614_s1 + $0xb0] ss:$8 sps:$4 sm:$0xff]  }
  0x1d   : > { %576 = vmatpush1.bf16.msra.mxu0 %v1067_v5  ;;  %1004 = vmatpush1.bf16.msra.mxu1 %v1067_v5  ;;  %v1098_v28 = vld [vmem:[%s1614_s1 + $0xa4] ss:$8 sps:$4 sm:$0xff]   ;;  %v1100_v29 = vld [vmem:[%s1614_s1 + $0xa0] ss:$8 sps:$4 sm:$0xff]   ;;  %v1101_v30 = vld [vmem:[%s1614_s1 + $0x94] ss:$8 sps:$4 sm:$0xff]  }
  0x1e   : > { %577 = vmatprep.subr.bf16.mxu0 %v1068_v6  ;;  %989 = vmatprep.subr.bf16.mxu1 %v1068_v6  ;;  %v1103_v31 = vld [vmem:[%s1614_s1 + $0x90] ss:$8 sps:$4 sm:$0xff]   ;;  %v1104_v32 = vld [vmem:[%s1614_s1 + $0x84] ss:$8 sps:$4 sm:$0xff]   ;;  %v1106_v33 = vld [vmem:[%s1614_s1 + $0x80] ss:$8 sps:$4 sm:$0xff]  }
  0x1f   : > { %v1107_v34 = vld [vmem:[%s1328_s8] ss:$8 sps:$4 sm:$0xff]   ;;  %v1113_v36 = vld [vmem:[%s1328_s8 + $0x14] ss:$8 sps:$4 sm:$0xff]   ;;  %v1117_v38 = vld [vmem:[%s1328_s8 + $0x10] ss:$8 sps:$4 sm:$0xff]  }
  0x20   : > { %v1110_v35 = vld [vmem:[%s1328_s8 + $0x80] ss:$8 sps:$4 sm:$0xff]   ;;  %v1115_v37 = vld [vmem:[%s1328_s8 + $0x94] ss:$8 sps:$4 sm:$0xff]   ;;  %v1118_v39 = vld [vmem:[%s1328_s8 + $0x90] ss:$8 sps:$4 sm:$0xff]  }
  0x21   : > { %578 = vmatpush1.bf16.msra.mxu0 %v1070_v7  ;;  %1005 = vmatpush1.bf16.msra.mxu1 %v1070_v7  ;;  %v1119_v40 = vld [vmem:[%s1328_s8 + $0x24] ss:$8 sps:$4 sm:$0xff]   ;;  %v1123_v42 = vld [vmem:[%s1328_s8 + $0x20] ss:$8 sps:$4 sm:$0xff]   ;;  %v1125_v44 = vld [vmem:[%s1328_s8 + $0x34] ss:$8 sps:$4 sm:$0xff]  }
  0x22   : > { %579 = vmatprep.subr.bf16.mxu0 %v1071_v8  ;;  %990 = vmatprep.subr.bf16.mxu1 %v1071_v8  ;;  %v1121_v41 = vld [vmem:[%s1328_s8 + $0xa4] ss:$8 sps:$4 sm:$0xff]   ;;  %v1124_v43 = vld [vmem:[%s1328_s8 + $0xa0] ss:$8 sps:$4 sm:$0xff]   ;;  %v1127_v45 = vld [vmem:[%s1328_s8 + $0xb4] ss:$8 sps:$4 sm:$0xff]  }
  0x23   : > { %v1129_v46 = vld [vmem:[%s1328_s8 + $0x30] ss:$8 sps:$4 sm:$0xff]   ;;  %v1131_v48 = vld [vmem:[%s1328_s8 + $0x44] ss:$8 sps:$4 sm:$0xff]   ;;  %v1135_v50 = vld [vmem:[%s1328_s8 + $0x40] ss:$8 sps:$4 sm:$0xff]  }
  0x24   : > { %v1130_v47 = vld [vmem:[%s1328_s8 + $0xb0] ss:$8 sps:$4 sm:$0xff]   ;;  %v1133_v49 = vld [vmem:[%s1328_s8 + $0xc4] ss:$8 sps:$4 sm:$0xff]   ;;  %v1136_v51 = vld [vmem:[%s1328_s8 + $0xc0] ss:$8 sps:$4 sm:$0xff]  }
  0x25   : > { %580 = vmatpush1.bf16.msra.mxu0 %v1073_v9  ;;  %1006 = vmatpush1.bf16.msra.mxu1 %v1073_v9  ;;  %v1137_v52 = vld [vmem:[%s1328_s8 + $0x54] ss:$8 sps:$4 sm:$0xff]   ;;  %v1141_v54 = vld [vmem:[%s1328_s8 + $0x50] ss:$8 sps:$4 sm:$0xff]   ;;  %v1143_v56 = vld [vmem:[%s1328_s8 + $0x64] ss:$8 sps:$4 sm:$0xff]  }
  0x26   : > { %581 = vmatprep.subr.bf16.mxu0 %v1074_v10  ;;  %991 = vmatprep.subr.bf16.mxu1 %v1074_v10  ;;  %v1139_v53 = vld [vmem:[%s1328_s8 + $0xd4] ss:$8 sps:$4 sm:$0xff]   ;;  %v1142_v55 = vld [vmem:[%s1328_s8 + $0xd0] ss:$8 sps:$4 sm:$0xff]   ;;  %v1145_v57 = vld [vmem:[%s1328_s8 + $0xe4] ss:$8 sps:$4 sm:$0xff]  }
  0x27   : > { %v1147_v58 = vld [vmem:[%s1328_s8 + $0x60] ss:$8 sps:$4 sm:$0xff]   ;;  %v1149_v60 = vld [vmem:[%s1328_s8 + $0x74] ss:$8 sps:$4 sm:$0xff]   ;;  %v1153_v62 = vld [vmem:[%s1328_s8 + $0x70] ss:$8 sps:$4 sm:$0xff]  }
  0x28   : > { %v1148_v59 = vld [vmem:[%s1328_s8 + $0xe0] ss:$8 sps:$4 sm:$0xff]   ;;  %v1151_v61 = vld [vmem:[%s1328_s8 + $0xf4] ss:$8 sps:$4 sm:$0xff]   ;;  %v1154_v63 = vld [vmem:[%s1328_s8 + $0xf0] ss:$8 sps:$4 sm:$0xff]  }
  0x29   : > { %582 = vmatpush1.bf16.msra.mxu0 %v1076_v11  ;;  %1007 = vmatpush1.bf16.msra.mxu1 %v1076_v11  ;;  %v243_v2 = vsub.s32 0, %v242_v1  ;;  %v239_v3 = vld [vmem:[%s1615_s2] sm:$0x3]  ;;  %v247_v4 = vsub.s32 1, %v242_v1  ;;  %s1434_s8 = scalar_lea.vmem [#allocation2], %s909_s26 }
  0x2a   : > { %583 = vmatprep.subr.bf16.mxu0 %v1077_v12  ;;  %992 = vmatprep.subr.bf16.mxu1 %v1077_v12  ;;  %s843_s28 = sshll.u32 %s1434_s8, 4  ;;  %s1563_s28 = int_to_ptr.vmem [resolvable:$true] %s843_s28 }
  0x2b   : > { %v1428_v5 = vrot.slane %v239_v3, %v243_v2  ;;  %v1430_v6 = vrot.slane %v239_v3, %v247_v4  ;;  %s1155_s5 = scalar_lea.vmem %s1563_s28, 8192  ;;  %p1162_p0 = scmp.lt.s32.totalorder %s1563_s28, %s1160_s9 }
  0x2c   : > { %p1156_p11 = scmp.ne.s32.totalorder %s1563_s28, %s1155_s5  ;;  %p1163_p1 = scmp.lt.s32.totalorder %s1161_s10, %s1155_s5 }
  0x2d   : > { %584 = vmatpush1.bf16.msra.mxu0 %v1079_v14  ;;  %1008 = vmatpush1.bf16.msra.mxu1 %v1079_v14 }
  0x2e   : > { %585 = vmatprep.subr.bf16.mxu0 %v1080_v16  ;;  %993 = vmatprep.subr.bf16.mxu1 %v1080_v16  ;;  %p1157_p12 = pnand %p1156_p11, %p1278_p5  ;;  %p1164_p2 = por %p1163_p1, %p1162_p0 }
  0x30   : > { %p1158_p13 = pneg %p1157_p12 }
  0x31   : > { %586 = vmatpush1.bf16.msra.mxu0 %v1082_v17  ;;  %1009 = vmatpush1.bf16.msra.mxu1 %v1082_v17 }
  0x32   : > { %587 = vmatprep.subr.bf16.mxu0 %v1083_v18  ;;  %994 = vmatprep.subr.bf16.mxu1 %v1083_v18  ;;  %p1165_p3 = pnand %p1164_p2, %p1158_p13 }
  0x35   : > { %588 = vmatpush2.bf16.msra.mxu0 %v1085_v19  ;;  %1010 = vmatpush2.bf16.msra.mxu1 %v1085_v19 }
  0x36   : > { %589 = vmatprep.subr.bf16.mxu0 %v1086_v20  ;;  %995 = vmatprep.subr.bf16.mxu1 %v1086_v20 }
  0x39   : > { %590 = vmatpush2.bf16.msra.mxu0 %v1088_v21  ;;  %1011 = vmatpush2.bf16.msra.mxu1 %v1088_v21 }
  0x3a   : > { %591 = vmatprep.subr.bf16.mxu0 %v1089_v22  ;;  %996 = vmatprep.subr.bf16.mxu1 %v1089_v22 }
  0x3d   : > { %592 = vmatpush2.bf16.msra.mxu0 %v1091_v23  ;;  %1012 = vmatpush2.bf16.msra.mxu1 %v1091_v23 }
  0x3e   : > { %593 = vmatprep.subr.bf16.mxu0 %v1092_v24  ;;  %997 = vmatprep.subr.bf16.mxu1 %v1092_v24 }
  0x41   : > { %594 = vmatpush2.bf16.msra.mxu0 %v1094_v25  ;;  %1013 = vmatpush2.bf16.msra.mxu1 %v1094_v25 }
  0x42   : > { %595 = vmatprep.subr.bf16.mxu0 %v1095_v26  ;;  %998 = vmatprep.subr.bf16.mxu1 %v1095_v26 }
  0x45   : > { %596 = vmatpush2.bf16.msra.mxu0 %v1097_v27  ;;  %1014 = vmatpush2.bf16.msra.mxu1 %v1097_v27 }
  0x46   : > { %597 = vmatprep.subr.bf16.mxu0 %v1098_v28  ;;  %999 = vmatprep.subr.bf16.mxu1 %v1098_v28 }
  0x49   : > { %598 = vmatpush2.bf16.msra.mxu0 %v1100_v29  ;;  %1015 = vmatpush2.bf16.msra.mxu1 %v1100_v29 }
  0x4a   : > { %599 = vmatprep.subr.bf16.mxu0 %v1101_v30  ;;  %1000 = vmatprep.subr.bf16.mxu1 %v1101_v30 }
  0x4d   : > { %600 = vmatpush2.bf16.msra.mxu0 %v1103_v31  ;;  %1016 = vmatpush2.bf16.msra.mxu1 %v1103_v31 }
  0x4e   : > { %601 = vmatprep.subr.bf16.mxu0 %v1104_v32  ;;  %1001 = vmatprep.subr.bf16.mxu1 %v1104_v32 }
  0x51   : > { %602 = vmatpush2.bf16.msra.mxu0 %v1106_v33  ;;  %1017 = vmatpush2.bf16.msra.mxu1 %v1106_v33 }
  0x54   : > { %604 = vmatmul.mubr.bf16.vlgmr.msra.gmra.mxu0 %v1107_v34  ;;  %684 = vmatmul.mubr.bf16.vlgmr.msra.gmra.mxu1 %v1110_v35 }
  0x55   : > { %613 = vmatprep.mubr.bf16.mxu0 %v1113_v36  ;;  %693 = vmatprep.mubr.bf16.mxu1 %v1115_v37 }
  0x5c   : > { %614 = vmatmul.mubr.bf16.gmra.mxu0 %v1117_v38  ;;  %694 = vmatmul.mubr.bf16.gmra.mxu1 %v1118_v39 }
  0x5d   : > { %623 = vmatprep.mubr.bf16.mxu0 %v1119_v40  ;;  %703 = vmatprep.mubr.bf16.mxu1 %v1121_v41 }
  0x64   : > { %624 = vmatmul.mubr.bf16.gmra.mxu0 %v1123_v42  ;;  %704 = vmatmul.mubr.bf16.gmra.mxu1 %v1124_v43 }
  0x65   : > { %633 = vmatprep.mubr.bf16.mxu0 %v1125_v44  ;;  %713 = vmatprep.mubr.bf16.mxu1 %v1127_v45 }
  0x6c   : > { %634 = vmatmul.mubr.bf16.gmra.mxu0 %v1129_v46  ;;  %714 = vmatmul.mubr.bf16.gmra.mxu1 %v1130_v47 }
  0x6d   : > { %643 = vmatprep.mubr.bf16.mxu0 %v1131_v48  ;;  %723 = vmatprep.mubr.bf16.mxu1 %v1133_v49 }
  0x74   : > { %644 = vmatmul.mubr.bf16.gmra.mxu0 %v1135_v50  ;;  %724 = vmatmul.mubr.bf16.gmra.mxu1 %v1136_v51 }
  0x75   : > { %653 = vmatprep.mubr.bf16.mxu0 %v1137_v52  ;;  %733 = vmatprep.mubr.bf16.mxu1 %v1139_v53 }
  0x7c   : > { %654 = vmatmul.mubr.bf16.gmra.mxu0 %v1141_v54  ;;  %734 = vmatmul.mubr.bf16.gmra.mxu1 %v1142_v55 }
  0x7d   : > { %663 = vmatprep.mubr.bf16.mxu0 %v1143_v56  ;;  %743 = vmatprep.mubr.bf16.mxu1 %v1145_v57 }
  0x84   : > { %664 = vmatmul.mubr.bf16.gmra.mxu0 %v1147_v58  ;;  %744 = vmatmul.mubr.bf16.gmra.mxu1 %v1148_v59 }
  0x85   : > { %673 = vmatprep.mubr.bf16.mxu0 %v1149_v60  ;;  %753 = vmatprep.mubr.bf16.mxu1 %v1151_v61 }
  0x8c   : > { %674 = vmatmul.mubr.bf16.gmra.mxu0 %v1153_v62  ;;  %754 = vmatmul.mubr.bf16.gmra.mxu1 %v1154_v63 }
 0x114   : > { %v605_v7 = vpop.f32.mrf.mxu0  ;;  %v685_v8 = vpop.f32.mrf.mxu1 }
 0x115   : > { %v606_v9 = vadd.f32 %v605_v7, %v1428_v5  ;;  %v686_v10 = vadd.f32 %v685_v8, %v1428_v5 }
 0x116   : > { %v607_v11 = vpop.f32.mrf.mxu0  ;;  %v687_v12 = vpop.f32.mrf.mxu1 }
 0x117   : > { %764 = vst [vmem:[%s1434_s8] sm:$0xff] %v606_v9  ;;  %796 = vst [vmem:[%s1434_s8 + $0x100] sm:$0xff] %v686_v10  ;;  %v608_v13 = vadd.f32 %v607_v11, %v1430_v6  ;;  %v688_v14 = vadd.f32 %v687_v12, %v1430_v6 }
 0x118   : > { %v609_v15 = vpop.f32.mrf.mxu0  ;;  %v689_v16 = vpop.f32.mrf.mxu1 }
 0x119   : > { %765 = vst [vmem:[%s1434_s8 + $0x8] sm:$0xff] %v608_v13  ;;  %797 = vst [vmem:[%s1434_s8 + $0x108] sm:$0xff] %v688_v14  ;;  %v610_v17 = vadd.f32 %v609_v15, %v1428_v5  ;;  %v690_v18 = vadd.f32 %v689_v16, %v1428_v5 }
 0x11a   : > { %v611_v19 = vpop.f32.mrf.mxu0  ;;  %v691_v20 = vpop.f32.mrf.mxu1 }
 0x11b   : > { %766 = vst [vmem:[%s1434_s8 + $0x10] sm:$0xff] %v610_v17  ;;  %798 = vst [vmem:[%s1434_s8 + $0x110] sm:$0xff] %v690_v18  ;;  %v612_v21 = vadd.f32 %v611_v19, %v1430_v6  ;;  %v692_v22 = vadd.f32 %v691_v20, %v1430_v6 }
 0x11c   : > { %v615_v23 = vpop.f32.mrf.mxu0  ;;  %v695_v24 = vpop.f32.mrf.mxu1 }
 0x11d   : > { %767 = vst [vmem:[%s1434_s8 + $0x18] sm:$0xff] %v612_v21  ;;  %799 = vst [vmem:[%s1434_s8 + $0x118] sm:$0xff] %v692_v22  ;;  %v616_v25 = vadd.f32 %v615_v23, %v1428_v5  ;;  %v696_v26 = vadd.f32 %v695_v24, %v1428_v5 }
 0x11e   : > { %v617_v27 = vpop.f32.mrf.mxu0  ;;  %v697_v28 = vpop.f32.mrf.mxu1 }
 0x11f   : > { %768 = vst [vmem:[%s1434_s8 + $0x20] sm:$0xff] %v616_v25  ;;  %800 = vst [vmem:[%s1434_s8 + $0x120] sm:$0xff] %v696_v26  ;;  %v618_v29 = vadd.f32 %v617_v27, %v1430_v6  ;;  %v698_v30 = vadd.f32 %v697_v28, %v1430_v6 }
 0x120   : > { %v619_v31 = vpop.f32.mrf.mxu0  ;;  %v699_v32 = vpop.f32.mrf.mxu1 }
 0x121   : > { %769 = vst [vmem:[%s1434_s8 + $0x28] sm:$0xff] %v618_v29  ;;  %801 = vst [vmem:[%s1434_s8 + $0x128] sm:$0xff] %v698_v30  ;;  %v620_v33 = vadd.f32 %v619_v31, %v1428_v5  ;;  %v700_v34 = vadd.f32 %v699_v32, %v1428_v5 }
 0x122   : > { %v621_v35 = vpop.f32.mrf.mxu0  ;;  %v701_v36 = vpop.f32.mrf.mxu1 }
 0x123   : > { %770 = vst [vmem:[%s1434_s8 + $0x30] sm:$0xff] %v620_v33  ;;  %802 = vst [vmem:[%s1434_s8 + $0x130] sm:$0xff] %v700_v34  ;;  %v622_v37 = vadd.f32 %v621_v35, %v1430_v6  ;;  %v702_v38 = vadd.f32 %v701_v36, %v1430_v6 }
 0x124   : > { %v625_v39 = vpop.f32.mrf.mxu0  ;;  %v705_v40 = vpop.f32.mrf.mxu1 }
 0x125   : > { %771 = vst [vmem:[%s1434_s8 + $0x38] sm:$0xff] %v622_v37  ;;  %803 = vst [vmem:[%s1434_s8 + $0x138] sm:$0xff] %v702_v38  ;;  %v626_v41 = vadd.f32 %v625_v39, %v1428_v5  ;;  %v706_v42 = vadd.f32 %v705_v40, %v1428_v5 }
 0x126   : > { %v627_v43 = vpop.f32.mrf.mxu0  ;;  %v707_v44 = vpop.f32.mrf.mxu1 }
 0x127   : > { %772 = vst [vmem:[%s1434_s8 + $0x40] sm:$0xff] %v626_v41  ;;  %804 = vst [vmem:[%s1434_s8 + $0x140] sm:$0xff] %v706_v42  ;;  %v628_v45 = vadd.f32 %v627_v43, %v1430_v6  ;;  %v708_v46 = vadd.f32 %v707_v44, %v1430_v6 }
 0x128   : > { %v629_v47 = vpop.f32.mrf.mxu0  ;;  %v709_v48 = vpop.f32.mrf.mxu1 }
 0x129   : > { %773 = vst [vmem:[%s1434_s8 + $0x48] sm:$0xff] %v628_v45  ;;  %805 = vst [vmem:[%s1434_s8 + $0x148] sm:$0xff] %v708_v46  ;;  %v630_v49 = vadd.f32 %v629_v47, %v1428_v5  ;;  %v710_v50 = vadd.f32 %v709_v48, %v1428_v5 }
 0x12a   : > { %v631_v51 = vpop.f32.mrf.mxu0  ;;  %v711_v52 = vpop.f32.mrf.mxu1 }
 0x12b   : > { %774 = vst [vmem:[%s1434_s8 + $0x50] sm:$0xff] %v630_v49  ;;  %806 = vst [vmem:[%s1434_s8 + $0x150] sm:$0xff] %v710_v50  ;;  %v632_v53 = vadd.f32 %v631_v51, %v1430_v6  ;;  %v712_v54 = vadd.f32 %v711_v52, %v1430_v6 }
 0x12c   : > { %v635_v55 = vpop.f32.mrf.mxu0  ;;  %v715_v56 = vpop.f32.mrf.mxu1 }
 0x12d   : > { %775 = vst [vmem:[%s1434_s8 + $0x58] sm:$0xff] %v632_v53  ;;  %807 = vst [vmem:[%s1434_s8 + $0x158] sm:$0xff] %v712_v54  ;;  %v636_v57 = vadd.f32 %v635_v55, %v1428_v5  ;;  %v716_v58 = vadd.f32 %v715_v56, %v1428_v5 }
 0x12e   : > { %v637_v59 = vpop.f32.mrf.mxu0  ;;  %v717_v60 = vpop.f32.mrf.mxu1 }
 0x12f   : > { %776 = vst [vmem:[%s1434_s8 + $0x60] sm:$0xff] %v636_v57  ;;  %808 = vst [vmem:[%s1434_s8 + $0x160] sm:$0xff] %v716_v58  ;;  %v638_v61 = vadd.f32 %v637_v59, %v1430_v6  ;;  %v718_v62 = vadd.f32 %v717_v60, %v1430_v6 }
 0x130   : > { %v639_v63 = vpop.f32.mrf.mxu0  ;;  %v719_v0 = vpop.f32.mrf.mxu1 }
 0x131   : > { %777 = vst [vmem:[%s1434_s8 + $0x68] sm:$0xff] %v638_v61  ;;  %809 = vst [vmem:[%s1434_s8 + $0x168] sm:$0xff] %v718_v62  ;;  %v640_v1 = vadd.f32 %v639_v63, %v1428_v5  ;;  %v720_v2 = vadd.f32 %v719_v0, %v1428_v5 }
 0x132   : > { %v641_v3 = vpop.f32.mrf.mxu0  ;;  %v721_v4 = vpop.f32.mrf.mxu1 }
 0x133   : > { %778 = vst [vmem:[%s1434_s8 + $0x70] sm:$0xff] %v640_v1  ;;  %810 = vst [vmem:[%s1434_s8 + $0x170] sm:$0xff] %v720_v2  ;;  %v642_v7 = vadd.f32 %v641_v3, %v1430_v6  ;;  %v722_v8 = vadd.f32 %v721_v4, %v1430_v6 }
 0x134   : > { %v645_v9 = vpop.f32.mrf.mxu0  ;;  %v725_v10 = vpop.f32.mrf.mxu1 }
 0x135   : > { %779 = vst [vmem:[%s1434_s8 + $0x78] sm:$0xff] %v642_v7  ;;  %811 = vst [vmem:[%s1434_s8 + $0x178] sm:$0xff] %v722_v8  ;;  %v646_v11 = vadd.f32 %v645_v9, %v1428_v5  ;;  %v726_v12 = vadd.f32 %v725_v10, %v1428_v5 }
 0x136   : > { %v647_v13 = vpop.f32.mrf.mxu0  ;;  %v727_v14 = vpop.f32.mrf.mxu1 }
 0x137   : > { %780 = vst [vmem:[%s1434_s8 + $0x80] sm:$0xff] %v646_v11  ;;  %812 = vst [vmem:[%s1434_s8 + $0x180] sm:$0xff] %v726_v12  ;;  %v648_v15 = vadd.f32 %v647_v13, %v1430_v6  ;;  %v728_v16 = vadd.f32 %v727_v14, %v1430_v6 }
 0x138   : > { %v649_v17 = vpop.f32.mrf.mxu0  ;;  %v729_v18 = vpop.f32.mrf.mxu1 }
 0x139   : > { %781 = vst [vmem:[%s1434_s8 + $0x88] sm:$0xff] %v648_v15  ;;  %813 = vst [vmem:[%s1434_s8 + $0x188] sm:$0xff] %v728_v16  ;;  %v650_v19 = vadd.f32 %v649_v17, %v1428_v5  ;;  %v730_v20 = vadd.f32 %v729_v18, %v1428_v5 }
 0x13a   : > { %v651_v21 = vpop.f32.mrf.mxu0  ;;  %v731_v22 = vpop.f32.mrf.mxu1 }
 0x13b   : > { %782 = vst [vmem:[%s1434_s8 + $0x90] sm:$0xff] %v650_v19  ;;  %814 = vst [vmem:[%s1434_s8 + $0x190] sm:$0xff] %v730_v20  ;;  %v652_v23 = vadd.f32 %v651_v21, %v1430_v6  ;;  %v732_v24 = vadd.f32 %v731_v22, %v1430_v6 }
 0x13c   : > { %v655_v25 = vpop.f32.mrf.mxu0  ;;  %v735_v26 = vpop.f32.mrf.mxu1 }
 0x13d   : > { %783 = vst [vmem:[%s1434_s8 + $0x98] sm:$0xff] %v652_v23  ;;  %815 = vst [vmem:[%s1434_s8 + $0x198] sm:$0xff] %v732_v24  ;;  %v656_v27 = vadd.f32 %v655_v25, %v1428_v5  ;;  %v736_v28 = vadd.f32 %v735_v26, %v1428_v5 }
 0x13e   : > { %v657_v29 = vpop.f32.mrf.mxu0  ;;  %v737_v30 = vpop.f32.mrf.mxu1 }
 0x13f   : > { %784 = vst [vmem:[%s1434_s8 + $0xa0] sm:$0xff] %v656_v27  ;;  %816 = vst [vmem:[%s1434_s8 + $0x1a0] sm:$0xff] %v736_v28  ;;  %v658_v31 = vadd.f32 %v657_v29, %v1430_v6  ;;  %v738_v32 = vadd.f32 %v737_v30, %v1430_v6 }
 0x140   : > { %v659_v33 = vpop.f32.mrf.mxu0  ;;  %v739_v34 = vpop.f32.mrf.mxu1 }
 0x141   : > { %785 = vst [vmem:[%s1434_s8 + $0xa8] sm:$0xff] %v658_v31  ;;  %817 = vst [vmem:[%s1434_s8 + $0x1a8] sm:$0xff] %v738_v32  ;;  %v660_v35 = vadd.f32 %v659_v33, %v1428_v5  ;;  %v740_v36 = vadd.f32 %v739_v34, %v1428_v5 }
 0x142   : > { %v661_v37 = vpop.f32.mrf.mxu0  ;;  %v741_v38 = vpop.f32.mrf.mxu1 }
 0x143   : > { %786 = vst [vmem:[%s1434_s8 + $0xb0] sm:$0xff] %v660_v35  ;;  %818 = vst [vmem:[%s1434_s8 + $0x1b0] sm:$0xff] %v740_v36  ;;  %v662_v39 = vadd.f32 %v661_v37, %v1430_v6  ;;  %v742_v40 = vadd.f32 %v741_v38, %v1430_v6 }
 0x144   : > { %v665_v41 = vpop.f32.mrf.mxu0  ;;  %v745_v42 = vpop.f32.mrf.mxu1 }
 0x145   : > { %787 = vst [vmem:[%s1434_s8 + $0xb8] sm:$0xff] %v662_v39  ;;  %819 = vst [vmem:[%s1434_s8 + $0x1b8] sm:$0xff] %v742_v40  ;;  %v666_v43 = vadd.f32 %v665_v41, %v1428_v5  ;;  %v746_v44 = vadd.f32 %v745_v42, %v1428_v5 }
 0x146   : > { %v667_v45 = vpop.f32.mrf.mxu0  ;;  %v747_v46 = vpop.f32.mrf.mxu1 }
 0x147   : > { %788 = vst [vmem:[%s1434_s8 + $0xc0] sm:$0xff] %v666_v43  ;;  %820 = vst [vmem:[%s1434_s8 + $0x1c0] sm:$0xff] %v746_v44  ;;  %v668_v47 = vadd.f32 %v667_v45, %v1430_v6  ;;  %v748_v48 = vadd.f32 %v747_v46, %v1430_v6 }
 0x148   : > { %v669_v49 = vpop.f32.mrf.mxu0  ;;  %v749_v50 = vpop.f32.mrf.mxu1 }
 0x149   : > { %789 = vst [vmem:[%s1434_s8 + $0xc8] sm:$0xff] %v668_v47  ;;  %821 = vst [vmem:[%s1434_s8 + $0x1c8] sm:$0xff] %v748_v48  ;;  %v670_v51 = vadd.f32 %v669_v49, %v1428_v5  ;;  %v750_v52 = vadd.f32 %v749_v50, %v1428_v5 }
 0x14a   : > { %v671_v53 = vpop.f32.mrf.mxu0  ;;  %v751_v54 = vpop.f32.mrf.mxu1 }
 0x14b   : > { %790 = vst [vmem:[%s1434_s8 + $0xd0] sm:$0xff] %v670_v51  ;;  %822 = vst [vmem:[%s1434_s8 + $0x1d0] sm:$0xff] %v750_v52  ;;  %v672_v55 = vadd.f32 %v671_v53, %v1430_v6  ;;  %v752_v56 = vadd.f32 %v751_v54, %v1430_v6 }
 0x14c   : > { %v675_v57 = vpop.f32.mrf.mxu0  ;;  %v755_v58 = vpop.f32.mrf.mxu1 }
 0x14d   : > { %791 = vst [vmem:[%s1434_s8 + $0xd8] sm:$0xff] %v672_v55  ;;  %823 = vst [vmem:[%s1434_s8 + $0x1d8] sm:$0xff] %v752_v56  ;;  %v676_v59 = vadd.f32 %v675_v57, %v1428_v5  ;;  %v756_v60 = vadd.f32 %v755_v58, %v1428_v5 }
 0x14e   : > { %v677_v61 = vpop.f32.mrf.mxu0  ;;  %v757_v62 = vpop.f32.mrf.mxu1 }
 0x14f   : > { %792 = vst [vmem:[%s1434_s8 + $0xe0] sm:$0xff] %v676_v59  ;;  %824 = vst [vmem:[%s1434_s8 + $0x1e0] sm:$0xff] %v756_v60  ;;  %v678_v63 = vadd.f32 %v677_v61, %v1430_v6  ;;  %v758_v0 = vadd.f32 %v757_v62, %v1430_v6 }
 0x150   : > { %v679_v1 = vpop.f32.mrf.mxu0  ;;  %v759_v2 = vpop.f32.mrf.mxu1 }
 0x151   : > { %793 = vst [vmem:[%s1434_s8 + $0xe8] sm:$0xff] %v678_v63  ;;  %825 = vst [vmem:[%s1434_s8 + $0x1e8] sm:$0xff] %v758_v0  ;;  %v680_v3 = vadd.f32 %v679_v1, %v1428_v5  ;;  %v760_v4 = vadd.f32 %v759_v2, %v1428_v5 }
 0x152   : > { %v681_v7 = vpop.f32.mrf.mxu0  ;;  %v761_v8 = vpop.f32.mrf.mxu1 }
 0x153   : > { %794 = vst [vmem:[%s1434_s8 + $0xf0] sm:$0xff] %v680_v3  ;;  %826 = vst [vmem:[%s1434_s8 + $0x1f0] sm:$0xff] %v760_v4  ;;  %v682_v9 = vadd.f32 %v681_v7, %v1430_v6  ;;  %v762_v10 = vadd.f32 %v761_v8, %v1430_v6 }
 0x155   : > { %795 = vst [vmem:[%s1434_s8 + $0xf8] sm:$0xff] %v682_v9  ;;  %827 = vst [vmem:[%s1434_s8 + $0x1f8] sm:$0xff] %v762_v10 }
 0x156   : > { %1168 = shalt.err (!%p1165_p3)
}
 0x157   : > { %s1169_s7 = scalar_lea.hbm %s1561_s4, 8192  ;;  %s1173_s19 = scalar_lea.hbm %s1616_s3, 16384 }
 0x158   : > { %p1170_p4 = scmp.ne.s32.totalorder %s1561_s4, %s1169_s7  ;;  %p1174_p9 = scmp.lt.s32.totalorder %s1561_s4, %s1616_s3 }
 0x159   : > { %p1175_p10 = scmp.lt.s32.totalorder %s1173_s19, %s1169_s7 }
 0x15a   : > { %p1171_p7 = pnand %p1170_p4, %p1278_p5 }
 0x15b   : > { %p1176_p11 = por %p1175_p10, %p1174_p9 }
 0x15c   : > { %p1172_p8 = pneg %p1171_p7 }
 0x15e   : > { %p1177_p12 = pnand %p1176_p11, %p1172_p8 }
 0x160   : > { %1180 = shalt.err (!%p1177_p12)
}
 0x161   : > { %s1218_s25 = smov 256   ;;  %s1219_s26 = smov 16  }
 0x162   : > { %1018 = dma.vmem_to_hbm [thread:$0]  (%p1278_p5), %s1563_s28, 8192, %s1561_s4, %s1573_s16, %s1218_s25, %s1218_s25, %s1219_s26  }
 0x163 PF: > { %p1024_p13 = scmp.ge.s32.totalorder %s1215_s15, 2  ;;  %s858_s8 = sand.u32 1, %s1203_s12  }
 0x164   : > { %s859_s27 = scalar_lea.sflag [#allocation3], %s858_s8 }
 0x165   : > { %p1021_p0 = pnand %p1024_p13, %p1282_p6 }
 0x167   : > { %p1022_p1 = pneg %p1021_p0 }
 0x169   : > { %1198 = dma.done.wait (%p1022_p1), %s859_s27, 8192  }
 0x16a   : > { %1200 = vsyncadd (%p1022_p1), %s859_s27, 4294959104  ;;  %p13_p2 = scmp.ge.s32.totalorder %s1265_s18, 4   ;;  %s1619_s12 = smov %s1207_s13 }
 0x16b   : > { %s1620_s13 = smov %s1211_s14  ;;  %s1621_s14 = smov %s1276_s21 }
 0x16c   : > { %s1622_s15 = smov %s1265_s18  ;;  %15 = sbr.rel (!%p13_p2) target bundleno = 3 (0x3), region = 67 }
 0x171   :  { %864 = vsyncpa [#allocation3], 1 }
 0x172   :  { %866 = vsyncpa [#allocation3 + $0x1], 1 }

// kernel: multi_head_attention_forward.3
= control target key start
LH: loop header
LB: loop body
LE: loop exit
PB: predicated region body
PF: predicated region fallthrough
CT: control target
= control target key end

     0   :  { %s3058_s21 = smov 0   ;;  %s3661_s0 = inlined_call_operand.vmem [shape: bf16[512,256], index: 0, kind: input, shape index: {}]   ;;  %s3662_s1 = inlined_call_operand.vmem [shape: bf16[256,256], index: 1, kind: input, shape index: {}]   ;;  %s3663_s2 = inlined_call_operand.vmem [shape: bf16[256,256], index: 2, kind: input, shape index: {}]   ;;  %s3664_s3 = inlined_call_operand.vmem [shape: bf16[256,256], index: 3, kind: input, shape index: {}]   ;;  %s3665_s4 = inlined_call_operand.vmem [shape: bf16[512,256], index: 4, kind: output, shape index: {0}]   ;;  %s3666_s5 = inlined_call_operand.vmem [shape: bf16[512,256], index: 5, kind: output, shape index: {1}]   ;;  %s3667_s6 = inlined_call_operand.vmem [shape: bf16[512,256], index: 6, kind: output, shape index: {2}]  }
   0x1 LB: > { %s2440_s22 = sadd.s32 4294967295, %s3021_s21   ;;  %p2444_p0 = scmp.ge.s32.totalorder %s3021_s21, 1  ;;  %s3021_s21 = sphi %s3058_s21, %s17_s21  }
   0x2   : > { %p219_p1 = scmp.lt.s32.totalorder %s3021_s21, 3 }
   0x4   : > { %p220_p2 = pnand %p2444_p0, %p219_p1 }
   0x5   : > { %s2445_s9 = sshll.u32 (!%p220_p2), %s2440_s22, 5 }
   0x6   : > { %223 = sbr.rel (%p220_p2) target bundleno = 462 (0x1ce), region = 36  ;;  %p264_p3 = scmp.lt.s32.totalorder (!%p220_p2), %s2445_s9, 63 }
   0xb   : > { %v2823_v0 = vld [vmem:[%s3662_s1 + $0x74] ss:$8 sps:$4 sm:$0xff]   ;;  %v2825_v1 = vld [vmem:[%s3662_s1 + $0x70] ss:$8 sps:$4 sm:$0xff]   ;;  %v2826_v2 = vld [vmem:[%s3662_s1 + $0x64] ss:$8 sps:$4 sm:$0xff]  }
   0xc   : > { %675 = vmatprep.subr.bf16.mxu0 %v2823_v0  ;;  %2783 = vmatprep.subr.bf16.mxu1 %v2823_v0  ;;  %v2828_v3 = vld [vmem:[%s3662_s1 + $0x60] ss:$8 sps:$4 sm:$0xff]   ;;  %v2829_v4 = vld [vmem:[%s3662_s1 + $0x54] ss:$8 sps:$4 sm:$0xff]   ;;  %v2831_v5 = vld [vmem:[%s3662_s1 + $0x50] ss:$8 sps:$4 sm:$0xff]  }
   0xd   : > { %676 = vmatpush1.bf16.msra.mxu0 %v2825_v1  ;;  %2799 = vmatpush1.bf16.msra.mxu1 %v2825_v1  ;;  %v2832_v6 = vld [vmem:[%s3662_s1 + $0x44] ss:$8 sps:$4 sm:$0xff]   ;;  %v2834_v7 = vld [vmem:[%s3662_s1 + $0x40] ss:$8 sps:$4 sm:$0xff]   ;;  %v2835_v8 = vld [vmem:[%s3662_s1 + $0x34] ss:$8 sps:$4 sm:$0xff]  }
   0xe   : > { %677 = vmatprep.subr.bf16.mxu0 %v2826_v2  ;;  %2784 = vmatprep.subr.bf16.mxu1 %v2826_v2  ;;  %s3669_s9 = smov (!%p264_p3, %s2445_s9), 63  ;;  %v2837_v9 = vld [vmem:[%s3662_s1 + $0x30] ss:$8 sps:$4 sm:$0xff]   ;;  %v2838_v10 = vld [vmem:[%s3662_s1 + $0x24] ss:$8 sps:$4 sm:$0xff]  }
   0xf   : > { %s3099_s23 = sshll.u32 %s3669_s9, 3  ;;  %v2840_v11 = vld [vmem:[%s3662_s1 + $0x20] ss:$8 sps:$4 sm:$0xff]   ;;  %v2841_v12 = vld [vmem:[%s3662_s1 + $0x14] ss:$8 sps:$4 sm:$0xff]  }
  0x10   : > { %s3108_s28 = scalar_lea.vmem %s3661_s0, %s3099_s23  ;;  %v2843_v14 = vld [vmem:[%s3662_s1 + $0x10] ss:$8 sps:$4 sm:$0xff]   ;;  %v2844_v16 = vld [vmem:[%s3662_s1 + $0x4] ss:$8 sps:$4 sm:$0xff]   ;;  %v2846_v17 = vld [vmem:[%s3662_s1] ss:$8 sps:$4 sm:$0xff]   ;;  %s3548_s30 = scalar_lea.vmem %s3665_s4, %s3099_s23 }
  0x11   : > { %678 = vmatpush1.bf16.msra.mxu0 %v2828_v3  ;;  %2800 = vmatpush1.bf16.msra.mxu1 %v2828_v3  ;;  %v3114_v13 = vld [vmem:[%s3108_s28 + $0x4] ss:$8 sps:$4 sm:$0xff]   ;;  %v2847_v18 = vld [vmem:[%s3662_s1 + $0xf4] ss:$8 sps:$4 sm:$0xff]   ;;  %v2849_v19 = vld [vmem:[%s3662_s1 + $0xf0] ss:$8 sps:$4 sm:$0xff]   ;;  %s3586_s9 = scalar_lea.vmem %s3666_s5, %s3099_s23  ;;  %s3592_s12 = scalar_lea.vmem %s3667_s6, %s3099_s23 }
  0x12   : > { %679 = vmatprep.subr.bf16.mxu0 %v2829_v4  ;;  %2785 = vmatprep.subr.bf16.mxu1 %v2829_v4  ;;  %v3120_v15 = vld [vmem:[%s3108_s28 + $0x84] ss:$8 sps:$4 sm:$0xff]   ;;  %v2852_v21 = vld [vmem:[%s3662_s1 + $0xe0] ss:$8 sps:$4 sm:$0xff]   ;;  %v2853_v22 = vld [vmem:[%s3662_s1 + $0xd4] ss:$8 sps:$4 sm:$0xff]  }
  0x13   : > { %707 = vmatprep.mubr.bf16.mxu0 %v3114_v13  ;;  %787 = vmatprep.mubr.bf16.mxu1 %v3120_v15  ;;  %v2850_v20 = vld [vmem:[%s3662_s1 + $0xe4] ss:$8 sps:$4 sm:$0xff]   ;;  %v2855_v23 = vld [vmem:[%s3662_s1 + $0xd0] ss:$8 sps:$4 sm:$0xff]   ;;  %v2858_v25 = vld [vmem:[%s3662_s1 + $0xc0] ss:$8 sps:$4 sm:$0xff]  }
  0x14   : > { %v2856_v24 = vld [vmem:[%s3662_s1 + $0xc4] ss:$8 sps:$4 sm:$0xff]   ;;  %v2859_v26 = vld [vmem:[%s3662_s1 + $0xb4] ss:$8 sps:$4 sm:$0xff]   ;;  %v2861_v27 = vld [vmem:[%s3662_s1 + $0xb0] ss:$8 sps:$4 sm:$0xff]  }
  0x15   : > { %680 = vmatpush1.bf16.msra.mxu0 %v2831_v5  ;;  %2801 = vmatpush1.bf16.msra.mxu1 %v2831_v5  ;;  %v2862_v28 = vld [vmem:[%s3662_s1 + $0xa4] ss:$8 sps:$4 sm:$0xff]   ;;  %v2864_v29 = vld [vmem:[%s3662_s1 + $0xa0] ss:$8 sps:$4 sm:$0xff]   ;;  %v2865_v30 = vld [vmem:[%s3662_s1 + $0x94] ss:$8 sps:$4 sm:$0xff]  }
  0x16   : > { %681 = vmatprep.subr.bf16.mxu0 %v2832_v6  ;;  %2786 = vmatprep.subr.bf16.mxu1 %v2832_v6  ;;  %v2867_v31 = vld [vmem:[%s3662_s1 + $0x90] ss:$8 sps:$4 sm:$0xff]   ;;  %v2868_v32 = vld [vmem:[%s3662_s1 + $0x84] ss:$8 sps:$4 sm:$0xff]   ;;  %v2870_v33 = vld [vmem:[%s3662_s1 + $0x80] ss:$8 sps:$4 sm:$0xff]  }
  0x17   : > { %v2879_v34 = vld [vmem:[%s3663_s2 + $0x74] ss:$8 sps:$4 sm:$0xff]   ;;  %v3182_v35 = vld [vmem:[%s3108_s28] ss:$8 sps:$4 sm:$0xff]   ;;  %v2877_v38 = vld [vmem:[%s3663_s2 + $0x70] ss:$8 sps:$4 sm:$0xff]  }
  0x18   : > { %v2882_v36 = vld [vmem:[%s3664_s3 + $0x74] ss:$8 sps:$4 sm:$0xff]   ;;  %v3188_v37 = vld [vmem:[%s3108_s28 + $0x80] ss:$8 sps:$4 sm:$0xff]   ;;  %v2880_v39 = vld [vmem:[%s3664_s3 + $0x70] ss:$8 sps:$4 sm:$0xff]  }
  0x19   : > { %682 = vmatpush1.bf16.msra.mxu0 %v2834_v7  ;;  %2802 = vmatpush1.bf16.msra.mxu1 %v2834_v7  ;;  %v2885_v40 = vld [vmem:[%s3663_s2 + $0x64] ss:$8 sps:$4 sm:$0xff]   ;;  %v3203_v42 = vld [vmem:[%s3108_s28 + $0x14] ss:$8 sps:$4 sm:$0xff]   ;;  %v2883_v44 = vld [vmem:[%s3663_s2 + $0x60] ss:$8 sps:$4 sm:$0xff]  }
  0x1a   : > { %683 = vmatprep.subr.bf16.mxu0 %v2835_v8  ;;  %2787 = vmatprep.subr.bf16.mxu1 %v2835_v8  ;;  %v2888_v41 = vld [vmem:[%s3664_s3 + $0x64] ss:$8 sps:$4 sm:$0xff]   ;;  %v3206_v43 = vld [vmem:[%s3108_s28 + $0x94] ss:$8 sps:$4 sm:$0xff]   ;;  %v2886_v45 = vld [vmem:[%s3664_s3 + $0x60] ss:$8 sps:$4 sm:$0xff]  }
  0x1b   : > { %v2897_v46 = vld [vmem:[%s3663_s2 + $0x54] ss:$8 sps:$4 sm:$0xff]   ;;  %v3220_v47 = vld [vmem:[%s3108_s28 + $0x10] ss:$8 sps:$4 sm:$0xff]   ;;  %v2903_v52 = vld [vmem:[%s3663_s2 + $0x44] ss:$8 sps:$4 sm:$0xff]  }
  0x1c   : > { %v2900_v48 = vld [vmem:[%s3664_s3 + $0x54] ss:$8 sps:$4 sm:$0xff]   ;;  %v3228_v49 = vld [vmem:[%s3108_s28 + $0x90] ss:$8 sps:$4 sm:$0xff]   ;;  %v2906_v53 = vld [vmem:[%s3664_s3 + $0x44] ss:$8 sps:$4 sm:$0xff]  }
  0x1d   : > { %684 = vmatpush1.bf16.msra.mxu0 %v2837_v9  ;;  %2803 = vmatpush1.bf16.msra.mxu1 %v2837_v9  ;;  %v2895_v50 = vld [vmem:[%s3663_s2 + $0x50] ss:$8 sps:$4 sm:$0xff]   ;;  %v3243_v54 = vld [vmem:[%s3108_s28 + $0x24] ss:$8 sps:$4 sm:$0xff]   ;;  %v2901_v56 = vld [vmem:[%s3663_s2 + $0x40] ss:$8 sps:$4 sm:$0xff]  }
  0x1e   : > { %685 = vmatprep.subr.bf16.mxu0 %v2838_v10  ;;  %2788 = vmatprep.subr.bf16.mxu1 %v2838_v10  ;;  %v2898_v51 = vld [vmem:[%s3664_s3 + $0x50] ss:$8 sps:$4 sm:$0xff]   ;;  %v3246_v55 = vld [vmem:[%s3108_s28 + $0xa4] ss:$8 sps:$4 sm:$0xff]   ;;  %v2904_v57 = vld [vmem:[%s3664_s3 + $0x40] ss:$8 sps:$4 sm:$0xff]  }
  0x1f   : > { %v2915_v58 = vld [vmem:[%s3663_s2 + $0x34] ss:$8 sps:$4 sm:$0xff]   ;;  %v3260_v59 = vld [vmem:[%s3108_s28 + $0x20] ss:$8 sps:$4 sm:$0xff]   ;;  %v2913_v62 = vld [vmem:[%s3663_s2 + $0x30] ss:$8 sps:$4 sm:$0xff]  }
  0x20   : > { %v2918_v60 = vld [vmem:[%s3664_s3 + $0x34] ss:$8 sps:$4 sm:$0xff]   ;;  %v3268_v61 = vld [vmem:[%s3108_s28 + $0xa0] ss:$8 sps:$4 sm:$0xff]   ;;  %v2916_v63 = vld [vmem:[%s3664_s3 + $0x30] ss:$8 sps:$4 sm:$0xff]  }
  0x21   : > { %686 = vmatpush1.bf16.msra.mxu0 %v2840_v11  ;;  %2804 = vmatpush1.bf16.msra.mxu1 %v2840_v11  ;;  %v2921_v0 = vld [vmem:[%s3663_s2 + $0x24] ss:$8 sps:$4 sm:$0xff]   ;;  %v3283_v2 = vld [vmem:[%s3108_s28 + $0x34] ss:$8 sps:$4 sm:$0xff]   ;;  %v2919_v4 = vld [vmem:[%s3663_s2 + $0x20] ss:$8 sps:$4 sm:$0xff]  }
  0x22   : > { %687 = vmatprep.subr.bf16.mxu0 %v2841_v12  ;;  %2789 = vmatprep.subr.bf16.mxu1 %v2841_v12  ;;  %v2924_v1 = vld [vmem:[%s3664_s3 + $0x24] ss:$8 sps:$4 sm:$0xff]   ;;  %v3286_v3 = vld [vmem:[%s3108_s28 + $0xb4] ss:$8 sps:$4 sm:$0xff]   ;;  %v2922_v5 = vld [vmem:[%s3664_s3 + $0x20] ss:$8 sps:$4 sm:$0xff]  }
  0x23   : > { %v2933_v6 = vld [vmem:[%s3663_s2 + $0x14] ss:$8 sps:$4 sm:$0xff]   ;;  %v3305_v8 = vld [vmem:[%s3108_s28 + $0x30] ss:$8 sps:$4 sm:$0xff]   ;;  %v2939_v12 = vld [vmem:[%s3663_s2 + $0x4] ss:$8 sps:$4 sm:$0xff]  }
  0x24   : > { %v2936_v7 = vld [vmem:[%s3664_s3 + $0x14] ss:$8 sps:$4 sm:$0xff]   ;;  %v3308_v9 = vld [vmem:[%s3108_s28 + $0xb0] ss:$8 sps:$4 sm:$0xff]  }
  0x25   : > { %688 = vmatpush1.bf16.msra.mxu0 %v2843_v14  ;;  %2805 = vmatpush1.bf16.msra.mxu1 %v2843_v14  ;;  %v2931_v10 = vld [vmem:[%s3663_s2 + $0x10] ss:$8 sps:$4 sm:$0xff]   ;;  %v2942_v14 = vld [vmem:[%s3664_s3 + $0x4] ss:$8 sps:$4 sm:$0xff]  }
  0x26   : > { %689 = vmatprep.subr.bf16.mxu0 %v2844_v16  ;;  %2790 = vmatprep.subr.bf16.mxu1 %v2844_v16  ;;  %v2934_v11 = vld [vmem:[%s3664_s3 + $0x10] ss:$8 sps:$4 sm:$0xff]   ;;  %v3323_v16 = vld [vmem:[%s3108_s28 + $0x44] ss:$8 sps:$4 sm:$0xff]  }
  0x29   : > { %690 = vmatpush1.bf16.msra.mxu0 %v2846_v17  ;;  %2806 = vmatpush1.bf16.msra.mxu1 %v2846_v17  ;;  %v3326_v17 = vld [vmem:[%s3108_s28 + $0xc4] ss:$8 sps:$4 sm:$0xff]  }
  0x2a   : > { %691 = vmatprep.subr.bf16.mxu0 %v2847_v18  ;;  %2791 = vmatprep.subr.bf16.mxu1 %v2847_v18  ;;  %v2937_v18 = vld [vmem:[%s3663_s2] ss:$8 sps:$4 sm:$0xff]  }
  0x2d   : > { %692 = vmatpush2.bf16.msra.mxu0 %v2849_v19  ;;  %2807 = vmatpush2.bf16.msra.mxu1 %v2849_v19  ;;  %v2940_v19 = vld [vmem:[%s3664_s3] ss:$8 sps:$4 sm:$0xff]  }
  0x2e   : > { %693 = vmatprep.subr.bf16.mxu0 %v2850_v20  ;;  %2792 = vmatprep.subr.bf16.mxu1 %v2850_v20  ;;  %v2951_v20 = vld [vmem:[%s3663_s2 + $0xf4] ss:$8 sps:$4 sm:$0xff]  }
  0x31   : > { %694 = vmatpush2.bf16.msra.mxu0 %v2852_v21  ;;  %2808 = vmatpush2.bf16.msra.mxu1 %v2852_v21  ;;  %v2954_v21 = vld [vmem:[%s3664_s3 + $0xf4] ss:$8 sps:$4 sm:$0xff]  }
  0x32   : > { %695 = vmatprep.subr.bf16.mxu0 %v2853_v22  ;;  %2793 = vmatprep.subr.bf16.mxu1 %v2853_v22  ;;  %v3345_v22 = vld [vmem:[%s3108_s28 + $0x40] ss:$8 sps:$4 sm:$0xff]  }
  0x35   : > { %696 = vmatpush2.bf16.msra.mxu0 %v2855_v23  ;;  %2809 = vmatpush2.bf16.msra.mxu1 %v2855_v23  ;;  %v3348_v23 = vld [vmem:[%s3108_s28 + $0xc0] ss:$8 sps:$4 sm:$0xff]  }
  0x36   : > { %697 = vmatprep.subr.bf16.mxu0 %v2856_v24  ;;  %2794 = vmatprep.subr.bf16.mxu1 %v2856_v24  ;;  %v2949_v24 = vld [vmem:[%s3663_s2 + $0xf0] ss:$8 sps:$4 sm:$0xff]  }
  0x39   : > { %698 = vmatpush2.bf16.msra.mxu0 %v2858_v25  ;;  %2810 = vmatpush2.bf16.msra.mxu1 %v2858_v25  ;;  %v2952_v25 = vld [vmem:[%s3664_s3 + $0xf0] ss:$8 sps:$4 sm:$0xff]  }
  0x3a   : > { %699 = vmatprep.subr.bf16.mxu0 %v2859_v26  ;;  %2795 = vmatprep.subr.bf16.mxu1 %v2859_v26  ;;  %v2957_v26 = vld [vmem:[%s3663_s2 + $0xe4] ss:$8 sps:$4 sm:$0xff]  }
  0x3d   : > { %700 = vmatpush2.bf16.msra.mxu0 %v2861_v27  ;;  %2811 = vmatpush2.bf16.msra.mxu1 %v2861_v27  ;;  %v2960_v27 = vld [vmem:[%s3664_s3 + $0xe4] ss:$8 sps:$4 sm:$0xff]  }
  0x3e   : > { %701 = vmatprep.subr.bf16.mxu0 %v2862_v28  ;;  %2796 = vmatprep.subr.bf16.mxu1 %v2862_v28  ;;  %v3363_v28 = vld [vmem:[%s3108_s28 + $0x54] ss:$8 sps:$4 sm:$0xff]  }
  0x41   : > { %702 = vmatpush2.bf16.msra.mxu0 %v2864_v29  ;;  %2812 = vmatpush2.bf16.msra.mxu1 %v2864_v29  ;;  %v3366_v29 = vld [vmem:[%s3108_s28 + $0xd4] ss:$8 sps:$4 sm:$0xff]  }
  0x42   : > { %703 = vmatprep.subr.bf16.mxu0 %v2865_v30  ;;  %2797 = vmatprep.subr.bf16.mxu1 %v2865_v30  ;;  %v2955_v30 = vld [vmem:[%s3663_s2 + $0xe0] ss:$8 sps:$4 sm:$0xff]  }
  0x45   : > { %704 = vmatpush2.bf16.msra.mxu0 %v2867_v31  ;;  %2813 = vmatpush2.bf16.msra.mxu1 %v2867_v31  ;;  %v2958_v31 = vld [vmem:[%s3664_s3 + $0xe0] ss:$8 sps:$4 sm:$0xff]  }
  0x46   : > { %705 = vmatprep.subr.bf16.mxu0 %v2868_v32  ;;  %2798 = vmatprep.subr.bf16.mxu1 %v2868_v32  ;;  %v2969_v32 = vld [vmem:[%s3663_s2 + $0xd4] ss:$8 sps:$4 sm:$0xff]  }
  0x49   : > { %706 = vmatpush2.bf16.msra.mxu0 %v2870_v33  ;;  %2814 = vmatpush2.bf16.msra.mxu1 %v2870_v33  ;;  %v2972_v33 = vld [vmem:[%s3664_s3 + $0xd4] ss:$8 sps:$4 sm:$0xff]  }
  0x4a   : > { %1284 = vmatprep.subr.bf16.mxu1 %v2879_v34  ;;  %1893 = vmatprep.subr.bf16.mxu0 %v2882_v36  ;;  %v3385_v34 = vld [vmem:[%s3108_s28 + $0x50] ss:$8 sps:$4 sm:$0xff]  }
  0x4b   : > { %v3388_v36 = vld [vmem:[%s3108_s28 + $0xd0] ss:$8 sps:$4 sm:$0xff]  }
  0x4c   : > { %708 = vmatmul.mubr.bf16.vlgmr.msra.gmra.mxu0 %v3182_v35  ;;  %788 = vmatmul.mubr.bf16.vlgmr.msra.gmra.mxu1 %v3188_v37 }
  0x4d   : > { %1285 = vmatpush1.bf16.msra.mxu1 %v2877_v38  ;;  %1894 = vmatpush1.bf16.msra.mxu0 %v2880_v39  ;;  %v2967_v38 = vld [vmem:[%s3663_s2 + $0xd0] ss:$8 sps:$4 sm:$0xff]  }
  0x4e   : > { %1286 = vmatprep.subr.bf16.mxu1 %v2885_v40  ;;  %1895 = vmatprep.subr.bf16.mxu0 %v2888_v41  ;;  %v2970_v39 = vld [vmem:[%s3664_s3 + $0xd0] ss:$8 sps:$4 sm:$0xff]   ;;  %v2975_v40 = vld [vmem:[%s3663_s2 + $0xc4] ss:$8 sps:$4 sm:$0xff]  }
  0x4f   : > { %717 = vmatprep.mubr.bf16.mxu0 %v3203_v42  ;;  %797 = vmatprep.mubr.bf16.mxu1 %v3206_v43  ;;  %v2978_v41 = vld [vmem:[%s3664_s3 + $0xc4] ss:$8 sps:$4 sm:$0xff]  }
  0x51   : > { %1287 = vmatpush1.bf16.msra.mxu1 %v2883_v44  ;;  %1896 = vmatpush1.bf16.msra.mxu0 %v2886_v45  ;;  %v3403_v44 = vld [vmem:[%s3108_s28 + $0x64] ss:$8 sps:$4 sm:$0xff]  }
  0x52   : > { %1288 = vmatprep.subr.bf16.mxu1 %v2897_v46  ;;  %1897 = vmatprep.subr.bf16.mxu0 %v2900_v48  ;;  %v3406_v45 = vld [vmem:[%s3108_s28 + $0xe4] ss:$8 sps:$4 sm:$0xff]   ;;  %v2973_v46 = vld [vmem:[%s3663_s2 + $0xc0] ss:$8 sps:$4 sm:$0xff]  }
  0x53   : > { %v2976_v48 = vld [vmem:[%s3664_s3 + $0xc0] ss:$8 sps:$4 sm:$0xff]  }
  0x54   : > { %718 = vmatmul.mubr.bf16.gmra.mxu0 %v3220_v47  ;;  %798 = vmatmul.mubr.bf16.gmra.mxu1 %v3228_v49 }
  0x55   : > { %1289 = vmatpush1.bf16.msra.mxu1 %v2895_v50  ;;  %1898 = vmatpush1.bf16.msra.mxu0 %v2898_v51  ;;  %v2987_v50 = vld [vmem:[%s3663_s2 + $0xb4] ss:$8 sps:$4 sm:$0xff]  }
  0x56   : > { %1290 = vmatprep.subr.bf16.mxu1 %v2903_v52  ;;  %1899 = vmatprep.subr.bf16.mxu0 %v2906_v53  ;;  %v2990_v51 = vld [vmem:[%s3664_s3 + $0xb4] ss:$8 sps:$4 sm:$0xff]   ;;  %v3425_v52 = vld [vmem:[%s3108_s28 + $0x60] ss:$8 sps:$4 sm:$0xff]  }
  0x57   : > { %727 = vmatprep.mubr.bf16.mxu0 %v3243_v54  ;;  %807 = vmatprep.mubr.bf16.mxu1 %v3246_v55  ;;  %v3428_v53 = vld [vmem:[%s3108_s28 + $0xe0] ss:$8 sps:$4 sm:$0xff]  }
  0x59   : > { %1291 = vmatpush1.bf16.msra.mxu1 %v2901_v56  ;;  %1900 = vmatpush1.bf16.msra.mxu0 %v2904_v57  ;;  %v2985_v56 = vld [vmem:[%s3663_s2 + $0xb0] ss:$8 sps:$4 sm:$0xff]  }
  0x5a   : > { %1292 = vmatprep.subr.bf16.mxu1 %v2915_v58  ;;  %1901 = vmatprep.subr.bf16.mxu0 %v2918_v60  ;;  %v2988_v57 = vld [vmem:[%s3664_s3 + $0xb0] ss:$8 sps:$4 sm:$0xff]   ;;  %v2993_v58 = vld [vmem:[%s3663_s2 + $0xa4] ss:$8 sps:$4 sm:$0xff]  }
  0x5b   : > { %v2996_v60 = vld [vmem:[%s3664_s3 + $0xa4] ss:$8 sps:$4 sm:$0xff]  }
  0x5c   : > { %728 = vmatmul.mubr.bf16.gmra.mxu0 %v3260_v59  ;;  %808 = vmatmul.mubr.bf16.gmra.mxu1 %v3268_v61 }
  0x5d   : > { %1293 = vmatpush1.bf16.msra.mxu1 %v2913_v62  ;;  %1902 = vmatpush1.bf16.msra.mxu0 %v2916_v63  ;;  %v2997_v62 = vld [vmem:[%s3108_s28 + $0x74] ss:$8 sps:$4 sm:$0xff]  }
  0x5e   : > { %1294 = vmatprep.subr.bf16.mxu1 %v2921_v0  ;;  %1903 = vmatprep.subr.bf16.mxu0 %v2924_v1  ;;  %v3444_v63 = vld [vmem:[%s3108_s28 + $0xf4] ss:$8 sps:$4 sm:$0xff]   ;;  %v2991_v0 = vld [vmem:[%s3663_s2 + $0xa0] ss:$8 sps:$4 sm:$0xff]  }
  0x5f   : > { %737 = vmatprep.mubr.bf16.mxu0 %v3283_v2  ;;  %817 = vmatprep.mubr.bf16.mxu1 %v3286_v3  ;;  %v2994_v1 = vld [vmem:[%s3664_s3 + $0xa0] ss:$8 sps:$4 sm:$0xff]  }
  0x61   : > { %1295 = vmatpush1.bf16.msra.mxu1 %v2919_v4  ;;  %1904 = vmatpush1.bf16.msra.mxu0 %v2922_v5  ;;  %v3005_v4 = vld [vmem:[%s3663_s2 + $0x94] ss:$8 sps:$4 sm:$0xff]  }
  0x62   : > { %1296 = vmatprep.subr.bf16.mxu1 %v2933_v6  ;;  %1905 = vmatprep.subr.bf16.mxu0 %v2936_v7  ;;  %v3008_v5 = vld [vmem:[%s3664_s3 + $0x94] ss:$8 sps:$4 sm:$0xff]   ;;  %v3001_v6 = vld [vmem:[%s3108_s28 + $0x70] ss:$8 sps:$4 sm:$0xff]  }
  0x63   : > { %v3463_v7 = vld [vmem:[%s3108_s28 + $0xf0] ss:$8 sps:$4 sm:$0xff]  }
  0x64   : > { %738 = vmatmul.mubr.bf16.gmra.mxu0 %v3305_v8  ;;  %818 = vmatmul.mubr.bf16.gmra.mxu1 %v3308_v9 }
  0x65   : > { %1297 = vmatpush1.bf16.msra.mxu1 %v2931_v10  ;;  %1906 = vmatpush1.bf16.msra.mxu0 %v2934_v11  ;;  %v3003_v10 = vld [vmem:[%s3663_s2 + $0x90] ss:$8 sps:$4 sm:$0xff]  }
  0x66   : > { %1298 = vmatprep.subr.bf16.mxu1 %v2939_v12  ;;  %1907 = vmatprep.subr.bf16.mxu0 %v2942_v14  ;;  %v3006_v11 = vld [vmem:[%s3664_s3 + $0x90] ss:$8 sps:$4 sm:$0xff]   ;;  %v3011_v12 = vld [vmem:[%s3663_s2 + $0x84] ss:$8 sps:$4 sm:$0xff]  }
  0x67   : > { %747 = vmatprep.mubr.bf16.mxu0 %v3323_v16  ;;  %827 = vmatprep.mubr.bf16.mxu1 %v3326_v17  ;;  %v3014_v14 = vld [vmem:[%s3664_s3 + $0x84] ss:$8 sps:$4 sm:$0xff]  }
  0x69   : > { %1299 = vmatpush1.bf16.msra.mxu1 %v2937_v18  ;;  %1908 = vmatpush1.bf16.msra.mxu0 %v2940_v19  ;;  %v3009_v18 = vld [vmem:[%s3663_s2 + $0x80] ss:$8 sps:$4 sm:$0xff]  }
  0x6a   : > { %1300 = vmatprep.subr.bf16.mxu1 %v2951_v20  ;;  %1909 = vmatprep.subr.bf16.mxu0 %v2954_v21  ;;  %v3012_v19 = vld [vmem:[%s3664_s3 + $0x80] ss:$8 sps:$4 sm:$0xff]  }
  0x6c   : > { %748 = vmatmul.mubr.bf16.gmra.mxu0 %v3345_v22  ;;  %828 = vmatmul.mubr.bf16.gmra.mxu1 %v3348_v23 }
  0x6d   : > { %1301 = vmatpush2.bf16.msra.mxu1 %v2949_v24  ;;  %1910 = vmatpush2.bf16.msra.mxu0 %v2952_v25 }
  0x6e   : > { %1302 = vmatprep.subr.bf16.mxu1 %v2957_v26  ;;  %1911 = vmatprep.subr.bf16.mxu0 %v2960_v27 }
  0x6f   : > { %757 = vmatprep.mubr.bf16.mxu0 %v3363_v28  ;;  %837 = vmatprep.mubr.bf16.mxu1 %v3366_v29 }
  0x71   : > { %1303 = vmatpush2.bf16.msra.mxu1 %v2955_v30  ;;  %1912 = vmatpush2.bf16.msra.mxu0 %v2958_v31 }
  0x72   : > { %1304 = vmatprep.subr.bf16.mxu1 %v2969_v32  ;;  %1913 = vmatprep.subr.bf16.mxu0 %v2972_v33 }
  0x74   : > { %758 = vmatmul.mubr.bf16.gmra.mxu0 %v3385_v34  ;;  %838 = vmatmul.mubr.bf16.gmra.mxu1 %v3388_v36 }
  0x75   : > { %1305 = vmatpush2.bf16.msra.mxu1 %v2967_v38  ;;  %1914 = vmatpush2.bf16.msra.mxu0 %v2970_v39 }
  0x76   : > { %1306 = vmatprep.subr.bf16.mxu1 %v2975_v40  ;;  %1915 = vmatprep.subr.bf16.mxu0 %v2978_v41 }
  0x77   : > { %767 = vmatprep.mubr.bf16.mxu0 %v3403_v44  ;;  %847 = vmatprep.mubr.bf16.mxu1 %v3406_v45 }
  0x79   : > { %1307 = vmatpush2.bf16.msra.mxu1 %v2973_v46  ;;  %1916 = vmatpush2.bf16.msra.mxu0 %v2976_v48 }
  0x7a   : > { %1308 = vmatprep.subr.bf16.mxu1 %v2987_v50  ;;  %1917 = vmatprep.subr.bf16.mxu0 %v2990_v51 }
  0x7c   : > { %768 = vmatmul.mubr.bf16.gmra.mxu0 %v3425_v52  ;;  %848 = vmatmul.mubr.bf16.gmra.mxu1 %v3428_v53 }
  0x7d   : > { %1309 = vmatpush2.bf16.msra.mxu1 %v2985_v56  ;;  %1918 = vmatpush2.bf16.msra.mxu0 %v2988_v57 }
  0x7e   : > { %1310 = vmatprep.subr.bf16.mxu1 %v2993_v58  ;;  %1919 = vmatprep.subr.bf16.mxu0 %v2996_v60 }
  0x7f   : > { %777 = vmatprep.mubr.bf16.mxu0 %v2997_v62  ;;  %857 = vmatprep.mubr.bf16.mxu1 %v3444_v63 }
  0x81   : > { %1311 = vmatpush2.bf16.msra.mxu1 %v2991_v0  ;;  %1920 = vmatpush2.bf16.msra.mxu0 %v2994_v1 }
  0x82   : > { %1312 = vmatprep.subr.bf16.mxu1 %v3005_v4  ;;  %1921 = vmatprep.subr.bf16.mxu0 %v3008_v5 }
  0x84   : > { %778 = vmatmul.mubr.bf16.gmra.mxu0 %v3001_v6  ;;  %858 = vmatmul.mubr.bf16.gmra.mxu1 %v3463_v7 }
  0x85   : > { %1313 = vmatpush2.bf16.msra.mxu1 %v3003_v10  ;;  %1922 = vmatpush2.bf16.msra.mxu0 %v3006_v11 }
  0x86   : > { %1314 = vmatprep.subr.bf16.mxu1 %v3011_v12  ;;  %1923 = vmatprep.subr.bf16.mxu0 %v3014_v14 }
  0x87   : > { %1316 = vmatprep.mubr.bf16.mxu1 %v3114_v13  ;;  %1925 = vmatprep.mubr.bf16.mxu0 %v3114_v13 }
  0x89   : > { %1315 = vmatpush2.bf16.msra.mxu1 %v3009_v18  ;;  %1924 = vmatpush2.bf16.msra.mxu0 %v3012_v19 }
  0x8c   : > { %1317 = vmatmul.mubr.bf16.vlgmr.msra.gmra.mxu1 %v3182_v35  ;;  %1926 = vmatmul.mubr.bf16.vlgmr.msra.gmra.mxu0 %v3182_v35 }
  0x8d   : > { %1326 = vmatprep.mubr.bf16.mxu1 %v3203_v42  ;;  %1935 = vmatprep.mubr.bf16.mxu0 %v3203_v42 }
  0x94   : > { %1327 = vmatmul.mubr.bf16.gmra.mxu1 %v3220_v47  ;;  %1936 = vmatmul.mubr.bf16.gmra.mxu0 %v3220_v47 }
  0x95   : > { %1336 = vmatprep.mubr.bf16.mxu1 %v3243_v54  ;;  %1945 = vmatprep.mubr.bf16.mxu0 %v3243_v54 }
  0x9c   : > { %1337 = vmatmul.mubr.bf16.gmra.mxu1 %v3260_v59  ;;  %1946 = vmatmul.mubr.bf16.gmra.mxu0 %v3260_v59 }
  0x9d   : > { %1346 = vmatprep.mubr.bf16.mxu1 %v3283_v2  ;;  %1955 = vmatprep.mubr.bf16.mxu0 %v3283_v2 }
  0xa4   : > { %1347 = vmatmul.mubr.bf16.gmra.mxu1 %v3305_v8  ;;  %1956 = vmatmul.mubr.bf16.gmra.mxu0 %v3305_v8 }
  0xa5   : > { %1356 = vmatprep.mubr.bf16.mxu1 %v3323_v16  ;;  %1965 = vmatprep.mubr.bf16.mxu0 %v3323_v16 }
  0xac   : > { %1357 = vmatmul.mubr.bf16.gmra.mxu1 %v3345_v22  ;;  %1966 = vmatmul.mubr.bf16.gmra.mxu0 %v3345_v22 }
  0xad   : > { %1366 = vmatprep.mubr.bf16.mxu1 %v3363_v28  ;;  %1975 = vmatprep.mubr.bf16.mxu0 %v3363_v28 }
  0xb4   : > { %1367 = vmatmul.mubr.bf16.gmra.mxu1 %v3385_v34  ;;  %1976 = vmatmul.mubr.bf16.gmra.mxu0 %v3385_v34 }
  0xb5   : > { %1376 = vmatprep.mubr.bf16.mxu1 %v3403_v44  ;;  %1985 = vmatprep.mubr.bf16.mxu0 %v3403_v44 }
  0xbc   : > { %1377 = vmatmul.mubr.bf16.gmra.mxu1 %v3425_v52  ;;  %1986 = vmatmul.mubr.bf16.gmra.mxu0 %v3425_v52 }
  0xbd   : > { %1386 = vmatprep.mubr.bf16.mxu1 %v2997_v62  ;;  %1995 = vmatprep.mubr.bf16.mxu0 %v2997_v62 }
  0xc4   : > { %1387 = vmatmul.mubr.bf16.gmra.mxu1 %v3001_v6  ;;  %1996 = vmatmul.mubr.bf16.gmra.mxu0 %v3001_v6 }
  0xc5   : > { %1396 = vmatprep.mubr.bf16.mxu1 %v3120_v15  ;;  %2005 = vmatprep.mubr.bf16.mxu0 %v3120_v15 }
  0xcc   : > { %1397 = vmatmul.mubr.bf16.gmra.mxu1 %v3188_v37  ;;  %2006 = vmatmul.mubr.bf16.gmra.mxu0 %v3188_v37 }
  0xcd   : > { %1406 = vmatprep.mubr.bf16.mxu1 %v3206_v43  ;;  %2015 = vmatprep.mubr.bf16.mxu0 %v3206_v43 }
  0xd4   : > { %1407 = vmatmul.mubr.bf16.gmra.mxu1 %v3228_v49  ;;  %2016 = vmatmul.mubr.bf16.gmra.mxu0 %v3228_v49 }
  0xd5   : > { %1416 = vmatprep.mubr.bf16.mxu1 %v3246_v55  ;;  %2025 = vmatprep.mubr.bf16.mxu0 %v3246_v55 }
  0xdc   : > { %1417 = vmatmul.mubr.bf16.gmra.mxu1 %v3268_v61  ;;  %2026 = vmatmul.mubr.bf16.gmra.mxu0 %v3268_v61 }
  0xdd   : > { %1426 = vmatprep.mubr.bf16.mxu1 %v3286_v3  ;;  %2035 = vmatprep.mubr.bf16.mxu0 %v3286_v3 }
  0xe4   : > { %1427 = vmatmul.mubr.bf16.gmra.mxu1 %v3308_v9  ;;  %2036 = vmatmul.mubr.bf16.gmra.mxu0 %v3308_v9 }
  0xe5   : > { %1436 = vmatprep.mubr.bf16.mxu1 %v3326_v17  ;;  %2045 = vmatprep.mubr.bf16.mxu0 %v3326_v17 }
  0xec   : > { %1437 = vmatmul.mubr.bf16.gmra.mxu1 %v3348_v23  ;;  %2046 = vmatmul.mubr.bf16.gmra.mxu0 %v3348_v23 }
  0xed   : > { %1446 = vmatprep.mubr.bf16.mxu1 %v3366_v29  ;;  %2055 = vmatprep.mubr.bf16.mxu0 %v3366_v29 }
  0xf4   : > { %1447 = vmatmul.mubr.bf16.gmra.mxu1 %v3388_v36  ;;  %2056 = vmatmul.mubr.bf16.gmra.mxu0 %v3388_v36 }
  0xf5   : > { %1456 = vmatprep.mubr.bf16.mxu1 %v3406_v45  ;;  %2065 = vmatprep.mubr.bf16.mxu0 %v3406_v45 }
  0xfc   : > { %1457 = vmatmul.mubr.bf16.gmra.mxu1 %v3428_v53  ;;  %2066 = vmatmul.mubr.bf16.gmra.mxu0 %v3428_v53 }
  0xfd   : > { %1466 = vmatprep.mubr.bf16.mxu1 %v3444_v63  ;;  %2075 = vmatprep.mubr.bf16.mxu0 %v3444_v63 }
 0x104   : > { %1467 = vmatmul.mubr.bf16.gmra.mxu1 %v3463_v7  ;;  %2076 = vmatmul.mubr.bf16.gmra.mxu0 %v3463_v7 }
 0x10c   : > { %v709_v13 = vpop.f32.mrf.mxu0  ;;  %v789_v15 = vpop.f32.mrf.mxu1 }
 0x10e   : > { %v711_v35 = vpop.f32.mrf.mxu0  ;;  %v791_v37 = vpop.f32.mrf.mxu1 }
 0x10f   : > { %v2687_v42 = vpack.c.bf16 %v711_v35, %v709_v13  ;;  %v2703_v43 = vpack.c.bf16 %v791_v37, %v789_v15 }
 0x110   : > { %v713_v47 = vpop.f32.mrf.mxu0  ;;  %v793_v49 = vpop.f32.mrf.mxu1 }
 0x111   : > { %1060 = vst [vmem:[%s3548_s30] sm:$0xff] %v2687_v42  ;;  %1076 = vst [vmem:[%s3548_s30 + $0x80] sm:$0xff] %v2703_v43 }
 0x112   : > { %v715_v54 = vpop.f32.mrf.mxu0  ;;  %v795_v55 = vpop.f32.mrf.mxu1 }
 0x113   : > { %v2688_v59 = vpack.c.bf16 %v715_v54, %v713_v47  ;;  %v2704_v61 = vpack.c.bf16 %v795_v55, %v793_v49 }
 0x114   : > { %v719_v2 = vpop.f32.mrf.mxu0  ;;  %v799_v3 = vpop.f32.mrf.mxu1 }
 0x115   : > { %1061 = vst [vmem:[%s3548_s30 + $0x8] sm:$0xff] %v2688_v59  ;;  %1077 = vst [vmem:[%s3548_s30 + $0x88] sm:$0xff] %v2704_v61 }
 0x116   : > { %v721_v8 = vpop.f32.mrf.mxu0  ;;  %v801_v9 = vpop.f32.mrf.mxu1 }
 0x117   : > { %v2689_v16 = vpack.c.bf16 %v721_v8, %v719_v2  ;;  %v2705_v17 = vpack.c.bf16 %v801_v9, %v799_v3 }
 0x118   : > { %v723_v20 = vpop.f32.mrf.mxu0  ;;  %v803_v21 = vpop.f32.mrf.mxu1 }
 0x119   : > { %1062 = vst [vmem:[%s3548_s30 + $0x10] sm:$0xff] %v2689_v16  ;;  %1078 = vst [vmem:[%s3548_s30 + $0x90] sm:$0xff] %v2705_v17 }
 0x11a   : > { %v725_v22 = vpop.f32.mrf.mxu0  ;;  %v805_v23 = vpop.f32.mrf.mxu1 }
 0x11b   : > { %v2690_v24 = vpack.c.bf16 %v725_v22, %v723_v20  ;;  %v2706_v25 = vpack.c.bf16 %v805_v23, %v803_v21 }
 0x11c   : > { %v729_v26 = vpop.f32.mrf.mxu0  ;;  %v809_v27 = vpop.f32.mrf.mxu1 }
 0x11d   : > { %1063 = vst [vmem:[%s3548_s30 + $0x18] sm:$0xff] %v2690_v24  ;;  %1079 = vst [vmem:[%s3548_s30 + $0x98] sm:$0xff] %v2706_v25 }
 0x11e   : > { %v731_v28 = vpop.f32.mrf.mxu0  ;;  %v811_v29 = vpop.f32.mrf.mxu1 }
 0x11f   : > { %v2691_v30 = vpack.c.bf16 %v731_v28, %v729_v26  ;;  %v2707_v31 = vpack.c.bf16 %v811_v29, %v809_v27 }
 0x120   : > { %v733_v32 = vpop.f32.mrf.mxu0  ;;  %v813_v33 = vpop.f32.mrf.mxu1 }
 0x121   : > { %1064 = vst [vmem:[%s3548_s30 + $0x20] sm:$0xff] %v2691_v30  ;;  %1080 = vst [vmem:[%s3548_s30 + $0xa0] sm:$0xff] %v2707_v31 }
 0x122   : > { %v735_v34 = vpop.f32.mrf.mxu0  ;;  %v815_v36 = vpop.f32.mrf.mxu1 }
 0x123   : > { %v2692_v38 = vpack.c.bf16 %v735_v34, %v733_v32  ;;  %v2708_v39 = vpack.c.bf16 %v815_v36, %v813_v33 }
 0x124   : > { %v739_v40 = vpop.f32.mrf.mxu0  ;;  %v819_v41 = vpop.f32.mrf.mxu1 }
 0x125   : > { %1065 = vst [vmem:[%s3548_s30 + $0x28] sm:$0xff] %v2692_v38  ;;  %1081 = vst [vmem:[%s3548_s30 + $0xa8] sm:$0xff] %v2708_v39 }
 0x126   : > { %v741_v44 = vpop.f32.mrf.mxu0  ;;  %v821_v45 = vpop.f32.mrf.mxu1 }
 0x127   : > { %v2693_v46 = vpack.c.bf16 %v741_v44, %v739_v40  ;;  %v2709_v48 = vpack.c.bf16 %v821_v45, %v819_v41 }
 0x128   : > { %v743_v50 = vpop.f32.mrf.mxu0  ;;  %v823_v51 = vpop.f32.mrf.mxu1 }
 0x129   : > { %1066 = vst [vmem:[%s3548_s30 + $0x30] sm:$0xff] %v2693_v46  ;;  %1082 = vst [vmem:[%s3548_s30 + $0xb0] sm:$0xff] %v2709_v48 }
 0x12a   : > { %v745_v52 = vpop.f32.mrf.mxu0  ;;  %v825_v53 = vpop.f32.mrf.mxu1 }
 0x12b   : > { %v2694_v56 = vpack.c.bf16 %v745_v52, %v743_v50  ;;  %v2710_v57 = vpack.c.bf16 %v825_v53, %v823_v51 }
 0x12c   : > { %v749_v58 = vpop.f32.mrf.mxu0  ;;  %v829_v60 = vpop.f32.mrf.mxu1 }
 0x12d   : > { %1067 = vst [vmem:[%s3548_s30 + $0x38] sm:$0xff] %v2694_v56  ;;  %1083 = vst [vmem:[%s3548_s30 + $0xb8] sm:$0xff] %v2710_v57 }
 0x12e   : > { %v751_v62 = vpop.f32.mrf.mxu0  ;;  %v831_v63 = vpop.f32.mrf.mxu1 }
 0x12f   : > { %v2695_v0 = vpack.c.bf16 %v751_v62, %v749_v58  ;;  %v2711_v1 = vpack.c.bf16 %v831_v63, %v829_v60 }
 0x130   : > { %v753_v4 = vpop.f32.mrf.mxu0  ;;  %v833_v5 = vpop.f32.mrf.mxu1 }
 0x131   : > { %1068 = vst [vmem:[%s3548_s30 + $0x40] sm:$0xff] %v2695_v0  ;;  %1084 = vst [vmem:[%s3548_s30 + $0xc0] sm:$0xff] %v2711_v1 }
 0x132   : > { %v755_v6 = vpop.f32.mrf.mxu0  ;;  %v835_v7 = vpop.f32.mrf.mxu1 }
 0x133   : > { %v2696_v10 = vpack.c.bf16 %v755_v6, %v753_v4  ;;  %v2712_v11 = vpack.c.bf16 %v835_v7, %v833_v5 }
 0x134   : > { %v759_v12 = vpop.f32.mrf.mxu0  ;;  %v839_v14 = vpop.f32.mrf.mxu1 }
 0x135   : > { %1069 = vst [vmem:[%s3548_s30 + $0x48] sm:$0xff] %v2696_v10  ;;  %1085 = vst [vmem:[%s3548_s30 + $0xc8] sm:$0xff] %v2712_v11 }
 0x136   : > { %v761_v18 = vpop.f32.mrf.mxu0  ;;  %v841_v19 = vpop.f32.mrf.mxu1 }
 0x137   : > { %v2697_v13 = vpack.c.bf16 %v761_v18, %v759_v12  ;;  %v2713_v15 = vpack.c.bf16 %v841_v19, %v839_v14 }
 0x138   : > { %v763_v35 = vpop.f32.mrf.mxu0  ;;  %v843_v37 = vpop.f32.mrf.mxu1 }
 0x139   : > { %1070 = vst [vmem:[%s3548_s30 + $0x50] sm:$0xff] %v2697_v13  ;;  %1086 = vst [vmem:[%s3548_s30 + $0xd0] sm:$0xff] %v2713_v15 }
 0x13a   : > { %v765_v42 = vpop.f32.mrf.mxu0  ;;  %v845_v43 = vpop.f32.mrf.mxu1 }
 0x13b   : > { %v2698_v47 = vpack.c.bf16 %v765_v42, %v763_v35  ;;  %v2714_v49 = vpack.c.bf16 %v845_v43, %v843_v37 }
 0x13c   : > { %v769_v54 = vpop.f32.mrf.mxu0  ;;  %v849_v55 = vpop.f32.mrf.mxu1 }
 0x13d   : > { %1071 = vst [vmem:[%s3548_s30 + $0x58] sm:$0xff] %v2698_v47  ;;  %1087 = vst [vmem:[%s3548_s30 + $0xd8] sm:$0xff] %v2714_v49 }
 0x13e   : > { %v771_v59 = vpop.f32.mrf.mxu0  ;;  %v851_v61 = vpop.f32.mrf.mxu1 }
 0x13f   : > { %v2699_v2 = vpack.c.bf16 %v771_v59, %v769_v54  ;;  %v2715_v3 = vpack.c.bf16 %v851_v61, %v849_v55 }
 0x140   : > { %v773_v8 = vpop.f32.mrf.mxu0  ;;  %v853_v9 = vpop.f32.mrf.mxu1 }
 0x141   : > { %1072 = vst [vmem:[%s3548_s30 + $0x60] sm:$0xff] %v2699_v2  ;;  %1088 = vst [vmem:[%s3548_s30 + $0xe0] sm:$0xff] %v2715_v3 }
 0x142   : > { %v775_v16 = vpop.f32.mrf.mxu0  ;;  %v855_v17 = vpop.f32.mrf.mxu1 }
 0x143   : > { %v2700_v20 = vpack.c.bf16 %v775_v16, %v773_v8  ;;  %v2716_v21 = vpack.c.bf16 %v855_v17, %v853_v9 }
 0x144   : > { %v779_v22 = vpop.f32.mrf.mxu0  ;;  %v859_v23 = vpop.f32.mrf.mxu1 }
 0x145   : > { %1073 = vst [vmem:[%s3548_s30 + $0x68] sm:$0xff] %v2700_v20  ;;  %1089 = vst [vmem:[%s3548_s30 + $0xe8] sm:$0xff] %v2716_v21 }
 0x146   : > { %v781_v24 = vpop.f32.mrf.mxu0  ;;  %v861_v25 = vpop.f32.mrf.mxu1 }
 0x147   : > { %v2701_v26 = vpack.c.bf16 %v781_v24, %v779_v22  ;;  %v2717_v27 = vpack.c.bf16 %v861_v25, %v859_v23 }
 0x148   : > { %v783_v28 = vpop.f32.mrf.mxu0  ;;  %v863_v29 = vpop.f32.mrf.mxu1 }
 0x149   : > { %1074 = vst [vmem:[%s3548_s30 + $0x70] sm:$0xff] %v2701_v26  ;;  %1090 = vst [vmem:[%s3548_s30 + $0xf0] sm:$0xff] %v2717_v27 }
 0x14a   : > { %v785_v30 = vpop.f32.mrf.mxu0  ;;  %v865_v31 = vpop.f32.mrf.mxu1 }
 0x14b   : > { %v2702_v32 = vpack.c.bf16 %v785_v30, %v783_v28  ;;  %v2718_v33 = vpack.c.bf16 %v865_v31, %v863_v29 }
 0x14c   : > { %v1318_v34 = vpop.f32.mrf.mxu1  ;;  %v1927_v36 = vpop.f32.mrf.mxu0 }
 0x14d   : > { %1075 = vst [vmem:[%s3548_s30 + $0x78] sm:$0xff] %v2702_v32  ;;  %1091 = vst [vmem:[%s3548_s30 + $0xf8] sm:$0xff] %v2718_v33 }
 0x14e   : > { %v1320_v38 = vpop.f32.mrf.mxu1  ;;  %v1929_v39 = vpop.f32.mrf.mxu0 }
 0x14f   : > { %v2719_v40 = vpack.c.bf16 %v1320_v38, %v1318_v34  ;;  %v2751_v41 = vpack.c.bf16 %v1929_v39, %v1927_v36 }
 0x150   : > { %v1322_v44 = vpop.f32.mrf.mxu1  ;;  %v1931_v45 = vpop.f32.mrf.mxu0 }
 0x151   : > { %1669 = vst [vmem:[%s3586_s9] sm:$0xff] %v2719_v40  ;;  %2278 = vst [vmem:[%s3592_s12] sm:$0xff] %v2751_v41 }
 0x152   : > { %v1324_v46 = vpop.f32.mrf.mxu1  ;;  %v1933_v48 = vpop.f32.mrf.mxu0 }
 0x153   : > { %v2720_v50 = vpack.c.bf16 %v1324_v46, %v1322_v44  ;;  %v2752_v51 = vpack.c.bf16 %v1933_v48, %v1931_v45 }
 0x154   : > { %v1328_v52 = vpop.f32.mrf.mxu1  ;;  %v1937_v53 = vpop.f32.mrf.mxu0 }
 0x155   : > { %1670 = vst [vmem:[%s3586_s9 + $0x8] sm:$0xff] %v2720_v50  ;;  %2279 = vst [vmem:[%s3592_s12 + $0x8] sm:$0xff] %v2752_v51 }
 0x156   : > { %v1330_v56 = vpop.f32.mrf.mxu1  ;;  %v1939_v57 = vpop.f32.mrf.mxu0 }
 0x157   : > { %v2721_v58 = vpack.c.bf16 %v1330_v56, %v1328_v52  ;;  %v2753_v60 = vpack.c.bf16 %v1939_v57, %v1937_v53 }
 0x158   : > { %v1332_v62 = vpop.f32.mrf.mxu1  ;;  %v1941_v63 = vpop.f32.mrf.mxu0 }
 0x159   : > { %1671 = vst [vmem:[%s3586_s9 + $0x10] sm:$0xff] %v2721_v58  ;;  %2280 = vst [vmem:[%s3592_s12 + $0x10] sm:$0xff] %v2753_v60 }
 0x15a   : > { %v1334_v0 = vpop.f32.mrf.mxu1  ;;  %v1943_v1 = vpop.f32.mrf.mxu0 }
 0x15b   : > { %v2722_v4 = vpack.c.bf16 %v1334_v0, %v1332_v62  ;;  %v2754_v5 = vpack.c.bf16 %v1943_v1, %v1941_v63 }
 0x15c   : > { %v1338_v6 = vpop.f32.mrf.mxu1  ;;  %v1947_v7 = vpop.f32.mrf.mxu0 }
 0x15d   : > { %1672 = vst [vmem:[%s3586_s9 + $0x18] sm:$0xff] %v2722_v4  ;;  %2281 = vst [vmem:[%s3592_s12 + $0x18] sm:$0xff] %v2754_v5 }
 0x15e   : > { %v1340_v10 = vpop.f32.mrf.mxu1  ;;  %v1949_v11 = vpop.f32.mrf.mxu0 }
 0x15f   : > { %v2723_v12 = vpack.c.bf16 %v1340_v10, %v1338_v6  ;;  %v2755_v14 = vpack.c.bf16 %v1949_v11, %v1947_v7 }
 0x160   : > { %v1342_v18 = vpop.f32.mrf.mxu1  ;;  %v1951_v19 = vpop.f32.mrf.mxu0 }
 0x161   : > { %1673 = vst [vmem:[%s3586_s9 + $0x20] sm:$0xff] %v2723_v12  ;;  %2282 = vst [vmem:[%s3592_s12 + $0x20] sm:$0xff] %v2755_v14 }
 0x162   : > { %v1344_v13 = vpop.f32.mrf.mxu1  ;;  %v1953_v15 = vpop.f32.mrf.mxu0 }
 0x163   : > { %v2724_v35 = vpack.c.bf16 %v1344_v13, %v1342_v18  ;;  %v2756_v37 = vpack.c.bf16 %v1953_v15, %v1951_v19 }
 0x164   : > { %v1348_v42 = vpop.f32.mrf.mxu1  ;;  %v1957_v43 = vpop.f32.mrf.mxu0 }
 0x165   : > { %1674 = vst [vmem:[%s3586_s9 + $0x28] sm:$0xff] %v2724_v35  ;;  %2283 = vst [vmem:[%s3592_s12 + $0x28] sm:$0xff] %v2756_v37 }
 0x166   : > { %v1350_v47 = vpop.f32.mrf.mxu1  ;;  %v1959_v49 = vpop.f32.mrf.mxu0 }
 0x167   : > { %v2725_v54 = vpack.c.bf16 %v1350_v47, %v1348_v42  ;;  %v2757_v55 = vpack.c.bf16 %v1959_v49, %v1957_v43 }
 0x168   : > { %v1352_v59 = vpop.f32.mrf.mxu1  ;;  %v1961_v61 = vpop.f32.mrf.mxu0 }
 0x169   : > { %1675 = vst [vmem:[%s3586_s9 + $0x30] sm:$0xff] %v2725_v54  ;;  %2284 = vst [vmem:[%s3592_s12 + $0x30] sm:$0xff] %v2757_v55 }
 0x16a   : > { %v1354_v2 = vpop.f32.mrf.mxu1  ;;  %v1963_v3 = vpop.f32.mrf.mxu0 }
 0x16b   : > { %v2726_v8 = vpack.c.bf16 %v1354_v2, %v1352_v59  ;;  %v2758_v9 = vpack.c.bf16 %v1963_v3, %v1961_v61 }
 0x16c   : > { %v1358_v16 = vpop.f32.mrf.mxu1  ;;  %v1967_v17 = vpop.f32.mrf.mxu0 }
 0x16d   : > { %1676 = vst [vmem:[%s3586_s9 + $0x38] sm:$0xff] %v2726_v8  ;;  %2285 = vst [vmem:[%s3592_s12 + $0x38] sm:$0xff] %v2758_v9 }
 0x16e   : > { %v1360_v20 = vpop.f32.mrf.mxu1  ;;  %v1969_v21 = vpop.f32.mrf.mxu0 }
 0x16f   : > { %v2727_v22 = vpack.c.bf16 %v1360_v20, %v1358_v16  ;;  %v2759_v23 = vpack.c.bf16 %v1969_v21, %v1967_v17 }
 0x170   : > { %v1362_v24 = vpop.f32.mrf.mxu1  ;;  %v1971_v25 = vpop.f32.mrf.mxu0 }
 0x171   : > { %1677 = vst [vmem:[%s3586_s9 + $0x40] sm:$0xff] %v2727_v22  ;;  %2286 = vst [vmem:[%s3592_s12 + $0x40] sm:$0xff] %v2759_v23 }
 0x172   : > { %v1364_v26 = vpop.f32.mrf.mxu1  ;;  %v1973_v27 = vpop.f32.mrf.mxu0 }
 0x173   : > { %v2728_v28 = vpack.c.bf16 %v1364_v26, %v1362_v24  ;;  %v2760_v29 = vpack.c.bf16 %v1973_v27, %v1971_v25 }
 0x174   : > { %v1368_v30 = vpop.f32.mrf.mxu1  ;;  %v1977_v31 = vpop.f32.mrf.mxu0 }
 0x175   : > { %1678 = vst [vmem:[%s3586_s9 + $0x48] sm:$0xff] %v2728_v28  ;;  %2287 = vst [vmem:[%s3592_s12 + $0x48] sm:$0xff] %v2760_v29 }
 0x176   : > { %v1370_v32 = vpop.f32.mrf.mxu1  ;;  %v1979_v33 = vpop.f32.mrf.mxu0 }
 0x177   : > { %v2729_v34 = vpack.c.bf16 %v1370_v32, %v1368_v30  ;;  %v2761_v36 = vpack.c.bf16 %v1979_v33, %v1977_v31 }
 0x178   : > { %v1372_v38 = vpop.f32.mrf.mxu1  ;;  %v1981_v39 = vpop.f32.mrf.mxu0 }
 0x179   : > { %1679 = vst [vmem:[%s3586_s9 + $0x50] sm:$0xff] %v2729_v34  ;;  %2288 = vst [vmem:[%s3592_s12 + $0x50] sm:$0xff] %v2761_v36 }
 0x17a   : > { %v1374_v40 = vpop.f32.mrf.mxu1  ;;  %v1983_v41 = vpop.f32.mrf.mxu0 }
 0x17b   : > { %v2730_v44 = vpack.c.bf16 %v1374_v40, %v1372_v38  ;;  %v2762_v45 = vpack.c.bf16 %v1983_v41, %v1981_v39 }
 0x17c   : > { %v1378_v46 = vpop.f32.mrf.mxu1  ;;  %v1987_v48 = vpop.f32.mrf.mxu0 }
 0x17d   : > { %1680 = vst [vmem:[%s3586_s9 + $0x58] sm:$0xff] %v2730_v44  ;;  %2289 = vst [vmem:[%s3592_s12 + $0x58] sm:$0xff] %v2762_v45 }
 0x17e   : > { %v1380_v50 = vpop.f32.mrf.mxu1  ;;  %v1989_v51 = vpop.f32.mrf.mxu0 }
 0x17f   : > { %v2731_v52 = vpack.c.bf16 %v1380_v50, %v1378_v46  ;;  %v2763_v53 = vpack.c.bf16 %v1989_v51, %v1987_v48 }
 0x180   : > { %v1382_v56 = vpop.f32.mrf.mxu1  ;;  %v1991_v57 = vpop.f32.mrf.mxu0 }
 0x181   : > { %1681 = vst [vmem:[%s3586_s9 + $0x60] sm:$0xff] %v2731_v52  ;;  %2290 = vst [vmem:[%s3592_s12 + $0x60] sm:$0xff] %v2763_v53 }
 0x182   : > { %v1384_v58 = vpop.f32.mrf.mxu1  ;;  %v1993_v60 = vpop.f32.mrf.mxu0 }
 0x183   : > { %v2732_v62 = vpack.c.bf16 %v1384_v58, %v1382_v56  ;;  %v2764_v63 = vpack.c.bf16 %v1993_v60, %v1991_v57 }
 0x184   : > { %v1388_v0 = vpop.f32.mrf.mxu1  ;;  %v1997_v1 = vpop.f32.mrf.mxu0 }
 0x185   : > { %1682 = vst [vmem:[%s3586_s9 + $0x68] sm:$0xff] %v2732_v62  ;;  %2291 = vst [vmem:[%s3592_s12 + $0x68] sm:$0xff] %v2764_v63 }
 0x186   : > { %v1390_v4 = vpop.f32.mrf.mxu1  ;;  %v1999_v5 = vpop.f32.mrf.mxu0 }
 0x187   : > { %v2733_v6 = vpack.c.bf16 %v1390_v4, %v1388_v0  ;;  %v2765_v7 = vpack.c.bf16 %v1999_v5, %v1997_v1 }
 0x188   : > { %v1392_v10 = vpop.f32.mrf.mxu1  ;;  %v2001_v11 = vpop.f32.mrf.mxu0 }
 0x189   : > { %1683 = vst [vmem:[%s3586_s9 + $0x70] sm:$0xff] %v2733_v6  ;;  %2292 = vst [vmem:[%s3592_s12 + $0x70] sm:$0xff] %v2765_v7 }
 0x18a   : > { %v1394_v12 = vpop.f32.mrf.mxu1  ;;  %v2003_v14 = vpop.f32.mrf.mxu0 }
 0x18b   : > { %v2734_v18 = vpack.c.bf16 %v1394_v12, %v1392_v10  ;;  %v2766_v19 = vpack.c.bf16 %v2003_v14, %v2001_v11 }
 0x18c   : > { %v1398_v13 = vpop.f32.mrf.mxu1  ;;  %v2007_v15 = vpop.f32.mrf.mxu0 }
 0x18d   : > { %1684 = vst [vmem:[%s3586_s9 + $0x78] sm:$0xff] %v2734_v18  ;;  %2293 = vst [vmem:[%s3592_s12 + $0x78] sm:$0xff] %v2766_v19 }
 0x18e   : > { %v1400_v35 = vpop.f32.mrf.mxu1  ;;  %v2009_v37 = vpop.f32.mrf.mxu0 }
 0x18f   : > { %v2735_v42 = vpack.c.bf16 %v1400_v35, %v1398_v13  ;;  %v2767_v43 = vpack.c.bf16 %v2009_v37, %v2007_v15 }
 0x190   : > { %v1402_v47 = vpop.f32.mrf.mxu1  ;;  %v2011_v49 = vpop.f32.mrf.mxu0 }
 0x191   : > { %1685 = vst [vmem:[%s3586_s9 + $0x80] sm:$0xff] %v2735_v42  ;;  %2294 = vst [vmem:[%s3592_s12 + $0x80] sm:$0xff] %v2767_v43 }
 0x192   : > { %v1404_v54 = vpop.f32.mrf.mxu1  ;;  %v2013_v55 = vpop.f32.mrf.mxu0 }
 0x193   : > { %v2736_v59 = vpack.c.bf16 %v1404_v54, %v1402_v47  ;;  %v2768_v61 = vpack.c.bf16 %v2013_v55, %v2011_v49 }
 0x194   : > { %v1408_v2 = vpop.f32.mrf.mxu1  ;;  %v2017_v3 = vpop.f32.mrf.mxu0 }
 0x195   : > { %1686 = vst [vmem:[%s3586_s9 + $0x88] sm:$0xff] %v2736_v59  ;;  %2295 = vst [vmem:[%s3592_s12 + $0x88] sm:$0xff] %v2768_v61 }
 0x196   : > { %v1410_v8 = vpop.f32.mrf.mxu1  ;;  %v2019_v9 = vpop.f32.mrf.mxu0 }
 0x197   : > { %v2737_v16 = vpack.c.bf16 %v1410_v8, %v1408_v2  ;;  %v2769_v17 = vpack.c.bf16 %v2019_v9, %v2017_v3 }
 0x198   : > { %v1412_v20 = vpop.f32.mrf.mxu1  ;;  %v2021_v21 = vpop.f32.mrf.mxu0 }
 0x199   : > { %1687 = vst [vmem:[%s3586_s9 + $0x90] sm:$0xff] %v2737_v16  ;;  %2296 = vst [vmem:[%s3592_s12 + $0x90] sm:$0xff] %v2769_v17 }
 0x19a   : > { %v1414_v22 = vpop.f32.mrf.mxu1  ;;  %v2023_v23 = vpop.f32.mrf.mxu0 }
 0x19b   : > { %v2738_v24 = vpack.c.bf16 %v1414_v22, %v1412_v20  ;;  %v2770_v25 = vpack.c.bf16 %v2023_v23, %v2021_v21 }
 0x19c   : > { %v1418_v26 = vpop.f32.mrf.mxu1  ;;  %v2027_v27 = vpop.f32.mrf.mxu0 }
 0x19d   : > { %1688 = vst [vmem:[%s3586_s9 + $0x98] sm:$0xff] %v2738_v24  ;;  %2297 = vst [vmem:[%s3592_s12 + $0x98] sm:$0xff] %v2770_v25 }
 0x19e   : > { %v1420_v28 = vpop.f32.mrf.mxu1  ;;  %v2029_v29 = vpop.f32.mrf.mxu0 }
 0x19f   : > { %v2739_v30 = vpack.c.bf16 %v1420_v28, %v1418_v26  ;;  %v2771_v31 = vpack.c.bf16 %v2029_v29, %v2027_v27 }
 0x1a0   : > { %v1422_v32 = vpop.f32.mrf.mxu1  ;;  %v2031_v33 = vpop.f32.mrf.mxu0 }
 0x1a1   : > { %1689 = vst [vmem:[%s3586_s9 + $0xa0] sm:$0xff] %v2739_v30  ;;  %2298 = vst [vmem:[%s3592_s12 + $0xa0] sm:$0xff] %v2771_v31 }
 0x1a2   : > { %v1424_v34 = vpop.f32.mrf.mxu1  ;;  %v2033_v36 = vpop.f32.mrf.mxu0 }
 0x1a3   : > { %v2740_v38 = vpack.c.bf16 %v1424_v34, %v1422_v32  ;;  %v2772_v39 = vpack.c.bf16 %v2033_v36, %v2031_v33 }
 0x1a4   : > { %v1428_v40 = vpop.f32.mrf.mxu1  ;;  %v2037_v41 = vpop.f32.mrf.mxu0 }
 0x1a5   : > { %1690 = vst [vmem:[%s3586_s9 + $0xa8] sm:$0xff] %v2740_v38  ;;  %2299 = vst [vmem:[%s3592_s12 + $0xa8] sm:$0xff] %v2772_v39 }
 0x1a6   : > { %v1430_v44 = vpop.f32.mrf.mxu1  ;;  %v2039_v45 = vpop.f32.mrf.mxu0 }
 0x1a7   : > { %v2741_v46 = vpack.c.bf16 %v1430_v44, %v1428_v40  ;;  %v2773_v48 = vpack.c.bf16 %v2039_v45, %v2037_v41 }
 0x1a8   : > { %v1432_v50 = vpop.f32.mrf.mxu1  ;;  %v2041_v51 = vpop.f32.mrf.mxu0 }
 0x1a9   : > { %1691 = vst [vmem:[%s3586_s9 + $0xb0] sm:$0xff] %v2741_v46  ;;  %2300 = vst [vmem:[%s3592_s12 + $0xb0] sm:$0xff] %v2773_v48 }
 0x1aa   : > { %v1434_v52 = vpop.f32.mrf.mxu1  ;;  %v2043_v53 = vpop.f32.mrf.mxu0 }
 0x1ab   : > { %v2742_v56 = vpack.c.bf16 %v1434_v52, %v1432_v50  ;;  %v2774_v57 = vpack.c.bf16 %v2043_v53, %v2041_v51 }
 0x1ac   : > { %v1438_v58 = vpop.f32.mrf.mxu1  ;;  %v2047_v60 = vpop.f32.mrf.mxu0 }
 0x1ad   : > { %1692 = vst [vmem:[%s3586_s9 + $0xb8] sm:$0xff] %v2742_v56  ;;  %2301 = vst [vmem:[%s3592_s12 + $0xb8] sm:$0xff] %v2774_v57 }
 0x1ae   : > { %v1440_v62 = vpop.f32.mrf.mxu1  ;;  %v2049_v63 = vpop.f32.mrf.mxu0 }
 0x1af   : > { %v2743_v0 = vpack.c.bf16 %v1440_v62, %v1438_v58  ;;  %v2775_v1 = vpack.c.bf16 %v2049_v63, %v2047_v60 }
 0x1b0   : > { %v1442_v4 = vpop.f32.mrf.mxu1  ;;  %v2051_v5 = vpop.f32.mrf.mxu0 }
 0x1b1   : > { %1693 = vst [vmem:[%s3586_s9 + $0xc0] sm:$0xff] %v2743_v0  ;;  %2302 = vst [vmem:[%s3592_s12 + $0xc0] sm:$0xff] %v2775_v1 }
 0x1b2   : > { %v1444_v6 = vpop.f32.mrf.mxu1  ;;  %v2053_v7 = vpop.f32.mrf.mxu0 }
 0x1b3   : > { %v2744_v10 = vpack.c.bf16 %v1444_v6, %v1442_v4  ;;  %v2776_v11 = vpack.c.bf16 %v2053_v7, %v2051_v5 }
 0x1b4   : > { %v1448_v12 = vpop.f32.mrf.mxu1  ;;  %v2057_v14 = vpop.f32.mrf.mxu0 }
 0x1b5   : > { %1694 = vst [vmem:[%s3586_s9 + $0xc8] sm:$0xff] %v2744_v10  ;;  %2303 = vst [vmem:[%s3592_s12 + $0xc8] sm:$0xff] %v2776_v11 }
 0x1b6   : > { %v1450_v18 = vpop.f32.mrf.mxu1  ;;  %v2059_v19 = vpop.f32.mrf.mxu0 }
 0x1b7   : > { %v2745_v13 = vpack.c.bf16 %v1450_v18, %v1448_v12  ;;  %v2777_v15 = vpack.c.bf16 %v2059_v19, %v2057_v14 }
 0x1b8   : > { %v1452_v35 = vpop.f32.mrf.mxu1  ;;  %v2061_v37 = vpop.f32.mrf.mxu0 }
 0x1b9   : > { %1695 = vst [vmem:[%s3586_s9 + $0xd0] sm:$0xff] %v2745_v13  ;;  %2304 = vst [vmem:[%s3592_s12 + $0xd0] sm:$0xff] %v2777_v15 }
 0x1ba   : > { %v1454_v42 = vpop.f32.mrf.mxu1  ;;  %v2063_v43 = vpop.f32.mrf.mxu0 }
 0x1bb   : > { %v2746_v47 = vpack.c.bf16 %v1454_v42, %v1452_v35  ;;  %v2778_v49 = vpack.c.bf16 %v2063_v43, %v2061_v37 }
 0x1bc   : > { %v1458_v54 = vpop.f32.mrf.mxu1  ;;  %v2067_v55 = vpop.f32.mrf.mxu0 }
 0x1bd   : > { %1696 = vst [vmem:[%s3586_s9 + $0xd8] sm:$0xff] %v2746_v47  ;;  %2305 = vst [vmem:[%s3592_s12 + $0xd8] sm:$0xff] %v2778_v49 }
 0x1be   : > { %v1460_v59 = vpop.f32.mrf.mxu1  ;;  %v2069_v61 = vpop.f32.mrf.mxu0 }
 0x1bf   : > { %v2747_v2 = vpack.c.bf16 %v1460_v59, %v1458_v54  ;;  %v2779_v3 = vpack.c.bf16 %v2069_v61, %v2067_v55 }
 0x1c0   : > { %v1462_v8 = vpop.f32.mrf.mxu1  ;;  %v2071_v9 = vpop.f32.mrf.mxu0 }
 0x1c1   : > { %1697 = vst [vmem:[%s3586_s9 + $0xe0] sm:$0xff] %v2747_v2  ;;  %2306 = vst [vmem:[%s3592_s12 + $0xe0] sm:$0xff] %v2779_v3 }
 0x1c2   : > { %v1464_v16 = vpop.f32.mrf.mxu1  ;;  %v2073_v17 = vpop.f32.mrf.mxu0 }
 0x1c3   : > { %v2748_v20 = vpack.c.bf16 %v1464_v16, %v1462_v8  ;;  %v2780_v21 = vpack.c.bf16 %v2073_v17, %v2071_v9 }
 0x1c4   : > { %v1468_v22 = vpop.f32.mrf.mxu1  ;;  %v2077_v23 = vpop.f32.mrf.mxu0 }
 0x1c5   : > { %1698 = vst [vmem:[%s3586_s9 + $0xe8] sm:$0xff] %v2748_v20  ;;  %2307 = vst [vmem:[%s3592_s12 + $0xe8] sm:$0xff] %v2780_v21 }
 0x1c6   : > { %v1470_v24 = vpop.f32.mrf.mxu1  ;;  %v2079_v25 = vpop.f32.mrf.mxu0 }
 0x1c7   : > { %v2749_v26 = vpack.c.bf16 %v1470_v24, %v1468_v22  ;;  %v2781_v27 = vpack.c.bf16 %v2079_v25, %v2077_v23 }
 0x1c8   : > { %v1472_v28 = vpop.f32.mrf.mxu1  ;;  %v2081_v29 = vpop.f32.mrf.mxu0 }
 0x1c9   : > { %1699 = vst [vmem:[%s3586_s9 + $0xf0] sm:$0xff] %v2749_v26  ;;  %2308 = vst [vmem:[%s3592_s12 + $0xf0] sm:$0xff] %v2781_v27 }
 0x1ca   : > { %v1474_v30 = vpop.f32.mrf.mxu1  ;;  %v2083_v31 = vpop.f32.mrf.mxu0 }
 0x1cb   : > { %v2750_v32 = vpack.c.bf16 %v1474_v30, %v1472_v28  ;;  %v2782_v33 = vpack.c.bf16 %v2083_v31, %v2081_v29 }
 0x1cd   : > { %1700 = vst [vmem:[%s3586_s9 + $0xf8] sm:$0xff] %v2750_v32  ;;  %2309 = vst [vmem:[%s3592_s12 + $0xf8] sm:$0xff] %v2782_v33 }
 0x1ce PF: > { %s17_s21 = sadd.s32 1, %s3021_s21  }
 0x1cf   : > { %p14_p4 = scmp.ge.s32.totalorder %s17_s21, 4  }
 0x1d1   :  { %16 = sbr.rel (!%p14_p4) target bundleno = 1 (0x1), region = 90 }

// kernel: multi_head_attention_forward.4
= control target key start
LH: loop header
LB: loop body
LE: loop exit
PB: predicated region body
PF: predicated region fallthrough
CT: control target
= control target key end

     0   :  { %s5050_s0 = inlined_call_operand.vmem [shape: s32[3], index: 0, kind: input, shape index: {}]   ;;  %s5051_s2 = inlined_call_operand.vmem [shape: bf16[2,256,256], index: 2, kind: input, shape index: {}]   ;;  %s5052_s3 = inlined_call_operand.vmem [shape: bf16[2,256,256], index: 3, kind: input, shape index: {}]   ;;  %s5053_s4 = inlined_call_operand.vmem [shape: bf16[2,256,256], index: 4, kind: input, shape index: {}]   ;;  %s5054_s5 = inlined_call_operand.vmem [shape: bf16[2,256,256], index: 5, kind: output, shape index: {}]   ;;  %s5055_s1 = inlined_call_operand.vmem [shape: s32[3], index: 1, kind: input, shape index: {}]  }
   0x1   :  { %5064 = sst [smem:[#allocation23_spill]] %s5051_s2  ;;  %s10_s20 = sshll.u32 %s5050_s0, 4  ;;  %s11_s20 = int_to_ptr.vmem [resolvable:$true] %s10_s20 }
   0x2   :  { %5065 = sst [smem:[#allocation24_spill]] %s5052_s3  ;;  %s14_s23 = sshll.u32 %s5055_s1, 4  ;;  %s15_s23 = int_to_ptr.vmem [resolvable:$true] %s14_s23 }
   0x3   :  { %5066 = sst [smem:[#allocation25_spill]] %s5053_s4  ;;  %s3701_s24 = scalar_lea.vmem %s11_s20, 16 }
   0x4   :  { %5067 = sst [smem:[#allocation26_spill]] %s5054_s5  ;;  %p3702_p0 = scmp.ne.s32.totalorder %s11_s20, %s3701_s24 }
   0x5   :  { %p3706_p1 = scmp.lt.s32.totalorder %s11_s20, %s11_s20  ;;  %p3707_p2 = scmp.lt.s32.totalorder %s3701_s24, %s3701_s24 }
   0x7   :  { %p3708_p3 = por %p3707_p2, %p3706_p1 }
   0x9   :  { %p3709_p4 = pnand %p3708_p3, %p3702_p0 }
   0xb   :  { %3712 = shalt.err (!%p3709_p4)  }
   0xc   :  { %s3847_s25 = smov [#allocation6]   ;;  %s3713_s26 = scalar_lea.vmem %s15_s23, 16 }
   0xd   :  { %13 = dma.vmem_to_smem %s11_s20, 16, %s3847_s25, [#allocation5] }
   0xe   :  { %p3714_p5 = scmp.ne.s32.totalorder %s15_s23, %s3713_s26  ;;  %p3718_p6 = scmp.lt.s32.totalorder %s15_s23, %s15_s23 }
   0xf   :  { %p3719_p7 = scmp.lt.s32.totalorder %s3713_s26, %s3713_s26 }
  0x11   :  { %p3720_p8 = por %p3719_p7, %p3718_p6 }
  0x13   :  { %p3721_p9 = pnand %p3720_p8, %p3714_p5 }
  0x15   :  { %3724 = shalt.err (!%p3721_p9)  }
  0x16   :  { %s3848_s0 = smov [#allocation7]  }
  0x17   :  { %17 = dma.vmem_to_smem %s15_s23, 16, %s3848_s0, [#allocation5] }
  0x18   :  { %3785 = dma.done.wait [#allocation5], 32 }
  0x19   :  { %3786 = vsyncadd [#allocation5], 4294967264 }
  0x1a   :  { %19 = sfence }
  0x1b   :  { %s3889_s1 = smov 0   ;;  %s3891_s27 = smov 0  }
  0x1c   :  { %s3893_s28 = smov 0   ;;  %s3895_s29 = smov 0  }
  0x1d   :  { %s3897_s30 = smov 0   ;;  %s3899_s6 = smov 0  }
  0x1e   :  { %s3901_s7 = smov 0   ;;  %s3903_s8 = smov 0  }
  0x1f   :  { %s3905_s9 = smov 0   ;;  %s3907_s10 = smov 0  }
  0x20   :  { %s3909_s11 = smov 0   ;;  %s3911_s12 = smov 0  }
  0x21   :  { %s3913_s13 = smov 0   ;;  %s3915_s14 = smov 0  }
  0x22   :  { %s3917_s15 = smov 0  }
  0x23 LB: > { %5068 = sst [smem:[#allocation13_spill]] %s3805_s30  ;;  %s37_s17 = sadd.s32 1, %s3833_s12  ;;  %s3845_s15 = sphi %s3917_s15, %s25_s15   ;;  %s3841_s14 = sphi %s3915_s14, %s5127_s14   ;;  %s3837_s13 = sphi %s3913_s13, %s5126_s13   ;;  %s3833_s12 = sphi %s3911_s12, %s5125_s12   ;;  %s3829_s11 = sphi %s3909_s11, %s5110_s11   ;;  %s3825_s10 = sphi %s3907_s10, %s5124_s10   ;;  %s3821_s9 = sphi %s3905_s9, %s5123_s9   ;;  %s3817_s8 = sphi %s3903_s8, %s5122_s8   ;;  %s3813_s7 = sphi %s3901_s7, %s5121_s7   ;;  %s3809_s6 = sphi %s3899_s6, %s5120_s6   ;;  %s3805_s30 = sphi %s3897_s30, %s5119_s30   ;;  %s3801_s29 = sphi %s3895_s29, %s5118_s29   ;;  %s3797_s28 = sphi %s3893_s28, %s5117_s28   ;;  %s3793_s27 = sphi %s3891_s27, %s5116_s27   ;;  %s3789_s1 = sphi %s3889_s1, %s5115_s1  }
  0x24   : > { %5069 = sst [smem:[#allocation14_spill]] %s3813_s7  ;;  %p38_p10 = scmp.ge.s32.totalorder %s37_s17, 3 }
  0x25   : > { %5070 = sst [smem:[#allocation15_spill]] %s3821_s9  ;;  %s40_s18 = sadd.s32 1, %s3837_s13 }
  0x26   : > { %5071 = sst [smem:[#allocation16_spill]] %s3825_s10  ;;  %s44_s19 = sadd.s32 1, %s3841_s14 }
  0x27   : > { %5072 = sst [smem:[#allocation17_spill]] %s3829_s11  ;;  %s5129_s17 = smov (%p38_p10, %s37_s17), 0 }
  0x28   : > { %5073 = sst [smem:[#allocation18_spill]] %s3841_s14  ;;  %s5131_s18 = smov (!%p38_p10, %s40_s18), %s3837_s13 }
  0x29   : > { %s48_s20 = sld [smem:[#allocation6 + %s3833_s12]]  ;;  %s57_s22 = sadd.s32 1, %s3817_s8 }
  0x2a   : > { %5074 = sst [smem:[#allocation19_spill]] %s5129_s17  ;;  %p42_p11 = scmp.ge.s32.totalorder %s5131_s18, 2 }
  0x2b   : > { %s49_s21 = sld [smem:[#allocation6 + %s5129_s17]]  ;;  %p64_p12 = scmp.ne.s32.totalorder %s3817_s8, %s3813_s7 }
  0x2c   : > { %p65_p13 = scmp.eq.s32.totalorder %s3845_s15, 0  ;;  %s80_s23 = sld [smem:[#allocation7 + %s3833_s12]] }
  0x2d   : > { %s5133_s18 = smov (%p42_p11, %s5131_s18), 0  ;;  %s5135_s19 = smov (!%p42_p11, %s44_s19), %s3841_s14 }
  0x2e   : > { %5075 = sst [smem:[#allocation20_spill]] %s5133_s18  ;;  %s3983_s24 = ssub.s32 %s3837_s13, %s5133_s18 }
  0x2f   : > { %p3987_p0 = por %p65_p13, %p64_p12  ;;  %p46_p1 = scmp.ge.s32.totalorder %s5135_s19, 2 }
  0x30   : > { %s81_s0 = sld [smem:[#allocation7 + %s5129_s17]]  ;;  %s89_s16 = sadd.s32 1, %s3809_s6 }
  0x31   : > { %s51_s26 = ssub.s32 %s48_s20, %s49_s21  ;;  %s5137_s19 = smov (%p46_p1, %s5135_s19), 0 }
  0x32   : > { %5077 = sst [smem:[#allocation21_spill]] %s5137_s19  ;;  %p96_p2 = scmp.ne.s32.totalorder %s3809_s6, %s3805_s30 }
  0x33   : > { %s112_s18 = sld [smem:[#allocation7 + %s3833_s12]]  ;;  %s50_s5 = ssub.s32 %s3841_s14, %s5137_s19 }
  0x34   : > { %s113_s10 = sld [smem:[#allocation7 + %s5129_s17]]  ;;  %s52_s11 = sor.u32 %s51_s26, %s50_s5 }
  0x35   : > { %p4003_p3 = por %p96_p2, %p65_p13  ;;  %s54_s20 = sor.u32 %s3983_s24, %s52_s11 }
  0x36   : > { %s121_s21 = sadd.s32 1, %s3801_s29  ;;  %p55_p4 = scmp.eq.s32.totalorder %s54_s20, 0 }
  0x37   : > { %s5078_s9 = scalar_select %p4003_p3, 1, 0 }
  0x38   : > { %s83_s30 = ssub.s32 %s80_s23, %s81_s0  ;;  %p128_p5 = scmp.ne.s32.totalorder %s3801_s29, %s3797_s28 }
  0x39   : > { %5079 = sst [smem:[#allocation22_spill]] %s5078_s9  ;;  %s84_s19 = sor.u32 %s83_s30, %s50_s5 }
  0x3a   : > { %s4012_s7 = scalar_select %p55_p4, %s3817_s8, %s57_s22  }
  0x3b   : > { %s86_s26 = sor.u32 %s84_s19, %s3983_s24  ;;  %s115_s4 = ssub.s32 %s112_s18, %s113_s10 }
  0x3c   : > { %p87_p6 = scmp.eq.s32.totalorder %s86_s26, 0  ;;  %s116_s3 = sor.u32 %s115_s4, %s50_s5 }
  0x3d   : > { %s118_s11 = sor.u32 %s116_s3, %s3983_s24  ;;  %p4018_p7 = por %p128_p5, %p65_p13 }
  0x3e   : > { %s4023_s20 = scalar_select %p87_p6, %s3809_s6, %s89_s16  }
  0x3f   : > { %p119_p8 = scmp.eq.s32.totalorder %s118_s11, 0  ;;  %s144_s30 = sld [smem:[#allocation6 + %s3833_s12]] }
  0x40   : > { %s145_s23 = sld [smem:[#allocation6 + %s5129_s17]]  ;;  %p163_p9 = scmp.ne.s32.totalorder %s3793_s27, %s3789_s1 }
  0x41   : > { %s4028_s22 = scalar_select %p119_p8, %s3801_s29, %s121_s21  }
  0x42   : > { %s5081_s19 = sadd.s32 4294967295, %s3845_s15   ;;  %s153_s0 = sadd.s32 1, %s3793_s27 }
  0x43   : > { %p164_p10 = scmp.eq.s32.totalorder %s5081_s19, 11  ;;  %p3009_p13 = scmp.ge.s32.totalorder %s3845_s15, 12 }
  0x45   : > { %p4034_p11 = por %p164_p10, %p163_p9 }
  0x46   : > { %s147_s3 = ssub.s32 %s144_s30, %s145_s23 }
  0x47   : > { %s148_s4 = sor.u32 %s147_s3, %s50_s5  ;;  %186 = sbr.rel (%p3009_p13) target bundleno = 142 (0x8e), region = 16 }
  0x48   : > { %s150_s18 = sor.u32 %s148_s4, %s3983_s24 }
  0x49   : > { %p151_p12 = scmp.eq.s32.totalorder %s150_s18, 0 }
  0x4b   : > { %s4041_s26 = scalar_select %p151_p12, %s3793_s27, %s153_s0  }
  0x4c   : > { %189 = sbr.rel (!%p3987_p0) target bundleno = 98 (0x62), region = 20  ;;  %s194_s16 = sld [smem:[#allocation6 + %s3833_s12]] (%p3987_p0) }
  0x4d   : > { %s191_s21 = sand.u32 (%p3987_p0), 1, %s3817_s8   ;;  %s3013_s11 = sshll.u32 (%p3987_p0), %s3841_s14, 6 }
  0x4e   : > { %s3010_s30 = sshll.u32 (%p3987_p0), %s191_s21, 6  ;;  %s5083_s2 = sld [smem:[#allocation23_spill]] (%p3987_p0) }
  0x4f   : > { %s193_s25 = scalar_lea.vmem (%p3987_p0), [#allocation8], %s3010_s30 }
  0x52   : > { %s3104_s5 = sshll.u32 %s194_s16, 5 }
  0x53   : > { %s197_s24 = sadd.s32 %s3837_s13, %s3104_s5 }
  0x54   : > { %s199_s23 = sadd.s32 %s3013_s11, %s197_s24 }
  0x55   : > { %s3014_s19 = sshll.u32 %s199_s23, 2 }
  0x56   : > { %s4053_s18 = scalar_lea.vmem %s5083_s2, %s3014_s19 }
  0x57   : > { %v218_v0 = vld [vmem:[%s4053_s18] sm:$0xf]  ;;  %v220_v1 = vld [vmem:[%s4053_s18 + $0x8] sm:$0xf]  ;;  %v222_v2 = vld [vmem:[%s4053_s18 + $0x10] sm:$0xf] }
  0x58   : > { %219 = vst [vmem:[%s193_s25] sm:$0xf] %v218_v0  ;;  %221 = vst [vmem:[%s193_s25 + $0x4] sm:$0xf] %v220_v1  ;;  %v224_v3 = vld [vmem:[%s4053_s18 + $0x18] sm:$0xf] }
  0x59   : > { %223 = vst [vmem:[%s193_s25 + $0x8] sm:$0xf] %v222_v2  ;;  %v226_v4 = vld [vmem:[%s4053_s18 + $0x20] sm:$0xf]  ;;  %v228_v5 = vld [vmem:[%s4053_s18 + $0x28] sm:$0xf] }
  0x5a   : > { %225 = vst [vmem:[%s193_s25 + $0xc] sm:$0xf] %v224_v3  ;;  %227 = vst [vmem:[%s193_s25 + $0x10] sm:$0xf] %v226_v4  ;;  %v230_v6 = vld [vmem:[%s4053_s18 + $0x30] sm:$0xf] }
  0x5b   : > { %229 = vst [vmem:[%s193_s25 + $0x14] sm:$0xf] %v228_v5  ;;  %v232_v7 = vld [vmem:[%s4053_s18 + $0x38] sm:$0xf]  ;;  %v234_v8 = vld [vmem:[%s4053_s18 + $0x40] sm:$0xf] }
  0x5c   : > { %231 = vst [vmem:[%s193_s25 + $0x18] sm:$0xf] %v230_v6  ;;  %233 = vst [vmem:[%s193_s25 + $0x1c] sm:$0xf] %v232_v7  ;;  %v236_v9 = vld [vmem:[%s4053_s18 + $0x48] sm:$0xf] }
  0x5d   : > { %235 = vst [vmem:[%s193_s25 + $0x20] sm:$0xf] %v234_v8  ;;  %v238_v10 = vld [vmem:[%s4053_s18 + $0x50] sm:$0xf]  ;;  %v240_v11 = vld [vmem:[%s4053_s18 + $0x58] sm:$0xf] }
  0x5e   : > { %237 = vst [vmem:[%s193_s25 + $0x24] sm:$0xf] %v236_v9  ;;  %239 = vst [vmem:[%s193_s25 + $0x28] sm:$0xf] %v238_v10  ;;  %v242_v12 = vld [vmem:[%s4053_s18 + $0x60] sm:$0xf] }
  0x5f   : > { %241 = vst [vmem:[%s193_s25 + $0x2c] sm:$0xf] %v240_v11  ;;  %v244_v13 = vld [vmem:[%s4053_s18 + $0x68] sm:$0xf]  ;;  %v246_v14 = vld [vmem:[%s4053_s18 + $0x70] sm:$0xf] }
  0x60   : > { %243 = vst [vmem:[%s193_s25 + $0x30] sm:$0xf] %v242_v12  ;;  %245 = vst [vmem:[%s193_s25 + $0x34] sm:$0xf] %v244_v13  ;;  %v248_v15 = vld [vmem:[%s4053_s18 + $0x78] sm:$0xf] }
  0x61   : > { %247 = vst [vmem:[%s193_s25 + $0x38] sm:$0xf] %v246_v14  ;;  %249 = vst [vmem:[%s193_s25 + $0x3c] sm:$0xf] %v248_v15 }
  0x62 PF: > { %305 = sbr.rel (!%p4003_p3) target bundleno = 120 (0x78), region = 61  ;;  %s310_s16 = sld [smem:[#allocation7 + %s3833_s12]] (%p4003_p3) }
  0x63   : > { %s307_s21 = sand.u32 (%p4003_p3), 1, %s3809_s6   ;;  %s3018_s11 = sshll.u32 (%p4003_p3), %s3841_s14, 6 }
  0x64   : > { %s3015_s30 = sshll.u32 (%p4003_p3), %s307_s21, 6  ;;  %s5085_s18 = sld [smem:[#allocation24_spill]] (%p4003_p3) }
  0x65   : > { %s309_s0 = scalar_lea.vmem (%p4003_p3), [#allocation9], %s3015_s30 }
  0x68   : > { %s3105_s5 = sshll.u32 %s310_s16, 5 }
  0x69   : > { %s313_s24 = sadd.s32 %s3837_s13, %s3105_s5 }
  0x6a   : > { %s315_s23 = sadd.s32 %s3018_s11, %s313_s24 }
  0x6b   : > { %s3019_s19 = sshll.u32 %s315_s23, 2 }
  0x6c   : > { %s4080_s25 = scalar_lea.vmem %s5085_s18, %s3019_s19 }
  0x6d   : > { %v334_v16 = vld [vmem:[%s4080_s25] sm:$0xf]  ;;  %v336_v17 = vld [vmem:[%s4080_s25 + $0x8] sm:$0xf]  ;;  %v338_v18 = vld [vmem:[%s4080_s25 + $0x10] sm:$0xf] }
  0x6e   : > { %335 = vst [vmem:[%s309_s0] sm:$0xf] %v334_v16  ;;  %337 = vst [vmem:[%s309_s0 + $0x4] sm:$0xf] %v336_v17  ;;  %v340_v19 = vld [vmem:[%s4080_s25 + $0x18] sm:$0xf] }
  0x6f   : > { %339 = vst [vmem:[%s309_s0 + $0x8] sm:$0xf] %v338_v18  ;;  %v342_v20 = vld [vmem:[%s4080_s25 + $0x20] sm:$0xf]  ;;  %v344_v21 = vld [vmem:[%s4080_s25 + $0x28] sm:$0xf] }
  0x70   : > { %341 = vst [vmem:[%s309_s0 + $0xc] sm:$0xf] %v340_v19  ;;  %343 = vst [vmem:[%s309_s0 + $0x10] sm:$0xf] %v342_v20  ;;  %v346_v22 = vld [vmem:[%s4080_s25 + $0x30] sm:$0xf] }
  0x71   : > { %345 = vst [vmem:[%s309_s0 + $0x14] sm:$0xf] %v344_v21  ;;  %v348_v23 = vld [vmem:[%s4080_s25 + $0x38] sm:$0xf]  ;;  %v350_v24 = vld [vmem:[%s4080_s25 + $0x40] sm:$0xf] }
  0x72   : > { %347 = vst [vmem:[%s309_s0 + $0x18] sm:$0xf] %v346_v22  ;;  %349 = vst [vmem:[%s309_s0 + $0x1c] sm:$0xf] %v348_v23  ;;  %v352_v25 = vld [vmem:[%s4080_s25 + $0x48] sm:$0xf] }
  0x73   : > { %351 = vst [vmem:[%s309_s0 + $0x20] sm:$0xf] %v350_v24  ;;  %v354_v26 = vld [vmem:[%s4080_s25 + $0x50] sm:$0xf]  ;;  %v356_v27 = vld [vmem:[%s4080_s25 + $0x58] sm:$0xf] }
  0x74   : > { %353 = vst [vmem:[%s309_s0 + $0x24] sm:$0xf] %v352_v25  ;;  %355 = vst [vmem:[%s309_s0 + $0x28] sm:$0xf] %v354_v26  ;;  %v358_v28 = vld [vmem:[%s4080_s25 + $0x60] sm:$0xf] }
  0x75   : > { %357 = vst [vmem:[%s309_s0 + $0x2c] sm:$0xf] %v356_v27  ;;  %v360_v29 = vld [vmem:[%s4080_s25 + $0x68] sm:$0xf]  ;;  %v362_v30 = vld [vmem:[%s4080_s25 + $0x70] sm:$0xf] }
  0x76   : > { %359 = vst [vmem:[%s309_s0 + $0x30] sm:$0xf] %v358_v28  ;;  %361 = vst [vmem:[%s309_s0 + $0x34] sm:$0xf] %v360_v29  ;;  %v364_v31 = vld [vmem:[%s4080_s25 + $0x78] sm:$0xf] }
  0x77   : > { %363 = vst [vmem:[%s309_s0 + $0x38] sm:$0xf] %v362_v30  ;;  %365 = vst [vmem:[%s309_s0 + $0x3c] sm:$0xf] %v364_v31 }
  0x78 PF: > { %421 = sbr.rel (!%p4018_p7) target bundleno = 142 (0x8e), region = 102  ;;  %s426_s16 = sld [smem:[#allocation7 + %s3833_s12]] (%p4018_p7) }
  0x79   : > { %s423_s21 = sand.u32 (%p4018_p7), 1, %s3801_s29   ;;  %s3023_s11 = sshll.u32 (%p4018_p7), %s3841_s14, 6 }
  0x7a   : > { %s3020_s30 = sshll.u32 (%p4018_p7), %s423_s21, 6  ;;  %s5086_s18 = sld [smem:[#allocation25_spill]] (%p4018_p7) }
  0x7b   : > { %s425_s9 = scalar_lea.vmem (%p4018_p7), [#allocation10], %s3020_s30 }
  0x7e   : > { %s3106_s5 = sshll.u32 %s426_s16, 5 }
  0x7f   : > { %s429_s24 = sadd.s32 %s3837_s13, %s3106_s5 }
  0x80   : > { %s431_s23 = sadd.s32 %s3023_s11, %s429_s24 }
  0x81   : > { %s3024_s19 = sshll.u32 %s431_s23, 2 }
  0x82   : > { %s4107_s25 = scalar_lea.vmem %s5086_s18, %s3024_s19 }
  0x83   : > { %v450_v32 = vld [vmem:[%s4107_s25] sm:$0xf]  ;;  %v452_v33 = vld [vmem:[%s4107_s25 + $0x8] sm:$0xf]  ;;  %v454_v34 = vld [vmem:[%s4107_s25 + $0x10] sm:$0xf] }
  0x84   : > { %451 = vst [vmem:[%s425_s9] sm:$0xf] %v450_v32  ;;  %453 = vst [vmem:[%s425_s9 + $0x4] sm:$0xf] %v452_v33  ;;  %v456_v35 = vld [vmem:[%s4107_s25 + $0x18] sm:$0xf] }
  0x85   : > { %455 = vst [vmem:[%s425_s9 + $0x8] sm:$0xf] %v454_v34  ;;  %v458_v36 = vld [vmem:[%s4107_s25 + $0x20] sm:$0xf]  ;;  %v460_v37 = vld [vmem:[%s4107_s25 + $0x28] sm:$0xf] }
  0x86   : > { %457 = vst [vmem:[%s425_s9 + $0xc] sm:$0xf] %v456_v35  ;;  %459 = vst [vmem:[%s425_s9 + $0x10] sm:$0xf] %v458_v36  ;;  %v462_v38 = vld [vmem:[%s4107_s25 + $0x30] sm:$0xf] }
  0x87   : > { %461 = vst [vmem:[%s425_s9 + $0x14] sm:$0xf] %v460_v37  ;;  %v464_v39 = vld [vmem:[%s4107_s25 + $0x38] sm:$0xf]  ;;  %v466_v40 = vld [vmem:[%s4107_s25 + $0x40] sm:$0xf] }
  0x88   : > { %463 = vst [vmem:[%s425_s9 + $0x18] sm:$0xf] %v462_v38  ;;  %465 = vst [vmem:[%s425_s9 + $0x1c] sm:$0xf] %v464_v39  ;;  %v468_v41 = vld [vmem:[%s4107_s25 + $0x48] sm:$0xf] }
  0x89   : > { %467 = vst [vmem:[%s425_s9 + $0x20] sm:$0xf] %v466_v40  ;;  %v470_v42 = vld [vmem:[%s4107_s25 + $0x50] sm:$0xf]  ;;  %v472_v43 = vld [vmem:[%s4107_s25 + $0x58] sm:$0xf] }
  0x8a   : > { %469 = vst [vmem:[%s425_s9 + $0x24] sm:$0xf] %v468_v41  ;;  %471 = vst [vmem:[%s425_s9 + $0x28] sm:$0xf] %v470_v42  ;;  %v474_v44 = vld [vmem:[%s4107_s25 + $0x60] sm:$0xf] }
  0x8b   : > { %473 = vst [vmem:[%s425_s9 + $0x2c] sm:$0xf] %v472_v43  ;;  %v476_v45 = vld [vmem:[%s4107_s25 + $0x68] sm:$0xf]  ;;  %v478_v46 = vld [vmem:[%s4107_s25 + $0x70] sm:$0xf] }
  0x8c   : > { %475 = vst [vmem:[%s425_s9 + $0x30] sm:$0xf] %v474_v44  ;;  %477 = vst [vmem:[%s425_s9 + $0x34] sm:$0xf] %v476_v45  ;;  %v480_v47 = vld [vmem:[%s4107_s25 + $0x78] sm:$0xf] }
  0x8d   : > { %479 = vst [vmem:[%s425_s9 + $0x38] sm:$0xf] %v478_v46  ;;  %481 = vst [vmem:[%s425_s9 + $0x3c] sm:$0xf] %v480_v47 }
  0x8e PF: > { %p3025_p0 = scmp.ge.s32.totalorder %s3845_s15, 1  ;;  %p536_p1 = scmp.lt.s32.totalorder %s3845_s15, 13 }
  0x90   : > { %p537_p2 = pnand %p3025_p0, %p536_p1 }
  0x91   : > { %s5087_s0 = sld [smem:[#allocation14_spill]] (!%p537_p2)  ;;  %s557_s23 = sand.u32 (!%p537_p2), 1, %s3797_s28  }
  0x92   : > { %540 = sbr.rel (%p537_p2) target bundleno = 1902 (0x76e), region = 143  ;;  %s5088_s16 = sld [smem:[#allocation13_spill]] (!%p537_p2) }
  0x93   : > { %s5089_s21 = sld [smem:[#allocation15_spill]] (!%p537_p2)  ;;  %s584_s19 = sand.u32 (!%p537_p2), 1, %s3789_s1  }
  0x94   : > { %s3028_s3 = sshll.u32 (!%p537_p2), %s557_s23, 6  ;;  %s3029_s4 = sshll.u32 (!%p537_p2), %s584_s19, 6 }
  0x95   : > { %s4141_s17 = scalar_lea.vmem (!%p537_p2), [#allocation10], %s3028_s3  ;;  %s4143_s14 = scalar_lea.vmem (!%p537_p2), [#allocation11], %s3029_s4 }
  0x97   : > { %s543_s11 = sand.u32 1, %s5087_s0  }
  0x98   : > { %s550_s30 = sand.u32 1, %s5088_s16   ;;  %s3026_s5 = sshll.u32 %s543_s11, 6 }
  0x99   : > { %s3027_s24 = sshll.u32 %s550_s30, 6  ;;  %s4132_s18 = sld [smem:[#allocation6 + %s5089_s21]] }
  0x9a   : > { %s4135_s25 = sld [smem:[#allocation7 + %s5089_s21]]  ;;  %s4137_s9 = scalar_lea.vmem [#allocation8], %s3026_s5 }
  0x9b   : > { %s4139_s2 = scalar_lea.vmem [#allocation9], %s3027_s24 }
  0xa0   : > { %p3030_p3 = scmp.ne.s32.totalorder %s4135_s25, 0 }
  0xa2   : > { %601 = sbr.rel (%p3030_p3) target bundleno = 192 (0xc0), region = 159 }
  0xa7   : > { %vm602_vm0 = vcmask 7168   ;;  %v3849_v48 = vmov -inf   ;;  %v3850_v49 = vmov 0.0  }
  0xa8   : > { %603 = vst.msk [vmem:[#allocation2] sm:$0xff] %vm602_vm0, %v3849_v48  ;;  %604 = vst.msk [vmem:[#allocation2 + $0x8] sm:$0xff] %vm602_vm0, %v3849_v48 }
  0xa9   : > { %605 = vst.msk [vmem:[#allocation2 + $0x10] sm:$0xff] %vm602_vm0, %v3849_v48  ;;  %606 = vst.msk [vmem:[#allocation2 + $0x18] sm:$0xff] %vm602_vm0, %v3849_v48 }
  0xaa   : > { %607 = vst.msk [vmem:[#allocation2 + $0x20] sm:$0xff] %vm602_vm0, %v3849_v48  ;;  %608 = vst.msk [vmem:[#allocation2 + $0x28] sm:$0xff] %vm602_vm0, %v3849_v48 }
  0xab   : > { %609 = vst.msk [vmem:[#allocation2 + $0x30] sm:$0xff] %vm602_vm0, %v3849_v48  ;;  %610 = vst.msk [vmem:[#allocation2 + $0x38] sm:$0xff] %vm602_vm0, %v3849_v48 }
  0xac   : > { %611 = vst.msk [vmem:[#allocation2 + $0x40] sm:$0xff] %vm602_vm0, %v3849_v48  ;;  %612 = vst.msk [vmem:[#allocation2 + $0x48] sm:$0xff] %vm602_vm0, %v3849_v48 }
  0xad   : > { %613 = vst.msk [vmem:[#allocation2 + $0x50] sm:$0xff] %vm602_vm0, %v3849_v48  ;;  %614 = vst.msk [vmem:[#allocation2 + $0x58] sm:$0xff] %vm602_vm0, %v3849_v48 }
  0xae   : > { %615 = vst.msk [vmem:[#allocation2 + $0x60] sm:$0xff] %vm602_vm0, %v3849_v48  ;;  %616 = vst.msk [vmem:[#allocation2 + $0x68] sm:$0xff] %vm602_vm0, %v3849_v48 }
  0xaf   : > { %617 = vst.msk [vmem:[#allocation2 + $0x70] sm:$0xff] %vm602_vm0, %v3849_v48  ;;  %618 = vst.msk [vmem:[#allocation2 + $0x78] sm:$0xff] %vm602_vm0, %v3849_v48 }
  0xb0   : > { %619 = vst.msk [vmem:[#allocation3] sm:$0xff] %vm602_vm0, %v3850_v49  ;;  %620 = vst.msk [vmem:[#allocation3 + $0x8] sm:$0xff] %vm602_vm0, %v3850_v49 }
  0xb1   : > { %621 = vst.msk [vmem:[#allocation3 + $0x10] sm:$0xff] %vm602_vm0, %v3850_v49  ;;  %622 = vst.msk [vmem:[#allocation3 + $0x18] sm:$0xff] %vm602_vm0, %v3850_v49 }
  0xb2   : > { %623 = vst.msk [vmem:[#allocation3 + $0x20] sm:$0xff] %vm602_vm0, %v3850_v49  ;;  %624 = vst.msk [vmem:[#allocation3 + $0x28] sm:$0xff] %vm602_vm0, %v3850_v49 }
  0xb3   : > { %625 = vst.msk [vmem:[#allocation3 + $0x30] sm:$0xff] %vm602_vm0, %v3850_v49  ;;  %626 = vst.msk [vmem:[#allocation3 + $0x38] sm:$0xff] %vm602_vm0, %v3850_v49 }
  0xb4   : > { %627 = vst.msk [vmem:[#allocation3 + $0x40] sm:$0xff] %vm602_vm0, %v3850_v49  ;;  %628 = vst.msk [vmem:[#allocation3 + $0x48] sm:$0xff] %vm602_vm0, %v3850_v49 }
  0xb5   : > { %629 = vst.msk [vmem:[#allocation3 + $0x50] sm:$0xff] %vm602_vm0, %v3850_v49  ;;  %630 = vst.msk [vmem:[#allocation3 + $0x58] sm:$0xff] %vm602_vm0, %v3850_v49 }
  0xb6   : > { %631 = vst.msk [vmem:[#allocation3 + $0x60] sm:$0xff] %vm602_vm0, %v3850_v49  ;;  %632 = vst.msk [vmem:[#allocation3 + $0x68] sm:$0xff] %vm602_vm0, %v3850_v49 }
  0xb7   : > { %633 = vst.msk [vmem:[#allocation3 + $0x70] sm:$0xff] %vm602_vm0, %v3850_v49  ;;  %634 = vst.msk [vmem:[#allocation3 + $0x78] sm:$0xff] %vm602_vm0, %v3850_v49 }
  0xb8   : > { %635 = vst [vmem:[#allocation4 + $0x30] sm:$0xff] %v3850_v49  ;;  %636 = vst [vmem:[#allocation4] sm:$0xff] %v3850_v49 }
  0xb9   : > { %637 = vst [vmem:[#allocation4 + $0x58] sm:$0xff] %v3850_v49  ;;  %638 = vst [vmem:[#allocation4 + $0x18] sm:$0xff] %v3850_v49 }
  0xba   : > { %639 = vst [vmem:[#allocation4 + $0x50] sm:$0xff] %v3850_v49  ;;  %640 = vst [vmem:[#allocation4 + $0x68] sm:$0xff] %v3850_v49 }
  0xbb   : > { %641 = vst [vmem:[#allocation4 + $0x8] sm:$0xff] %v3850_v49  ;;  %642 = vst [vmem:[#allocation4 + $0x48] sm:$0xff] %v3850_v49 }
  0xbc   : > { %643 = vst [vmem:[#allocation4 + $0x40] sm:$0xff] %v3850_v49  ;;  %644 = vst [vmem:[#allocation4 + $0x20] sm:$0xff] %v3850_v49 }
  0xbd   : > { %645 = vst [vmem:[#allocation4 + $0x10] sm:$0xff] %v3850_v49  ;;  %646 = vst [vmem:[#allocation4 + $0x38] sm:$0xff] %v3850_v49 }
  0xbe   : > { %647 = vst [vmem:[#allocation4 + $0x60] sm:$0xff] %v3850_v49  ;;  %648 = vst [vmem:[#allocation4 + $0x70] sm:$0xff] %v3850_v49 }
  0xbf   : > { %649 = vst [vmem:[#allocation4 + $0x78] sm:$0xff] %v3850_v49  ;;  %650 = vst [vmem:[#allocation4 + $0x28] sm:$0xff] %v3850_v49 }
  0xc0 PF: > { %p3031_p4 = scmp.ge.s32.totalorder %s4135_s25, %s4132_s18 }
  0xc2   : > { %654 = sbr.rel (%p3031_p4) target bundleno = 985 (0x3d9), region = 163 }
  0xc7   : > { %v3491_v50 = vld [vmem:[%s4139_s2 + $0x38] sm:$0xff]   ;;  %v3492_v51 = vld [vmem:[%s4139_s2 + $0x30] sm:$0xff]   ;;  %v3493_v52 = vld [vmem:[%s4139_s2 + $0x28] sm:$0xff]   ;;  %v3851_v9 = vmov 0   ;;  %vm1216_vm1 = vcmask 7168  }
  0xc8   : > { %3235 = vmatprep.subr.bf16.mxu0 %v3491_v50  ;;  %v3499_v53 = vld [vmem:[%s4137_s9] sm:$0xff]   ;;  %v3495_v55 = vld [vmem:[%s4139_s2 + $0x18] sm:$0xff]   ;;  %v3496_v56 = vld [vmem:[%s4139_s2 + $0x10] sm:$0xff]   ;;  %3490 = vset.pattern.permute.xlu1 %v3851_v9 }
  0xc9   : > { %3236 = vmatpush3.bf16.xpose.msra.mxu0 %v3491_v50  ;;  %3251 = vmatprep.mubr.bf16.mxu0 %v3499_v53  ;;  %v3494_v54 = vld [vmem:[%s4139_s2 + $0x20] sm:$0xff]   ;;  %v3497_v57 = vld [vmem:[%s4139_s2 + $0x8] sm:$0xff]   ;;  %v3501_v60 = vld [vmem:[%s4137_s9 + $0x10] sm:$0xff]  }
  0xca   : > { %3237 = vmatprep.subr.bf16.mxu0 %v3492_v51  ;;  %v3498_v58 = vld [vmem:[%s4139_s2] sm:$0xff]   ;;  %v3500_v59 = vld [vmem:[%s4137_s9 + $0x8] sm:$0xff]   ;;  %v3502_v61 = vld [vmem:[%s4137_s9 + $0x18] sm:$0xff]   ;;  %3489 = vset.pattern.permute.xlu0 %v3851_v9 }
  0xcb   : > { %v3503_v62 = vld [vmem:[%s4137_s9 + $0x20] sm:$0xff]   ;;  %v3504_v63 = vld [vmem:[%s4137_s9 + $0x28] sm:$0xff]   ;;  %v3505_v0 = vld [vmem:[%s4137_s9 + $0x30] sm:$0xff]  }
  0xcc   : > { %v3506_v1 = vld [vmem:[%s4137_s9 + $0x38] sm:$0xff]   ;;  %v4245_v20 = vld [vmem:[#allocation2 + $0x10] sm:$0xff]  ;;  %v4248_v23 = vld [vmem:[#allocation2] sm:$0xff] }
  0xcd   : > { %v3507_v19 = vld [vmem:[%s4141_s17 + $0x38] sm:$0xff]   ;;  %v3508_v21 = vld [vmem:[%s4141_s17 + $0x30] sm:$0xff]   ;;  %v3509_v27 = vld [vmem:[%s4141_s17 + $0x28] sm:$0xff]  }
  0xce   : > { %3267 = vmatprep.subr.bf16.mxu1 %v3507_v19  ;;  %v4253_v26 = vld [vmem:[#allocation2 + $0x18] sm:$0xff]  ;;  %v4262_v30 = vld [vmem:[#allocation2 + $0x8] sm:$0xff]  ;;  %v3510_v33 = vld [vmem:[%s4141_s17 + $0x20] sm:$0xff]  }
  0xcf   : > { %3268 = vmatpush3.bf16.msra.mxu1 %v3507_v19  ;;  %v4277_v35 = vld [vmem:[#allocation2 + $0x20] sm:$0xff]  ;;  %v4281_v37 = vld [vmem:[#allocation2 + $0x38] sm:$0xff]  ;;  %v4288_v41 = vld [vmem:[#allocation2 + $0x30] sm:$0xff] }
  0xd0   : > { %3269 = vmatprep.subr.bf16.mxu1 %v3508_v21  ;;  %v3511_v38 = vld [vmem:[%s4141_s17 + $0x18] sm:$0xff]   ;;  %v4295_v44 = vld [vmem:[#allocation2 + $0x28] sm:$0xff]  ;;  %v3512_v45 = vld [vmem:[%s4141_s17 + $0x10] sm:$0xff]  }
  0xd1   : > { %3238 = vmatpush3.bf16.xpose.msra.mxu0 %v3492_v51  ;;  %v4303_v48 = vld [vmem:[#allocation2 + $0x40] sm:$0xff]  ;;  %v4311_v51 = vld [vmem:[#allocation2 + $0x58] sm:$0xff] }
  0xd2   : > { %3239 = vmatprep.subr.bf16.mxu0 %v3493_v52 }
  0xd3   : > { %3270 = vmatpush3.bf16.msra.mxu1 %v3508_v21  ;;  %v4342_v21 = vld [vmem:[#allocation2 + $0x78] sm:$0xff] }
  0xd4   : > { %3271 = vmatprep.subr.bf16.mxu1 %v3509_v27 }
  0xd7   : > { %3272 = vmatpush3.bf16.msra.mxu1 %v3509_v27  ;;  %v4350_v27 = vld [vmem:[#allocation2 + $0x70] sm:$0xff] }
  0xd8   : > { %3273 = vmatprep.subr.bf16.mxu1 %v3510_v33 }
  0xd9   : > { %3240 = vmatpush3.bf16.xpose.msra.mxu0 %v3493_v52  ;;  %v3513_v52 = vld [vmem:[%s4141_s17 + $0x8] sm:$0xff]  }
  0xda   : > { %3241 = vmatprep.subr.bf16.mxu0 %v3494_v54 }
  0xdb   : > { %3274 = vmatpush3.bf16.msra.mxu1 %v3510_v33 }
  0xdc   : > { %3275 = vmatprep.subr.bf16.mxu1 %v3511_v38 }
  0xdf   : > { %3276 = vmatpush3.bf16.msra.mxu1 %v3511_v38 }
  0xe0   : > { %3277 = vmatprep.subr.bf16.mxu1 %v3512_v45 }
  0xe1   : > { %3242 = vmatpush3.bf16.xpose.msra.mxu0 %v3494_v54 }
  0xe2   : > { %3243 = vmatprep.subr.bf16.mxu0 %v3495_v55 }
  0xe3   : > { %3278 = vmatpush3.bf16.msra.mxu1 %v3512_v45 }
  0xe4   : > { %3279 = vmatprep.subr.bf16.mxu1 %v3513_v52 }
  0xe7   : > { %3280 = vmatpush3.bf16.msra.mxu1 %v3513_v52 }
  0xe9   : > { %3244 = vmatpush3.bf16.xpose.msra.mxu0 %v3495_v55  ;;  %v4319_v55 = vld [vmem:[#allocation2 + $0x50] sm:$0xff] }
  0xea   : > { %3245 = vmatprep.subr.bf16.mxu0 %v3496_v56 }
  0xf1   : > { %3246 = vmatpush3.bf16.xpose.msra.mxu0 %v3496_v56 }
  0xf2   : > { %3247 = vmatprep.subr.bf16.mxu0 %v3497_v57 }
  0xf9   : > { %3248 = vmatpush3.bf16.xpose.msra.mxu0 %v3497_v57 }
  0xfa   : > { %3249 = vmatprep.subr.bf16.mxu0 %v3498_v58 }
 0x101   : > { %3250 = vmatpush3.bf16.xpose.msra.mxu0 %v3498_v58 }
 0x108   : > { %3252 = vmatmul.mubr.bf16.vlgmr.msra.gmra.mxu0 %v3500_v59  ;;  %v4327_v59 = vld [vmem:[#allocation2 + $0x48] sm:$0xff] }
 0x109   : > { %3255 = vmatprep.mubr.bf16.mxu0 %v3501_v60  ;;  %v3514_v60 = vld [vmem:[%s4141_s17] sm:$0xff]  }
 0x10a   : > { %3281 = vmatprep.subr.bf16.mxu1 %v3514_v60 }
 0x10b   : > { %3282 = vmatpush3.bf16.msra.mxu1 %v3514_v60 }
 0x110   : > { %3256 = vmatmul.mubr.bf16.gmra.mxu0 %v3502_v61 }
 0x111   : > { %3259 = vmatprep.mubr.bf16.mxu0 %v3503_v62 }
 0x118   : > { %3260 = vmatmul.mubr.bf16.gmra.mxu0 %v3504_v63 }
 0x119   : > { %3263 = vmatprep.mubr.bf16.mxu0 %v3505_v0  ;;  %v4336_v0 = vld [vmem:[#allocation2 + $0x60] sm:$0xff] }
 0x120   : > { %3264 = vmatmul.mubr.bf16.gmra.mxu0 %v3506_v1 }
 0x1c8   : > { %v4196_v2 = vpop.f32.mrf.mxu0 }
 0x1c9   : > { %916 = vmax.xlane.f32.xlu1 %v4196_v2 }
 0x1ca   : > { %v4199_v3 = vpop.f32.mrf.mxu0 }
 0x1cb   : > { %912 = vmax.xlane.f32.xlu0 %v4199_v3 }
 0x1cc   : > { %v4202_v4 = vpop.f32.mrf.mxu0 }
 0x1cd   : > { %918 = vmax.xlane.f32.xlu1 %v4202_v4 }
 0x1ce   : > { %v4205_v5 = vpop.f32.mrf.mxu0 }
 0x1cf   : > { %914 = vmax.xlane.f32.xlu0 %v4205_v5 }
 0x1d0   : > { %v4208_v6 = vpop.f32.mrf.mxu0 }
 0x1d2   : > { %v4210_v7 = vpop.f32.mrf.mxu0 }
 0x1d3   : > { %920 = vmax.xlane.f32.xlu0 %v4210_v7 }
 0x1d4   : > { %v4213_v8 = vpop.f32.mrf.mxu0 }
 0x1d5   : > { %926 = vmax.xlane.f32.xlu1 %v4213_v8 }
 0x1d6   : > { %v4216_v10 = vpop.f32.mrf.mxu0 }
 0x1d7   : > { %924 = vmax.xlane.f32.xlu0 %v4208_v6 }
 0x1d8   : > { %v4219_v11 = vpop.f32.mrf.mxu0 }
 0x1d9   : > { %922 = vmax.xlane.f32.xlu1 %v4216_v10 }
 0x1da   : > { %v4222_v12 = vpop.f32.mrf.mxu0 }
 0x1db   : > { %928 = vmax.xlane.f32.xlu0 %v4222_v12 }
 0x1dc   : > { %v4225_v13 = vpop.f32.mrf.mxu0 }
 0x1dd   : > { %934 = vmax.xlane.f32.xlu1 %v4225_v13 }
 0x1de   : > { %v4228_v14 = vpop.f32.mrf.mxu0 }
 0x1df   : > { %932 = vmax.xlane.f32.xlu0 %v4219_v11 }
 0x1e0   : > { %v4231_v15 = vpop.f32.mrf.mxu0 }
 0x1e1   : > { %930 = vmax.xlane.f32.xlu1 %v4228_v14 }
 0x1e2   : > { %v4234_v16 = vpop.f32.mrf.mxu0 }
 0x1e3   : > { %936 = vmax.xlane.f32.xlu0 %v4234_v16 }
 0x1e4   : > { %v4237_v17 = vpop.f32.mrf.mxu0 }
 0x1e5   : > { %942 = vmax.xlane.f32.xlu1 %v4237_v17 }
 0x1e6   : > { %v4241_v18 = vpop.f32.mrf.mxu0 }
 0x1e7   : > { %940 = vmax.xlane.f32.xlu0 %v4231_v15 }
 0x1e9   : > { %938 = vmax.xlane.f32.xlu1 %v4241_v18 }
 0x252   : > { %v917_v22 = vpop.xlane.xlu1 %916 }
 0x253   : > { %v4251_v24 = vmax.f32 %v4245_v20, %v917_v22 }
 0x254   : > { %v913_v25 = vpop.xlane.xlu0 %912 }
 0x255   : > { %1532 = vst.msk [vmem:[#allocation2 + $0x10] sm:$0xff] %vm1216_vm1, %v4251_v24  ;;  %v4259_v28 = vmax.f32 %v4248_v23, %v913_v25  ;;  %1020 = vperm.xlu1 %3490, %v4251_v24  }
 0x256   : > { %v919_v29 = vpop.xlane.xlu1 %918 }
 0x257   : > { %1530 = vst.msk [vmem:[#allocation2] sm:$0xff] %vm1216_vm1, %v4259_v28  ;;  %v4267_v31 = vmax.f32 %v4253_v26, %v919_v29  ;;  %1010 = vperm.xlu0 %3489, %v4259_v28   ;;  %v960_v56 = vsub.f32 %v4248_v23, %v4259_v28 }
 0x258   : > { %v915_v32 = vpop.xlane.xlu0 %914 }
 0x259   : > { %1533 = vst.msk [vmem:[#allocation2 + $0x18] sm:$0xff] %vm1216_vm1, %v4267_v31  ;;  %v4274_v34 = vmax.f32 %v4262_v30, %v915_v32  ;;  %1025 = vperm.xlu1 %3490, %v4267_v31   ;;  %v963_v62 = vsub.f32 %v4253_v26, %v4267_v31  ;;  %v976_v1 = vmul.f32 1.442695, %v960_v56  ;;  %v909_v31 = vld [vmem:[#allocation2 + $0x68] sm:$0xff]  ;;  %v962_v32 = vsub.f32 %v4245_v20, %v4251_v24 }
 0x25b   : > { %1531 = vst.msk [vmem:[#allocation2 + $0x8] sm:$0xff] %vm1216_vm1, %v4274_v34  ;;  %v961_v22 = vsub.f32 %v4262_v30, %v4274_v34  ;;  %v982_v25 = vmul.f32 1.442695, %v963_v62  ;;  %3515 = vpow2.f32 %v976_v1 }
 0x25c   : > { %v921_v36 = vpop.xlane.xlu0 %920 }
 0x25d   : > { %v4285_v39 = vmax.f32 %v4277_v35, %v921_v36  ;;  %1015 = vperm.xlu1 %3490, %v4274_v34   ;;  %v978_v33 = vmul.f32 1.442695, %v961_v22  ;;  %3517 = vpow2.f32 %v982_v25 }
 0x25e   : > { %v927_v40 = vpop.xlane.xlu1 %926 }
 0x25f   : > { %1534 = vst.msk [vmem:[#allocation2 + $0x20] sm:$0xff] %vm1216_vm1, %v4285_v39  ;;  %v4293_v42 = vmax.f32 %v4281_v37, %v927_v40  ;;  %3519 = vpow2.f32 %v978_v33 }
 0x260   : > { %v925_v43 = vpop.xlane.xlu0 %924 }
 0x261   : > { %1537 = vst.msk [vmem:[#allocation2 + $0x38] sm:$0xff] %vm1216_vm1, %v4293_v42  ;;  %v4301_v46 = vmax.f32 %v4288_v41, %v925_v43  ;;  %v967_v28 = vsub.f32 %v4281_v37, %v4293_v42  ;;  %v964_v43 = vsub.f32 %v4277_v35, %v4285_v39 }
 0x262   : > { %v923_v47 = vpop.xlane.xlu1 %922 }
 0x263   : > { %1536 = vst.msk [vmem:[#allocation2 + $0x30] sm:$0xff] %vm1216_vm1, %v4301_v46  ;;  %v4308_v49 = vmax.f32 %v4295_v44, %v923_v47  ;;  %1040 = vperm.xlu1 %3490, %v4301_v46   ;;  %v990_v38 = vmul.f32 1.442695, %v967_v28  ;;  %v984_v47 = vmul.f32 1.442695, %v964_v43 }
 0x264   : > { %v929_v50 = vpop.xlane.xlu0 %928 }
 0x265   : > { %1535 = vst.msk [vmem:[#allocation2 + $0x28] sm:$0xff] %vm1216_vm1, %v4308_v49  ;;  %v4317_v53 = vmax.f32 %v4303_v48, %v929_v50  ;;  %v965_v40 = vsub.f32 %v4295_v44, %v4308_v49  ;;  %3521 = vpow2.f32 %v990_v38 }
 0x266   : > { %v935_v54 = vpop.xlane.xlu1 %934 }
 0x267   : > { %1538 = vst.msk [vmem:[#allocation2 + $0x40] sm:$0xff] %vm1216_vm1, %v4317_v53  ;;  %v955_v57 = vmax.f32 %v4311_v51, %v935_v54  ;;  %1030 = vperm.xlu1 %3490, %v4285_v39   ;;  %v986_v45 = vmul.f32 1.442695, %v965_v40  ;;  %v968_v56 = vsub.f32 %v4303_v48, %v4317_v53 }
 0x268   : > { %v933_v58 = vpop.xlane.xlu0 %932  ;;  %v4386_v39 = vpop.eup %3515 }
 0x269   : > { %1541 = vst.msk [vmem:[#allocation2 + $0x58] sm:$0xff] %vm1216_vm1, %v955_v57  ;;  %v4332_v61 = vmax.f32 %v4319_v55, %v933_v58  ;;  %v971_v44 = vsub.f32 %v4311_v51, %v955_v57  ;;  %v992_v60 = vmul.f32 1.442695, %v968_v56 }
 0x26a   : > { %v931_v63 = vpop.xlane.xlu1 %930  ;;  %v4391_v54 = vpop.eup %3517 }
 0x26b   : > { %1540 = vst.msk [vmem:[#allocation2 + $0x50] sm:$0xff] %vm1216_vm1, %v4332_v61  ;;  %v953_v9 = vmax.f32 %v4327_v59, %v931_v63  ;;  %1035 = vperm.xlu1 %3490, %v4308_v49   ;;  %v966_v49 = vsub.f32 %v4288_v41, %v4301_v46  ;;  %v998_v50 = vmul.f32 1.442695, %v971_v44  ;;  %v970_v51 = vsub.f32 %v4319_v55, %v4332_v61 }
 0x26c   : > { %v937_v19 = vpop.xlane.xlu0 %936  ;;  %v4397_v58 = vpop.eup %3519 }
 0x26d   : > { %1539 = vst.msk [vmem:[#allocation2 + $0x48] sm:$0xff] %vm1216_vm1, %v953_v9  ;;  %v4348_v23 = vmax.f32 %v4336_v0, %v937_v19  ;;  %1055 = vperm.xlu0 %3489, %v953_v9   ;;  %v969_v35 = vsub.f32 %v4327_v59, %v953_v9  ;;  %v988_v52 = vmul.f32 1.442695, %v966_v49 }
 0x26e   : > { %v943_v26 = vpop.xlane.xlu1 %942 }
 0x26f   : > { %1542 = vst.msk [vmem:[#allocation2 + $0x60] sm:$0xff] %vm1216_vm1, %v4348_v23  ;;  %v4357_v29 = vmax.f32 %v4342_v21, %v943_v26  ;;  %1045 = vperm.xlu1 %3490, %v4293_v42   ;;  %v980_v42 = vmul.f32 1.442695, %v962_v32  ;;  %v994_v41 = vmul.f32 1.442695, %v969_v35 }
 0x270   : > { %v941_v30 = vpop.xlane.xlu0 %940 }
 0x271   : > { %v975_v34 = vsub.f32 %v4342_v21, %v4357_v29  ;;  %1545 = vst.msk [vmem:[#allocation2 + $0x78] sm:$0xff] %vm1216_vm1, %v4357_v29  ;;  %v4367_v36 = vmax.f32 %v4350_v27, %v941_v30  ;;  %1065 = vperm.xlu0 %3489, %v955_v57   ;;  %3523 = vpow2.f32 %v980_v42  ;;  %v996_v57 = vmul.f32 1.442695, %v970_v51 }
 0x272   : > { %v939_v37 = vpop.xlane.xlu1 %938  ;;  %3525 = vpow2.f32 %v986_v45  ;;  %v4400_v59 = vpop.eup %3521 }
 0x273   : > { %v974_v20 = vsub.f32 %v4350_v27, %v4367_v36  ;;  %1544 = vst.msk [vmem:[#allocation2 + $0x70] sm:$0xff] %vm1216_vm1, %v4367_v36  ;;  %v957_v24 = vmax.f32 %v909_v31, %v939_v37  ;;  %1050 = vperm.xlu1 %3490, %v4317_v53   ;;  %3527 = vpow2.f32 %v984_v47 }
 0x274   : > { %3529 = vpow2.f32 %v998_v50 }
 0x275   : > { %1543 = vst.msk [vmem:[#allocation2 + $0x68] sm:$0xff] %vm1216_vm1, %v957_v24  ;;  %1075 = vperm.xlu0 %3489, %v957_v24   ;;  %v973_v46 = vsub.f32 %v909_v31, %v957_v24  ;;  %3531 = vpow2.f32 %v988_v52 }
 0x276   : > { %3533 = vpow2.f32 %v994_v41 }
 0x277   : > { %1060 = vperm.xlu1 %3490, %v4332_v61   ;;  %v1002_v55 = vmul.f32 1.442695, %v973_v46  ;;  %3535 = vpow2.f32 %v996_v57  ;;  %v972_v61 = vsub.f32 %v4336_v0, %v4348_v23 }
 0x279   : > { %1085 = vperm.xlu0 %3489, %v4357_v29   ;;  %3537 = vpow2.f32 %v1002_v55  ;;  %v1000_v53 = vmul.f32 1.442695, %v972_v61 }
 0x27a   : > { %3539 = vpow2.f32 %v992_v60 }
 0x27b   : > { %1070 = vperm.xlu1 %3490, %v4348_v23   ;;  %3541 = vpow2.f32 %v1000_v53 }
 0x27d   : > { %1251 = vperm.xlu0 %3489, %v4386_v39  }
 0x27e   : > { %v4405_v62 = vpop.eup %3523 }
 0x27f   : > { %1080 = vperm.xlu1 %3490, %v4367_v36   ;;  %v4408_v48 = vpop.eup %3525 }
 0x280   : > { %v4411_v63 = vpop.eup %3527 }
 0x281   : > { %1266 = vperm.xlu0 %3489, %v4391_v54   ;;  %v4414_v1 = vpop.eup %3529 }
 0x282   : > { %v4417_v0 = vpop.eup %3531 }
 0x283   : > { %1256 = vperm.xlu1 %3490, %v4397_v58   ;;  %v4420_v9 = vpop.eup %3533 }
 0x284   : > { %v4423_v19 = vpop.eup %3535 }
 0x285   : > { %1286 = vperm.xlu0 %3489, %v4400_v59  }
 0x286   : > { %v4426_v22 = vpop.eup %3537 }
 0x287   : > { %1261 = vperm.xlu1 %3490, %v4405_v62   ;;  %v4429_v23 = vpop.eup %3539 }
 0x288   : > { %v4432_v25 = vpop.eup %3541 }
 0x289   : > { %1276 = vperm.xlu0 %3489, %v4408_v48  }
 0x28b   : > { %1271 = vperm.xlu1 %3490, %v4411_v63  }
 0x28d   : > { %1306 = vperm.xlu0 %3489, %v4414_v1  }
 0x28f   : > { %1281 = vperm.xlu1 %3490, %v4417_v0  }
 0x291   : > { %1296 = vperm.xlu0 %3489, %v4420_v9  }
 0x293   : > { %1301 = vperm.xlu1 %3490, %v4423_v19  }
 0x295   : > { %1316 = vperm.xlu0 %3489, %v4426_v22  }
 0x297   : > { %1291 = vperm.xlu1 %3490, %v4429_v23  }
 0x29b   : > { %1311 = vperm.xlu1 %3490, %v4432_v25  }
 0x2d0   : > { %v1021_v26 = vpop.permute.xlu1 %1020 }
 0x2d1   : > { %v1090_v28 = vsub.f32 %v4196_v2, %v1021_v26 }
 0x2d2   : > { %v1011_v30 = vpop.permute.xlu0 %1010 }
 0x2d3   : > { %v1108_v31 = vmul.f32 1.442695, %v1090_v28  ;;  %v1088_v32 = vsub.f32 %v4199_v3, %v1011_v30 }
 0x2d4   : > { %v1026_v33 = vpop.permute.xlu1 %1025 }
 0x2d5   : > { %3543 = vpow2.f32 %v1108_v31  ;;  %v1104_v37 = vmul.f32 1.442695, %v1088_v32  ;;  %v1091_v38 = vsub.f32 %v4202_v4, %v1026_v33 }
 0x2d7   : > { %3545 = vpow2.f32 %v1104_v37  ;;  %v1110_v40 = vmul.f32 1.442695, %v1091_v38 }
 0x2d8   : > { %v1016_v24 = vpop.permute.xlu1 %1015 }
 0x2d9   : > { %v1089_v42 = vsub.f32 %v4205_v5, %v1016_v24  ;;  %3547 = vpow2.f32 %v1110_v40 }
 0x2db   : > { %v1106_v43 = vmul.f32 1.442695, %v1089_v42 }
 0x2dd   : > { %3549 = vpow2.f32 %v1106_v43 }
 0x2de   : > { %v1041_v45 = vpop.permute.xlu1 %1040 }
 0x2df   : > { %v1094_v2 = vsub.f32 %v4208_v6, %v1041_v45 }
 0x2e1   : > { %v1116_v44 = vmul.f32 1.442695, %v1094_v2 }
 0x2e2   : > { %v3544_v47 = vpop.eup %3543  ;;  %v1031_v49 = vpop.permute.xlu1 %1030 }
 0x2e3   : > { %3551 = vpow2.f32 %v1116_v44  ;;  %v1092_v3 = vsub.f32 %v4210_v7, %v1031_v49  ;;  %1172 = vadd.xlane.f32.xlu0 %v3544_v47 }
 0x2e4   : > { %v3546_v50 = vpop.eup %3545 }
 0x2e5   : > { %v1112_v4 = vmul.f32 1.442695, %v1092_v3  ;;  %1168 = vadd.xlane.f32.xlu1 %v3546_v50 }
 0x2e6   : > { %v1036_v35 = vpop.permute.xlu1 %1035  ;;  %v3548_v52 = vpop.eup %3547 }
 0x2e7   : > { %3553 = vpow2.f32 %v1112_v4  ;;  %v1093_v5 = vsub.f32 %v4216_v10, %v1036_v35  ;;  %v1346_v60 = vpack.c.bf16 %v3548_v52, %v3544_v47 }
 0x2e8   : > { %v1056_v51 = vpop.permute.xlu0 %1055 }
 0x2e9   : > { %v1114_v41 = vmul.f32 1.442695, %v1093_v5  ;;  %1174 = vadd.xlane.f32.xlu1 %v3548_v52  ;;  %v1097_v6 = vsub.f32 %v4228_v14, %v1056_v51 }
 0x2ea   : > { %v3550_v46 = vpop.eup %3549  ;;  %v1046_v56 = vpop.permute.xlu1 %1045 }
 0x2eb   : > { %3555 = vpow2.f32 %v1114_v41  ;;  %v1095_v57 = vsub.f32 %v4213_v8, %v1046_v56  ;;  %1170 = vadd.xlane.f32.xlu0 %v3550_v46  ;;  %v1345_v7 = vpack.c.bf16 %v3550_v46, %v3546_v50  ;;  %v1122_v53 = vmul.f32 1.442695, %v1097_v6 }
 0x2ec   : > { %v1066_v55 = vpop.permute.xlu0 %1065 }
 0x2ed   : > { %v1118_v61 = vmul.f32 1.442695, %v1095_v57  ;;  %3283 = vmatprep.mubr.bf16.mxu1 %v1345_v7  ;;  %v1099_v10 = vsub.f32 %v4225_v13, %v1066_v55  ;;  %v1004_v57 = vmul.f32 1.442695, %v974_v20  ;;  %v1006_v7 = vmul.f32 1.442695, %v975_v34 }
 0x2ee   : > { %3284 = vmatmul.mubr.bf16.vlgmr.msra.gmra.mxu1 %v1346_v60  ;;  %v1051_v26 = vpop.permute.xlu1 %1050 }
 0x2ef   : > { %3557 = vpow2.f32 %v1118_v61  ;;  %v1096_v28 = vsub.f32 %v4222_v12, %v1051_v26  ;;  %v1126_v8 = vmul.f32 1.442695, %v1099_v10 }
 0x2f0   : > { %v3552_v30 = vpop.eup %3551  ;;  %v1076_v14 = vpop.permute.xlu0 %1075  ;;  %3559 = vpow2.f32 %v1122_v53 }
 0x2f1   : > { %v1120_v31 = vmul.f32 1.442695, %v1096_v28  ;;  %1180 = vadd.xlane.f32.xlu0 %v3552_v30  ;;  %v1101_v32 = vsub.f32 %v4241_v18, %v1076_v14 }
 0x2f2   : > { %v1061_v33 = vpop.permute.xlu1 %1060 }
 0x2f3   : > { %3561 = vpow2.f32 %v1120_v31  ;;  %v1098_v37 = vsub.f32 %v4219_v11, %v1061_v33  ;;  %v1130_v24 = vmul.f32 1.442695, %v1101_v32  ;;  %v1138_v31 = vld [vmem:[#allocation3 + $0x10] sm:$0xff]  ;;  %v1136_v32 = vld [vmem:[#allocation3] sm:$0xff] }
 0x2f4   : > { %v3554_v38 = vpop.eup %3553  ;;  %v1086_v40 = vpop.permute.xlu0 %1085  ;;  %3563 = vpow2.f32 %v1126_v8  ;;  %v1154_v33 = vmul.f32 %v4405_v62, %v1138_v31 }
 0x2f5   : > { %v1124_v13 = vmul.f32 1.442695, %v1098_v37  ;;  %1176 = vadd.xlane.f32.xlu0 %v3554_v38  ;;  %v1103_v12 = vsub.f32 %v4237_v17, %v1086_v40  ;;  %v1152_v40 = vmul.f32 %v4386_v39, %v1136_v32 }
 0x2f6   : > { %v1071_v42 = vpop.permute.xlu1 %1070 }
 0x2f7   : > { %3565 = vpow2.f32 %v1124_v13  ;;  %v1100_v43 = vsub.f32 %v4234_v16, %v1071_v42  ;;  %v1134_v18 = vmul.f32 1.442695, %v1103_v12  ;;  %v1137_v42 = vld [vmem:[#allocation3 + $0x8] sm:$0xff] }
 0x2f8   : > { %v3556_v45 = vpop.eup %3555  ;;  %3567 = vpow2.f32 %v1130_v24  ;;  %v4463_v61 = vpop.permute.xlu0 %1251  ;;  %v1139_v24 = vld [vmem:[#allocation3 + $0x18] sm:$0xff] }
 0x2f9   : > { %v1128_v2 = vmul.f32 1.442695, %v1100_v43  ;;  %v1347_v44 = vpack.c.bf16 %v3556_v45, %v3554_v38  ;;  %v1155_v43 = vmul.f32 %v4391_v54, %v1139_v24 }
 0x2fa   : > { %v1081_v47 = vpop.permute.xlu1 %1080 }
 0x2fb   : > { %3569 = vpow2.f32 %v1128_v2  ;;  %v1102_v11 = vsub.f32 %v4231_v15, %v1081_v47  ;;  %3287 = vmatprep.mubr.bf16.mxu1 %v1347_v44  ;;  %v1153_v44 = vmul.f32 %v4397_v58, %v1137_v42  ;;  %v1142_v47 = vld [vmem:[#allocation3 + $0x30] sm:$0xff]  ;;  %v1143_v58 = vld [vmem:[#allocation3 + $0x38] sm:$0xff] }
 0x2fc   : > { %v3558_v49 = vpop.eup %3557  ;;  %3571 = vpow2.f32 %v1134_v18  ;;  %v4467_v36 = vpop.permute.xlu0 %1266  ;;  %v1158_v39 = vmul.f32 %v4417_v0, %v1142_v47 }
 0x2fd   : > { %v1132_v3 = vmul.f32 1.442695, %v1102_v11  ;;  %1182 = vadd.xlane.f32.xlu1 %v3558_v49  ;;  %v1348_v50 = vpack.c.bf16 %v3558_v49, %v3552_v30  ;;  %v3560_v17 = vpop.eup %3559  ;;  %v1140_v49 = vld [vmem:[#allocation3 + $0x20] sm:$0xff] }
 0x2fe   : > { %v4465_v27 = vpop.permute.xlu1 %1256  ;;  %v1156_v54 = vmul.f32 %v4411_v63, %v1140_v49  ;;  %v1236_v49 = vld [vmem:[#allocation4 + $0x18] sm:$0xff] }
 0x2ff   : > { %3573 = vpow2.f32 %v1132_v3  ;;  %3288 = vmatmul.mubr.bf16.gmra.mxu1 %v1348_v50 }
 0x300   : > { %v3562_v4 = vpop.eup %3561  ;;  %3575 = vpow2.f32 %v1004_v57  ;;  %v4471_v53 = vpop.permute.xlu0 %1286  ;;  %v1145_v57 = vld [vmem:[#allocation3 + $0x48] sm:$0xff] }
 0x301   : > { %1178 = vadd.xlane.f32.xlu1 %v3556_v45  ;;  %v1349_v16 = vpack.c.bf16 %v3560_v17, %v3562_v4  ;;  %v3564_v35 = vpop.eup %3563  ;;  %3577 = vpow2.f32 %v1006_v7  ;;  %v1161_v32 = vmul.f32 %v4420_v9, %v1145_v57 }
 0x302   : > { %v4469_v20 = vpop.permute.xlu1 %1261 }
 0x303   : > { %3291 = vmatprep.mubr.bf16.mxu1 %v1349_v16 }
 0x304   : > { %v3566_v5 = vpop.eup %3565  ;;  %v4475_v29 = vpop.permute.xlu0 %1276 }
 0x305   : > { %1190 = vadd.xlane.f32.xlu1 %v3564_v35  ;;  %1188 = vadd.xlane.f32.xlu0 %v3566_v5  ;;  %v1350_v52 = vpack.c.bf16 %v3564_v35, %v3566_v5  ;;  %v3568_v51 = vpop.eup %3567  ;;  %v1141_v35 = vld [vmem:[#allocation3 + $0x28] sm:$0xff] }
 0x306   : > { %v4473_v21 = vpop.permute.xlu1 %1271  ;;  %v1157_v0 = vmul.f32 %v4408_v48, %v1141_v35 }
 0x307   : > { %3292 = vmatmul.mubr.bf16.gmra.mxu1 %v1350_v52 }
 0x308   : > { %v3570_v15 = vpop.eup %3569  ;;  %v4479_v10 = vpop.permute.xlu0 %1306 }
 0x309   : > { %1186 = vadd.xlane.f32.xlu1 %v3560_v17  ;;  %1184 = vadd.xlane.f32.xlu0 %v3562_v4  ;;  %v1351_v41 = vpack.c.bf16 %v3568_v51, %v3570_v15  ;;  %v3572_v46 = vpop.eup %3571  ;;  %v1159_v4 = vmul.f32 %v4400_v59, %v1143_v58  ;;  %v1144_v59 = vld [vmem:[#allocation3 + $0x40] sm:$0xff] }
 0x30a   : > { %v4477_v34 = vpop.permute.xlu1 %1281  ;;  %v1160_v48 = vmul.f32 %v4429_v23, %v1144_v59  ;;  %v1149_v23 = vld [vmem:[#allocation3 + $0x68] sm:$0xff] }
 0x30b   : > { %3295 = vmatprep.mubr.bf16.mxu1 %v1351_v41 }
 0x30c   : > { %v3574_v6 = vpop.eup %3573  ;;  %v4483_v28 = vpop.permute.xlu0 %1296 }
 0x30d   : > { %1198 = vadd.xlane.f32.xlu1 %v3572_v46  ;;  %1196 = vadd.xlane.f32.xlu0 %v3574_v6  ;;  %v1352_v56 = vpack.c.bf16 %v3572_v46, %v3574_v6  ;;  %v4457_v55 = vpop.eup %3575 }
 0x30e   : > { %v4460_v60 = vpop.eup %3577  ;;  %v4481_v26 = vpop.permute.xlu1 %1301 }
 0x30f   : > { %3296 = vmatmul.mubr.bf16.gmra.mxu1 %v1352_v56 }
 0x310   : > { %v4487_v14 = vpop.permute.xlu0 %1316 }
 0x311   : > { %1194 = vadd.xlane.f32.xlu1 %v3568_v51  ;;  %1192 = vadd.xlane.f32.xlu0 %v3570_v15  ;;  %v1146_v51 = vld [vmem:[#allocation3 + $0x50] sm:$0xff]  ;;  %v1147_v15 = vld [vmem:[#allocation3 + $0x58] sm:$0xff] }
 0x312   : > { %v4485_v30 = vpop.permute.xlu1 %1291  ;;  %v1162_v63 = vmul.f32 %v4423_v19, %v1146_v51  ;;  %v1163_v46 = vmul.f32 %v4414_v1, %v1147_v15  ;;  %v1151_v19 = vld [vmem:[#allocation3 + $0x78] sm:$0xff]  ;;  %v1240_v51 = vld [vmem:[#allocation4 + $0x48] sm:$0xff] }
 0x313   : > { %v1167_v24 = vmul.f32 %v4460_v60, %v1151_v19 }
 0x316   : > { %v4489_v8 = vpop.permute.xlu1 %1311 }
 0x322   : > { %1321 = vperm.xlu1 %3490, %v4457_v55  }
 0x327   : > { %1326 = vperm.xlu0 %3489, %v4460_v60   ;;  %v1235_v60 = vld [vmem:[#allocation4 + $0x58] sm:$0xff] }
 0x36c   : > { %v1173_v37 = vpop.xlane.xlu0 %1172 }
 0x36d   : > { %v1202_v38 = vadd.f32 %v1173_v37, %v1154_v33 }
 0x36e   : > { %v1169_v13 = vpop.xlane.xlu1 %1168 }
 0x36f   : > { %1219 = vst.msk [vmem:[#allocation3 + $0x10] sm:$0xff] %vm1216_vm1, %v1202_v38  ;;  %v1200_v12 = vadd.f32 %v1169_v13, %v1152_v40  ;;  %v1150_v38 = vld [vmem:[#allocation3 + $0x70] sm:$0xff] }
 0x370   : > { %v1166_v13 = vmul.f32 %v4457_v55, %v1150_v38  ;;  %v1242_v38 = vld [vmem:[#allocation4 + $0x20] sm:$0xff] }
 0x371   : > { %1217 = vst.msk [vmem:[#allocation3] sm:$0xff] %vm1216_vm1, %v1200_v12 }
 0x372   : > { %v1175_v45 = vpop.xlane.xlu1 %1174 }
 0x373   : > { %v1203_v2 = vadd.f32 %v1175_v45, %v1155_v43  ;;  %v1148_v43 = vld [vmem:[#allocation3 + $0x60] sm:$0xff] }
 0x374   : > { %v1171_v18 = vpop.xlane.xlu0 %1170 }
 0x375   : > { %1220 = vst.msk [vmem:[#allocation3 + $0x18] sm:$0xff] %vm1216_vm1, %v1203_v2  ;;  %v1201_v62 = vadd.f32 %v1171_v18, %v1153_v44  ;;  %v1164_v2 = vmul.f32 %v4432_v25, %v1148_v43  ;;  %v1165_v44 = vmul.f32 %v4426_v22, %v1149_v23  ;;  %v1234_v25 = vld [vmem:[#allocation4] sm:$0xff]  ;;  %v1332_v22 = vmul.f32 %v4467_v36, %v1236_v49 }
 0x377   : > { %1218 = vst.msk [vmem:[#allocation3 + $0x8] sm:$0xff] %vm1216_vm1, %v1201_v62 }
 0x37a   : > { %v1181_v11 = vpop.xlane.xlu0 %1180 }
 0x37b   : > { %v1206_v3 = vadd.f32 %v1181_v11, %v1158_v39  ;;  %v1233_v39 = vld [vmem:[#allocation4 + $0x30] sm:$0xff]  ;;  %v1331_v11 = vmul.f32 %v4469_v20, %v1235_v60  ;;  %v1239_v20 = vld [vmem:[#allocation4 + $0x8] sm:$0xff] }
 0x37d   : > { %1223 = vst.msk [vmem:[#allocation3 + $0x30] sm:$0xff] %vm1216_vm1, %v1206_v3 }
 0x37e   : > { %v1177_v50 = vpop.xlane.xlu0 %1176 }
 0x37f   : > { %v1204_v17 = vadd.f32 %v1177_v50, %v1156_v54  ;;  %v1329_v54 = vmul.f32 %v4463_v61, %v1233_v39  ;;  %v1335_v61 = vmul.f32 %v4477_v34, %v1239_v20 }
 0x381   : > { %1221 = vst.msk [vmem:[#allocation3 + $0x20] sm:$0xff] %vm1216_vm1, %v1204_v17 }
 0x386   : > { %v1183_v16 = vpop.xlane.xlu1 %1182 }
 0x387   : > { %v1207_v5 = vadd.f32 %v1183_v16, %v1159_v4  ;;  %v1330_v16 = vmul.f32 %v4465_v27, %v1234_v25 }
 0x389   : > { %1224 = vst.msk [vmem:[#allocation3 + $0x38] sm:$0xff] %vm1216_vm1, %v1207_v5 }
 0x38a   : > { %v1179_v52 = vpop.xlane.xlu1 %1178 }
 0x38b   : > { %v1205_v41 = vadd.f32 %v1179_v52, %v1157_v0  ;;  %v1237_v52 = vld [vmem:[#allocation4 + $0x50] sm:$0xff] }
 0x38d   : > { %1222 = vst.msk [vmem:[#allocation3 + $0x28] sm:$0xff] %vm1216_vm1, %v1205_v41  ;;  %v1333_v41 = vmul.f32 %v4473_v21, %v1237_v52  ;;  %v1244_v21 = vld [vmem:[#allocation4 + $0x38] sm:$0xff] }
 0x38e   : > { %v1189_v6 = vpop.xlane.xlu0 %1188  ;;  %v1191_v56 = vpop.xlane.xlu1 %1190 }
 0x38f   : > { %v1210_v7 = vadd.f32 %v1189_v6, %v1162_v63  ;;  %v1211_v31 = vadd.f32 %v1191_v56, %v1163_v46  ;;  %v1238_v63 = vld [vmem:[#allocation4 + $0x68] sm:$0xff]  ;;  %v1336_v6 = vmul.f32 %v4471_v53, %v1240_v51  ;;  %v1243_v56 = vld [vmem:[#allocation4 + $0x10] sm:$0xff] }
 0x390   : > { %v1334_v57 = vmul.f32 %v4475_v29, %v1238_v63  ;;  %v1339_v34 = vmul.f32 %v4481_v26, %v1243_v56 }
 0x391   : > { %1227 = vst.msk [vmem:[#allocation3 + $0x50] sm:$0xff] %vm1216_vm1, %v1210_v7  ;;  %1228 = vst.msk [vmem:[#allocation3 + $0x58] sm:$0xff] %vm1216_vm1, %v1211_v31  ;;  %v1241_v31 = vld [vmem:[#allocation4 + $0x40] sm:$0xff] }
 0x392   : > { %v1185_v33 = vpop.xlane.xlu0 %1184  ;;  %v1187_v37 = vpop.xlane.xlu1 %1186 }
 0x393   : > { %v1208_v40 = vadd.f32 %v1185_v33, %v1160_v48  ;;  %v1209_v1 = vadd.f32 %v1187_v37, %v1161_v32  ;;  %v1337_v37 = vmul.f32 %v4485_v30, %v1241_v31 }
 0x395   : > { %1225 = vst.msk [vmem:[#allocation3 + $0x40] sm:$0xff] %vm1216_vm1, %v1208_v40  ;;  %1226 = vst.msk [vmem:[#allocation3 + $0x48] sm:$0xff] %vm1216_vm1, %v1209_v1  ;;  %v1340_v40 = vmul.f32 %v4479_v10, %v1244_v21  ;;  %v1247_v1 = vld [vmem:[#allocation4 + $0x78] sm:$0xff] }
 0x396   : > { %v1197_v12 = vpop.xlane.xlu0 %1196  ;;  %v1199_v42 = vpop.xlane.xlu1 %1198 }
 0x397   : > { %v1214_v45 = vadd.f32 %v1197_v12, %v1166_v13  ;;  %v1215_v9 = vadd.f32 %v1199_v42, %v1167_v24  ;;  %v1338_v12 = vmul.f32 %v4483_v28, %v1242_v38  ;;  %v1245_v42 = vld [vmem:[#allocation4 + $0x60] sm:$0xff] }
 0x399   : > { %1231 = vst.msk [vmem:[#allocation3 + $0x70] sm:$0xff] %vm1216_vm1, %v1214_v45  ;;  %1232 = vst.msk [vmem:[#allocation3 + $0x78] sm:$0xff] %vm1216_vm1, %v1215_v9  ;;  %v1248_v45 = vld [vmem:[#allocation4 + $0x28] sm:$0xff] }
 0x39a   : > { %v1193_v18 = vpop.xlane.xlu0 %1192  ;;  %v1195_v62 = vpop.xlane.xlu1 %1194 }
 0x39b   : > { %v1212_v47 = vadd.f32 %v1193_v18, %v1164_v2  ;;  %v1213_v55 = vadd.f32 %v1195_v62, %v1165_v44  ;;  %v1341_v44 = vmul.f32 %v4489_v8, %v1245_v42  ;;  %v1246_v18 = vld [vmem:[#allocation4 + $0x70] sm:$0xff] }
 0x39c   : > { %v1342_v60 = vmul.f32 %v4487_v14, %v1246_v18 }
 0x39d   : > { %1229 = vst.msk [vmem:[#allocation3 + $0x60] sm:$0xff] %vm1216_vm1, %v1212_v47  ;;  %1230 = vst.msk [vmem:[#allocation3 + $0x68] sm:$0xff] %vm1216_vm1, %v1213_v55 }
 0x39e   : > { %v1322_v13 = vpop.permute.xlu1 %1321 }
 0x39f   : > { %v1343_v23 = vmul.f32 %v1322_v13, %v1247_v1 }
 0x3a2   : > { %v1327_v9 = vpop.permute.xlu0 %1326 }
 0x3a3   : > { %v1344_v47 = vmul.f32 %v1327_v9, %v1248_v45 }
 0x3ae   : > { %v3285_v3 = vpop.f32.mrf.mxu1 }
 0x3af   : > { %v1500_v50 = vadd.f32 %v3285_v3, %v1331_v11 }
 0x3b0   : > { %v1435_v17 = vpop.f32.mrf.mxu1 }
 0x3b1   : > { %1516 = vst [vmem:[#allocation4 + $0x58] sm:$0xff] %v1500_v50  ;;  %v1498_v58 = vadd.f32 %v1435_v17, %v1329_v54 }
 0x3b2   : > { %v3286_v4 = vpop.f32.mrf.mxu1 }
 0x3b3   : > { %1514 = vst [vmem:[#allocation4 + $0x30] sm:$0xff] %v1498_v58  ;;  %v1501_v35 = vadd.f32 %v3286_v4, %v1332_v22 }
 0x3b4   : > { %v1438_v5 = vpop.f32.mrf.mxu1 }
 0x3b5   : > { %1517 = vst [vmem:[#allocation4 + $0x18] sm:$0xff] %v1501_v35  ;;  %v1499_v0 = vadd.f32 %v1438_v5, %v1330_v16 }
 0x3b7   : > { %1515 = vst [vmem:[#allocation4] sm:$0xff] %v1499_v0 }
 0x3bf   : > { %v3289_v15 = vpop.f32.mrf.mxu1 }
 0x3c0   : > { %v1504_v36 = vadd.f32 %v3289_v15, %v1335_v61 }
 0x3c1   : > { %v1451_v46 = vpop.f32.mrf.mxu1 }
 0x3c2   : > { %1520 = vst [vmem:[#allocation4 + $0x8] sm:$0xff] %v1504_v36  ;;  %v1502_v27 = vadd.f32 %v1451_v46, %v1333_v41 }
 0x3c3   : > { %v3290_v59 = vpop.f32.mrf.mxu1 }
 0x3c4   : > { %1518 = vst [vmem:[#allocation4 + $0x50] sm:$0xff] %v1502_v27  ;;  %v1505_v7 = vadd.f32 %v3290_v59, %v1336_v6 }
 0x3c5   : > { %v1454_v48 = vpop.f32.mrf.mxu1 }
 0x3c6   : > { %1521 = vst [vmem:[#allocation4 + $0x48] sm:$0xff] %v1505_v7  ;;  %v1503_v32 = vadd.f32 %v1454_v48, %v1334_v57 }
 0x3c7   : > { %v3293_v33 = vpop.f32.mrf.mxu1 }
 0x3c8   : > { %1519 = vst [vmem:[#allocation4 + $0x68] sm:$0xff] %v1503_v32  ;;  %v1508_v53 = vadd.f32 %v3293_v33, %v1339_v34 }
 0x3c9   : > { %v1467_v19 = vpop.f32.mrf.mxu1 }
 0x3ca   : > { %1524 = vst [vmem:[#allocation4 + $0x10] sm:$0xff] %v1508_v53  ;;  %v1506_v29 = vadd.f32 %v1467_v19, %v1337_v37 }
 0x3cb   : > { %v3294_v24 = vpop.f32.mrf.mxu1 }
 0x3cc   : > { %1522 = vst [vmem:[#allocation4 + $0x40] sm:$0xff] %v1506_v29  ;;  %v1509_v26 = vadd.f32 %v3294_v24, %v1340_v40 }
 0x3cd   : > { %v1470_v43 = vpop.f32.mrf.mxu1 }
 0x3ce   : > { %1525 = vst [vmem:[#allocation4 + $0x38] sm:$0xff] %v1509_v26  ;;  %v1507_v30 = vadd.f32 %v1470_v43, %v1338_v12 }
 0x3cf   : > { %v3297_v2 = vpop.f32.mrf.mxu1 }
 0x3d0   : > { %1523 = vst [vmem:[#allocation4 + $0x20] sm:$0xff] %v1507_v30  ;;  %v1512_v10 = vadd.f32 %v3297_v2, %v1343_v23 }
 0x3d1   : > { %v1483_v62 = vpop.f32.mrf.mxu1 }
 0x3d2   : > { %1528 = vst [vmem:[#allocation4 + $0x78] sm:$0xff] %v1512_v10  ;;  %v1510_v55 = vadd.f32 %v1483_v62, %v1341_v44 }
 0x3d3   : > { %v3298_v28 = vpop.f32.mrf.mxu1 }
 0x3d4   : > { %1526 = vst [vmem:[#allocation4 + $0x60] sm:$0xff] %v1510_v55  ;;  %v1513_v39 = vadd.f32 %v3298_v28, %v1344_v47 }
 0x3d5   : > { %v1486_v11 = vpop.f32.mrf.mxu1 }
 0x3d6   : > { %1529 = vst [vmem:[#allocation4 + $0x28] sm:$0xff] %v1513_v39  ;;  %v1511_v49 = vadd.f32 %v1486_v11, %v1342_v60 }
 0x3d8   : > { %1527 = vst [vmem:[#allocation4 + $0x70] sm:$0xff] %v1511_v49 }
 0x3d9 PF: > { %p3056_p5 = scmp.ne.s32.totalorder %s4135_s25, %s4132_s18 }
 0x3db   : > { %1549 = sbr.rel (%p3056_p5) target bundleno = 1877 (0x755), region = 167 }
 0x3e0   : > { %v3581_v8 = vld [vmem:[%s4139_s2 + $0x38] sm:$0xff]   ;;  %v3582_v14 = vld [vmem:[%s4139_s2 + $0x30] sm:$0xff]   ;;  %v3583_v3 = vld [vmem:[%s4139_s2 + $0x28] sm:$0xff]   ;;  %v1598_v61 = vlaneseq  ;;  %v3852_v29 = vmov 0  }
 0x3e1   : > { %3299 = vmatprep.subr.bf16.mxu0 %v3581_v8  ;;  %v3589_v54 = vld [vmem:[%s4137_s9] sm:$0xff]   ;;  %v3585_v25 = vld [vmem:[%s4139_s2 + $0x18] sm:$0xff]   ;;  %v3586_v17 = vld [vmem:[%s4139_s2 + $0x10] sm:$0xff]   ;;  %3580 = vset.pattern.permute.xlu1 %v3852_v29 }
 0x3e2   : > { %3300 = vmatpush3.bf16.xpose.msra.mxu0 %v3581_v8  ;;  %3315 = vmatprep.mubr.bf16.mxu0 %v3589_v54  ;;  %v3584_v50 = vld [vmem:[%s4139_s2 + $0x20] sm:$0xff]   ;;  %v3587_v22 = vld [vmem:[%s4139_s2 + $0x8] sm:$0xff]   ;;  %v3591_v16 = vld [vmem:[%s4137_s9 + $0x10] sm:$0xff]   ;;  %v4555_v51 = vshrl.u32 %v1598_v61, 7  ;;  %v4558_v41 = vand.u32 127, %v1598_v61 }
 0x3e3   : > { %3301 = vmatprep.subr.bf16.mxu0 %v3582_v14  ;;  %v3588_v58 = vld [vmem:[%s4139_s2] sm:$0xff]   ;;  %v3590_v4 = vld [vmem:[%s4137_s9 + $0x8] sm:$0xff]   ;;  %v3592_v35 = vld [vmem:[%s4137_s9 + $0x18] sm:$0xff]   ;;  %3579 = vset.pattern.permute.xlu0 %v3852_v29 }
 0x3e4   : > { %v3593_v5 = vld [vmem:[%s4137_s9 + $0x20] sm:$0xff]   ;;  %v3594_v0 = vld [vmem:[%s4137_s9 + $0x28] sm:$0xff]   ;;  %v3595_v20 = vld [vmem:[%s4137_s9 + $0x30] sm:$0xff]   ;;  %v1601_v15 = vadd.s32 16, %v4555_v51  ;;  %v1602_v36 = vadd.s32 24, %v4555_v51  ;;  %vm1617_vm3 = vcmp.le.s32.totalorder %v4558_v41, %v4555_v51  ;;  %v1600_v46 = vadd.s32 8, %v4555_v51 }
 0x3e5   : > { %v3596_v52 = vld [vmem:[%s4137_s9 + $0x38] sm:$0xff]   ;;  %v1603_v57 = vadd.s32 32, %v4555_v51  ;;  %v1606_v48 = vadd.s32 56, %v4555_v51  ;;  %v1605_v21 = vadd.s32 48, %v4555_v51  ;;  %v1604_v37 = vadd.s32 40, %v4555_v51  ;;  %v3602_v29 = vld [vmem:[%s4141_s17 + $0x10] sm:$0xff]  }
 0x3e6   : > { %vm1619_vm2 = vcmp.le.s32.totalorder %v4558_v41, %v1601_v15  ;;  %vm1620_vm4 = vcmp.le.s32.totalorder %v4558_v41, %v1602_v36  ;;  %vm1618_vm5 = vcmp.le.s32.totalorder %v4558_v41, %v1600_v46  ;;  %v1607_v19 = vadd.s32 64, %v4555_v51  ;;  %v3597_v54 = vld [vmem:[%s4141_s17 + $0x38] sm:$0xff]   ;;  %v4678_v46 = vld [vmem:[#allocation2 + $0x20] sm:$0xff] }
 0x3e7   : > { %vm1621_vm6 = vcmp.le.s32.totalorder %v4558_v41, %v1603_v57  ;;  %vm1624_vm7 = vcmp.le.s32.totalorder %v4558_v41, %v1606_v48  ;;  %vm1623_vm8 = vcmp.le.s32.totalorder %v4558_v41, %v1605_v21  ;;  %vm1622_vm9 = vcmp.le.s32.totalorder %v4558_v41, %v1604_v37  ;;  %3331 = vmatprep.subr.bf16.mxu1 %v3597_v54  ;;  %v4684_v57 = vld [vmem:[#allocation2 + $0x38] sm:$0xff]  ;;  %v4691_v21 = vld [vmem:[#allocation2 + $0x30] sm:$0xff] }
 0x3e8   : > { %v1610_v13 = vadd.s32 88, %v4555_v51  ;;  %v1609_v24 = vadd.s32 80, %v4555_v51  ;;  %vm1625_vm10 = vcmp.le.s32.totalorder %v4558_v41, %v1607_v19  ;;  %v1608_v23 = vadd.s32 72, %v4555_v51  ;;  %3332 = vmatpush3.bf16.msra.mxu1 %v3597_v54  ;;  %v4700_v19 = vld [vmem:[#allocation2 + $0x28] sm:$0xff] }
 0x3e9   : > { %v1611_v9 = vadd.s32 96, %v4555_v51  ;;  %v1614_v18 = vadd.s32 120, %v4555_v51  ;;  %v1613_v62 = vadd.s32 112, %v4555_v51  ;;  %v1612_v55 = vadd.s32 104, %v4555_v51  ;;  %v4740_v54 = vld [vmem:[#allocation2 + $0x48] sm:$0xff] }
 0x3ea   : > { %3302 = vmatpush3.bf16.xpose.msra.mxu0 %v3582_v14  ;;  %vm1628_vm11 = vcmp.le.s32.totalorder %v4558_v41, %v1610_v13  ;;  %vm1627_vm12 = vcmp.le.s32.totalorder %v4558_v41, %v1609_v24  ;;  %vm1626_vm13 = vcmp.le.s32.totalorder %v4558_v41, %v1608_v23 }
 0x3eb   : > { %3303 = vmatprep.subr.bf16.mxu0 %v3583_v3  ;;  %vm1629_vm14 = vcmp.le.s32.totalorder %v4558_v41, %v1611_v9  ;;  %vm1632_vm15 = vcmp.le.s32.totalorder %v4558_v41, %v1614_v18  ;;  %vm1631_vm0 = vcmp.le.s32.totalorder %v4558_v41, %v1613_v62  ;;  %vm1630_vm1 = vcmp.le.s32.totalorder %v4558_v41, %v1612_v55  ;;  %v3600_v41 = vld [vmem:[%s4141_s17 + $0x20] sm:$0xff]   ;;  %v4720_v9 = vld [vmem:[#allocation2 + $0x58] sm:$0xff]  ;;  %v4730_v55 = vld [vmem:[#allocation2 + $0x50] sm:$0xff] }
 0x3f2   : > { %3304 = vmatpush3.bf16.xpose.msra.mxu0 %v3583_v3 }
 0x3f3   : > { %3305 = vmatprep.subr.bf16.mxu0 %v3584_v50 }
 0x3fa   : > { %3306 = vmatpush3.bf16.xpose.msra.mxu0 %v3584_v50  ;;  %v4640_v50 = vld [vmem:[#allocation2 + $0x10] sm:$0xff] }
 0x3fb   : > { %3307 = vmatprep.subr.bf16.mxu0 %v3585_v25 }
 0x402   : > { %3308 = vmatpush3.bf16.xpose.msra.mxu0 %v3585_v25  ;;  %v3598_v25 = vld [vmem:[%s4141_s17 + $0x30] sm:$0xff]  }
 0x403   : > { %3309 = vmatprep.subr.bf16.mxu0 %v3586_v17  ;;  %3333 = vmatprep.subr.bf16.mxu1 %v3598_v25 }
 0x404   : > { %3334 = vmatpush3.bf16.msra.mxu1 %v3598_v25  ;;  %v3604_v25 = vld [vmem:[%s4141_s17] sm:$0xff]  }
 0x40a   : > { %3310 = vmatpush3.bf16.xpose.msra.mxu0 %v3586_v17 }
 0x40b   : > { %3311 = vmatprep.subr.bf16.mxu0 %v3587_v22 }
 0x412   : > { %3312 = vmatpush3.bf16.xpose.msra.mxu0 %v3587_v22  ;;  %v4643_v22 = vld [vmem:[#allocation2] sm:$0xff] }
 0x413   : > { %3313 = vmatprep.subr.bf16.mxu0 %v3588_v58 }
 0x41a   : > { %3314 = vmatpush3.bf16.xpose.msra.mxu0 %v3588_v58 }
 0x421   : > { %3316 = vmatmul.mubr.bf16.vlgmr.msra.gmra.mxu0 %v3590_v4 }
 0x422   : > { %3319 = vmatprep.mubr.bf16.mxu0 %v3591_v16  ;;  %v4648_v16 = vld [vmem:[#allocation2 + $0x18] sm:$0xff] }
 0x429   : > { %3320 = vmatmul.mubr.bf16.gmra.mxu0 %v3592_v35  ;;  %v3599_v35 = vld [vmem:[%s4141_s17 + $0x28] sm:$0xff]  }
 0x42a   : > { %3323 = vmatprep.mubr.bf16.mxu0 %v3593_v5  ;;  %3335 = vmatprep.subr.bf16.mxu1 %v3599_v35 }
 0x42b   : > { %3336 = vmatpush3.bf16.msra.mxu1 %v3599_v35 }
 0x42c   : > { %3337 = vmatprep.subr.bf16.mxu1 %v3600_v41 }
 0x42f   : > { %3338 = vmatpush3.bf16.msra.mxu1 %v3600_v41 }
 0x431   : > { %3324 = vmatmul.mubr.bf16.gmra.mxu0 %v3594_v0 }
 0x432   : > { %3327 = vmatprep.mubr.bf16.mxu0 %v3595_v20 }
 0x439   : > { %3328 = vmatmul.mubr.bf16.gmra.mxu0 %v3596_v52  ;;  %v4659_v52 = vld [vmem:[#allocation2 + $0x8] sm:$0xff] }
 0x4e1   : > { %v3317_v63 = vpop.f32.mrf.mxu0 }
 0x4e2   : > { %v4565_v6 = vsel %vm1619_vm2, %v3317_v63, -1e+30  ;;  %vm2162_vm2 = vcmask 7168  }
 0x4e3   : > { %1862 = vmax.xlane.f32.xlu1 %v4565_v6  ;;  %v1763_v27 = vpop.f32.mrf.mxu0 }
 0x4e4   : > { %v4569_v56 = vsel %vm1617_vm3, %v1763_v27, -1e+30 }
 0x4e5   : > { %1858 = vmax.xlane.f32.xlu0 %v4569_v56  ;;  %v3318_v59 = vpop.f32.mrf.mxu0 }
 0x4e6   : > { %v4574_v7 = vsel %vm1620_vm4, %v3318_v59, -1e+30 }
 0x4e7   : > { %1864 = vmax.xlane.f32.xlu1 %v4574_v7  ;;  %v1766_v31 = vpop.f32.mrf.mxu0 }
 0x4e8   : > { %v4578_v34 = vsel %vm1618_vm5, %v1766_v31, -1e+30  ;;  %v3601_v31 = vld [vmem:[%s4141_s17 + $0x18] sm:$0xff]  }
 0x4e9   : > { %1860 = vmax.xlane.f32.xlu0 %v4578_v34  ;;  %v3321_v32 = vpop.f32.mrf.mxu0  ;;  %3339 = vmatprep.subr.bf16.mxu1 %v3601_v31 }
 0x4ea   : > { %v4596_v12 = vsel %vm1623_vm8, %v3321_v32, -1e+30  ;;  %3340 = vmatpush3.bf16.msra.mxu1 %v3601_v31 }
 0x4eb   : > { %v1779_v33 = vpop.f32.mrf.mxu0  ;;  %3341 = vmatprep.subr.bf16.mxu1 %v3602_v29 }
 0x4ec   : > { %v4585_v53 = vsel %vm1621_vm6, %v1779_v33, -1e+30 }
 0x4ed   : > { %1866 = vmax.xlane.f32.xlu0 %v4585_v53  ;;  %v3322_v38 = vpop.f32.mrf.mxu0 }
 0x4ee   : > { %v4590_v40 = vsel %vm1624_vm7, %v3322_v38, -1e+30  ;;  %3342 = vmatpush3.bf16.msra.mxu1 %v3602_v29 }
 0x4ef   : > { %1872 = vmax.xlane.f32.xlu1 %v4590_v40  ;;  %v1782_v1 = vpop.f32.mrf.mxu0 }
 0x4f0   : > { %v4600_v42 = vsel %vm1622_vm9, %v1782_v1, -1e+30 }
 0x4f1   : > { %1870 = vmax.xlane.f32.xlu0 %v4596_v12  ;;  %v3325_v26 = vpop.f32.mrf.mxu0 }
 0x4f2   : > { %v4612_v44 = vsel %vm1627_vm12, %v3325_v26, -1e+30  ;;  %v4710_v26 = vld [vmem:[#allocation2 + $0x40] sm:$0xff] }
 0x4f3   : > { %1868 = vmax.xlane.f32.xlu1 %v4600_v42  ;;  %v1795_v43 = vpop.f32.mrf.mxu0 }
 0x4f4   : > { %v4606_v30 = vsel %vm1625_vm10, %v1795_v43, -1e+30 }
 0x4f5   : > { %1874 = vmax.xlane.f32.xlu0 %v4606_v30  ;;  %v3326_v45 = vpop.f32.mrf.mxu0 }
 0x4f6   : > { %v4610_v2 = vsel %vm1628_vm11, %v3326_v45, -1e+30 }
 0x4f7   : > { %1880 = vmax.xlane.f32.xlu1 %v4610_v2  ;;  %v1798_v10 = vpop.f32.mrf.mxu0 }
 0x4f8   : > { %v4621_v28 = vsel %vm1626_vm13, %v1798_v10, -1e+30  ;;  %v3603_v10 = vld [vmem:[%s4141_s17 + $0x8] sm:$0xff]  }
 0x4f9   : > { %1878 = vmax.xlane.f32.xlu0 %v4612_v44  ;;  %v3329_v47 = vpop.f32.mrf.mxu0  ;;  %3343 = vmatprep.subr.bf16.mxu1 %v3603_v10 }
 0x4fa   : > { %v4632_v8 = vsel %vm1631_vm0, %v3329_v47, -1e+30  ;;  %3344 = vmatpush3.bf16.msra.mxu1 %v3603_v10 }
 0x4fb   : > { %1876 = vmax.xlane.f32.xlu1 %v4621_v28  ;;  %v1811_v60 = vpop.f32.mrf.mxu0  ;;  %3345 = vmatprep.subr.bf16.mxu1 %v3604_v25 }
 0x4fc   : > { %v4626_v39 = vsel %vm1629_vm14, %v1811_v60, -1e+30 }
 0x4fd   : > { %v3330_v11 = vpop.f32.mrf.mxu0  ;;  %1882 = vmax.xlane.f32.xlu0 %v4626_v39 }
 0x4fe   : > { %v4630_v49 = vsel %vm1632_vm15, %v3330_v11, -1e+30  ;;  %3346 = vmatpush3.bf16.msra.mxu1 %v3604_v25 }
 0x4ff   : > { %1888 = vmax.xlane.f32.xlu1 %v4630_v49  ;;  %v1814_v14 = vpop.f32.mrf.mxu0 }
 0x500   : > { %v4635_v3 = vsel %vm1630_vm1, %v1814_v14, -1e+30 }
 0x501   : > { %1886 = vmax.xlane.f32.xlu0 %v4632_v8 }
 0x503   : > { %1884 = vmax.xlane.f32.xlu1 %v4635_v3 }
 0x56c   : > { %v1863_v17 = vpop.xlane.xlu1 %1862 }
 0x56d   : > { %v4646_v58 = vmax.f32 %v4640_v50, %v1863_v17 }
 0x56e   : > { %v1859_v4 = vpop.xlane.xlu0 %1858 }
 0x56f   : > { %v1908_v5 = vsub.f32 %v4640_v50, %v4646_v58  ;;  %2478 = vst.msk [vmem:[#allocation2 + $0x10] sm:$0xff] %vm2162_vm2, %v4646_v58  ;;  %v4656_v0 = vmax.f32 %v4643_v22, %v1859_v4  ;;  %1966 = vperm.xlu1 %3580, %v4646_v58  }
 0x570   : > { %v1865_v20 = vpop.xlane.xlu1 %1864 }
 0x571   : > { %2476 = vst.msk [vmem:[#allocation2] sm:$0xff] %vm2162_vm2, %v4656_v0  ;;  %v4666_v51 = vmax.f32 %v4648_v16, %v1865_v20  ;;  %1956 = vperm.xlu0 %3579, %v4656_v0   ;;  %v4750_v20 = vld [vmem:[#allocation2 + $0x60] sm:$0xff] }
 0x572   : > { %v1861_v15 = vpop.xlane.xlu0 %1860 }
 0x573   : > { %2479 = vst.msk [vmem:[#allocation2 + $0x18] sm:$0xff] %vm2162_vm2, %v4666_v51  ;;  %v4675_v63 = vmax.f32 %v4659_v52, %v1861_v15  ;;  %1971 = vperm.xlu1 %3580, %v4666_v51  }
 0x575   : > { %v1907_v27 = vsub.f32 %v4659_v52, %v4675_v63  ;;  %2477 = vst.msk [vmem:[#allocation2 + $0x8] sm:$0xff] %vm2162_vm2, %v4675_v63  ;;  %v5092_v52 = vsub.f32 %v4648_v16, %v4666_v51 }
 0x576   : > { %v1867_v59 = vpop.xlane.xlu0 %1866 }
 0x577   : > { %v4688_v48 = vmax.f32 %v4678_v46, %v1867_v59  ;;  %1961 = vperm.xlu1 %3580, %v4675_v63   ;;  %v4760_v59 = vld [vmem:[#allocation2 + $0x78] sm:$0xff]  ;;  %v1928_v63 = vmul.f32 1.442695, %v5092_v52 }
 0x578   : > { %v1873_v32 = vpop.xlane.xlu1 %1872 }
 0x579   : > { %2480 = vst.msk [vmem:[#allocation2 + $0x20] sm:$0xff] %vm2162_vm2, %v4688_v48  ;;  %v4698_v37 = vmax.f32 %v4684_v57, %v1873_v32 }
 0x57a   : > { %v1871_v38 = vpop.xlane.xlu0 %1870 }
 0x57b   : > { %2483 = vst.msk [vmem:[#allocation2 + $0x38] sm:$0xff] %vm2162_vm2, %v4698_v37  ;;  %v4708_v13 = vmax.f32 %v4691_v21, %v1871_v38  ;;  %v5096_v16 = vsub.f32 %v4684_v57, %v4698_v37 }
 0x57c   : > { %v1869_v24 = vpop.xlane.xlu1 %1868 }
 0x57d   : > { %2482 = vst.msk [vmem:[#allocation2 + $0x30] sm:$0xff] %vm2162_vm2, %v4708_v13  ;;  %v4717_v23 = vmax.f32 %v4700_v19, %v1869_v24  ;;  %1986 = vperm.xlu1 %3580, %v4708_v13   ;;  %v4770_v24 = vld [vmem:[#allocation2 + $0x70] sm:$0xff]  ;;  %v5093_v50 = vsub.f32 %v4691_v21, %v4708_v13  ;;  %v1936_v51 = vmul.f32 1.442695, %v5096_v16 }
 0x57e   : > { %v1875_v45 = vpop.xlane.xlu0 %1874 }
 0x57f   : > { %2481 = vst.msk [vmem:[#allocation2 + $0x28] sm:$0xff] %vm2162_vm2, %v4717_v23  ;;  %v4728_v62 = vmax.f32 %v4710_v26, %v1875_v45  ;;  %v1934_v58 = vmul.f32 1.442695, %v5093_v50 }
 0x580   : > { %v1881_v47 = vpop.xlane.xlu1 %1880 }
 0x581   : > { %2484 = vst.msk [vmem:[#allocation2 + $0x40] sm:$0xff] %vm2162_vm2, %v4728_v62  ;;  %v4737_v11 = vmax.f32 %v4720_v9, %v1881_v47  ;;  %1976 = vperm.xlu1 %3580, %v4688_v48   ;;  %v4780_v47 = vld [vmem:[#allocation2 + $0x68] sm:$0xff] }
 0x582   : > { %v1879_v14 = vpop.xlane.xlu0 %1878 }
 0x583   : > { %2487 = vst.msk [vmem:[#allocation2 + $0x58] sm:$0xff] %vm2162_vm2, %v4737_v11  ;;  %v4748_v4 = vmax.f32 %v4730_v55, %v1879_v14 }
 0x584   : > { %v1877_v35 = vpop.xlane.xlu1 %1876 }
 0x585   : > { %2486 = vst.msk [vmem:[#allocation2 + $0x50] sm:$0xff] %vm2162_vm2, %v4748_v4  ;;  %v4757_v41 = vmax.f32 %v4740_v54, %v1877_v35  ;;  %1981 = vperm.xlu1 %3580, %v4717_v23  }
 0x586   : > { %v1883_v31 = vpop.xlane.xlu0 %1882 }
 0x587   : > { %2485 = vst.msk [vmem:[#allocation2 + $0x48] sm:$0xff] %vm2162_vm2, %v4757_v41  ;;  %2001 = vperm.xlu0 %3579, %v4757_v41   ;;  %v4768_v38 = vmax.f32 %v4750_v20, %v1883_v31  ;;  %v5098_v13 = vsub.f32 %v4740_v54, %v4757_v41 }
 0x588   : > { %v1889_v29 = vpop.xlane.xlu1 %1888 }
 0x589   : > { %v4773_v45 = vmax.f32 %v4760_v59, %v1889_v29  ;;  %1991 = vperm.xlu1 %3580, %v4698_v37   ;;  %2488 = vst.msk [vmem:[#allocation2 + $0x60] sm:$0xff] %vm2162_vm2, %v4768_v38  ;;  %v5099_v57 = vsub.f32 %v4750_v20, %v4768_v38 }
 0x58a   : > { %v1887_v14 = vpop.xlane.xlu0 %1886 }
 0x58b   : > { %2491 = vst.msk [vmem:[#allocation2 + $0x78] sm:$0xff] %vm2162_vm2, %v4773_v45  ;;  %2011 = vperm.xlu0 %3579, %v4737_v11   ;;  %v4788_v35 = vmax.f32 %v4770_v24, %v1887_v14  ;;  %v1946_v37 = vmul.f32 1.442695, %v5099_v57 }
 0x58c   : > { %v1885_v31 = vpop.xlane.xlu1 %1884 }
 0x58d   : > { %v4791_v29 = vmax.f32 %v4780_v47, %v1885_v31  ;;  %1996 = vperm.xlu1 %3580, %v4728_v62   ;;  %2490 = vst.msk [vmem:[#allocation2 + $0x70] sm:$0xff] %vm2162_vm2, %v4788_v35  ;;  %v5101_v54 = vsub.f32 %v4770_v24, %v4788_v35 }
 0x58f   : > { %2489 = vst.msk [vmem:[#allocation2 + $0x68] sm:$0xff] %vm2162_vm2, %v4791_v29  ;;  %2021 = vperm.xlu0 %3579, %v4791_v29   ;;  %v1950_v41 = vmul.f32 1.442695, %v5101_v54  ;;  %v5102_v20 = vsub.f32 %v4780_v47, %v4791_v29 }
 0x591   : > { %2006 = vperm.xlu1 %3580, %v4748_v4  }
 0x593   : > { %2031 = vperm.xlu0 %3579, %v4773_v45  }
 0x595   : > { %2016 = vperm.xlu1 %3580, %v4768_v38   ;;  %v1948_v38 = vmul.f32 1.442695, %v5102_v20 }
 0x599   : > { %2026 = vperm.xlu1 %3580, %v4788_v35  }
 0x5ea   : > { %v1967_v14 = vpop.permute.xlu1 %1966 }
 0x5eb   : > { %v2036_v31 = vsub.f32 %v4565_v6, %v1967_v14 }
 0x5ec   : > { %v1957_v17 = vpop.permute.xlu0 %1956 }
 0x5ed   : > { %v2054_v10 = vmul.f32 1.442695, %v2036_v31  ;;  %v2034_v25 = vsub.f32 %v4569_v56, %v1957_v17 }
 0x5ee   : > { %v1972_v32 = vpop.permute.xlu1 %1971 }
 0x5ef   : > { %3605 = vpow2.f32 %v2054_v10  ;;  %v2050_v15 = vmul.f32 1.442695, %v2034_v25  ;;  %v2037_v1 = vsub.f32 %v4574_v7, %v1972_v32 }
 0x5f1   : > { %3607 = vpow2.f32 %v2050_v15  ;;  %v2056_v60 = vmul.f32 1.442695, %v2037_v1 }
 0x5f2   : > { %v1962_v18 = vpop.permute.xlu1 %1961 }
 0x5f3   : > { %v2035_v43 = vsub.f32 %v4578_v34, %v1962_v18  ;;  %3609 = vpow2.f32 %v2056_v60 }
 0x5f5   : > { %v2052_v36 = vmul.f32 1.442695, %v2035_v43 }
 0x5f7   : > { %3611 = vpow2.f32 %v2052_v36 }
 0x5f8   : > { %v1987_v33 = vpop.permute.xlu1 %1986 }
 0x5f9   : > { %v2040_v6 = vsub.f32 %v4596_v12, %v1987_v33 }
 0x5fb   : > { %v2062_v14 = vmul.f32 1.442695, %v2040_v6 }
 0x5fc   : > { %v3606_v31 = vpop.eup %3605  ;;  %v1977_v61 = vpop.permute.xlu1 %1976 }
 0x5fd   : > { %3613 = vpow2.f32 %v2062_v14  ;;  %v2038_v56 = vsub.f32 %v4585_v53, %v1977_v61  ;;  %2118 = vadd.xlane.f32.xlu0 %v3606_v31 }
 0x5fe   : > { %v3608_v17 = vpop.eup %3607 }
 0x5ff   : > { %v2058_v7 = vmul.f32 1.442695, %v2038_v56  ;;  %2114 = vadd.xlane.f32.xlu1 %v3608_v17 }
 0x600   : > { %v1982_v1 = vpop.permute.xlu1 %1981  ;;  %v3610_v18 = vpop.eup %3609 }
 0x601   : > { %3615 = vpow2.f32 %v2058_v7  ;;  %v2039_v34 = vsub.f32 %v4600_v42, %v1982_v1  ;;  %v2292_v32 = vpack.c.bf16 %v3610_v18, %v3606_v31 }
 0x602   : > { %v2002_v43 = vpop.permute.xlu0 %2001 }
 0x603   : > { %v2060_v36 = vmul.f32 1.442695, %v2039_v34  ;;  %2120 = vadd.xlane.f32.xlu1 %v3610_v18  ;;  %v2043_v12 = vsub.f32 %v4621_v28, %v2002_v43 }
 0x604   : > { %v3612_v60 = vpop.eup %3611  ;;  %v1992_v33 = vpop.permute.xlu1 %1991 }
 0x605   : > { %3617 = vpow2.f32 %v2060_v36  ;;  %v2041_v15 = vsub.f32 %v4590_v40, %v1992_v33  ;;  %2116 = vadd.xlane.f32.xlu0 %v3612_v60  ;;  %v2291_v53 = vpack.c.bf16 %v3612_v60, %v3608_v17  ;;  %v2068_v25 = vmul.f32 1.442695, %v2043_v12 }
 0x606   : > { %v2012_v61 = vpop.permute.xlu0 %2011 }
 0x607   : > { %v2064_v10 = vmul.f32 1.442695, %v2041_v15  ;;  %3347 = vmatprep.mubr.bf16.mxu1 %v2291_v53  ;;  %v2045_v42 = vsub.f32 %v4610_v2, %v2012_v61 }
 0x608   : > { %3348 = vmatmul.mubr.bf16.vlgmr.msra.gmra.mxu1 %v2292_v32  ;;  %v1997_v6 = vpop.permute.xlu1 %1996 }
 0x609   : > { %3619 = vpow2.f32 %v2064_v10  ;;  %v2042_v14 = vsub.f32 %v4606_v30, %v1997_v6  ;;  %v2072_v40 = vmul.f32 1.442695, %v2045_v42 }
 0x60a   : > { %v3614_v56 = vpop.eup %3613  ;;  %v2022_v28 = vpop.permute.xlu0 %2021  ;;  %3621 = vpow2.f32 %v2068_v25 }
 0x60b   : > { %v2066_v7 = vmul.f32 1.442695, %v2042_v14  ;;  %2126 = vadd.xlane.f32.xlu0 %v3614_v56  ;;  %v2047_v17 = vsub.f32 %v4635_v3, %v2022_v28 }
 0x60c   : > { %v2007_v1 = vpop.permute.xlu1 %2006 }
 0x60d   : > { %3623 = vpow2.f32 %v2066_v7  ;;  %v2044_v31 = vsub.f32 %v4612_v44, %v2007_v1  ;;  %v2076_v43 = vmul.f32 1.442695, %v2047_v17  ;;  %v1924_v1 = vmul.f32 1.442695, %v1907_v27 }
 0x60e   : > { %v3616_v34 = vpop.eup %3615  ;;  %v2032_v18 = vpop.permute.xlu0 %2031  ;;  %3625 = vpow2.f32 %v2072_v40 }
 0x60f   : > { %v2070_v2 = vmul.f32 1.442695, %v2044_v31  ;;  %2122 = vadd.xlane.f32.xlu0 %v3616_v34  ;;  %v2049_v30 = vsub.f32 %v4630_v49, %v2032_v18  ;;  %v1926_v31 = vmul.f32 1.442695, %v1908_v5 }
 0x610   : > { %v2017_v36 = vpop.permute.xlu1 %2016 }
 0x611   : > { %3627 = vpow2.f32 %v2070_v2  ;;  %v2046_v60 = vsub.f32 %v4626_v39, %v2017_v36  ;;  %v2080_v3 = vmul.f32 1.442695, %v2049_v30  ;;  %v5091_v2 = vsub.f32 %v4678_v46, %v4688_v48 }
 0x612   : > { %v3618_v12 = vpop.eup %3617  ;;  %3629 = vpow2.f32 %v2076_v43  ;;  %v5097_v48 = vsub.f32 %v4730_v55, %v4748_v4  ;;  %v5100_v55 = vsub.f32 %v4720_v9, %v4737_v11  ;;  %v5103_v11 = vsub.f32 %v4760_v59, %v4773_v45 }
 0x613   : > { %v2074_v33 = vmul.f32 1.442695, %v2046_v60  ;;  %v2293_v15 = vpack.c.bf16 %v3618_v12, %v3616_v34  ;;  %v5090_v34 = vsub.f32 %v4643_v22, %v4656_v0  ;;  %v1930_v43 = vmul.f32 1.442695, %v5091_v2 }
 0x614   : > { %v2027_v53 = vpop.permute.xlu1 %2026  ;;  %v5094_v22 = vsub.f32 %v4700_v19, %v4717_v23  ;;  %v5095_v0 = vsub.f32 %v4710_v26, %v4728_v62  ;;  %v1942_v21 = vmul.f32 1.442695, %v5097_v48  ;;  %v1940_v26 = vmul.f32 1.442695, %v5098_v13  ;;  %v2087_v48 = vld [vmem:[#allocation3 + $0x28] sm:$0xff] }
 0x615   : > { %3631 = vpow2.f32 %v2074_v33  ;;  %v2048_v44 = vsub.f32 %v4632_v8, %v2027_v53  ;;  %3351 = vmatprep.mubr.bf16.mxu1 %v2293_v15  ;;  %v1922_v18 = vmul.f32 1.442695, %v5090_v34  ;;  %v1944_v4 = vmul.f32 1.442695, %v5100_v55  ;;  %v2082_v53 = vld [vmem:[#allocation3] sm:$0xff] }
 0x616   : > { %v3620_v61 = vpop.eup %3619  ;;  %3633 = vpow2.f32 %v2080_v3  ;;  %v1932_v5 = vmul.f32 1.442695, %v5094_v22  ;;  %v1938_v46 = vmul.f32 1.442695, %v5095_v0  ;;  %v2084_v3 = vld [vmem:[#allocation3 + $0x10] sm:$0xff]  ;;  %v2089_v22 = vld [vmem:[#allocation3 + $0x38] sm:$0xff] }
 0x617   : > { %v2078_v32 = vmul.f32 1.442695, %v2048_v44  ;;  %2128 = vadd.xlane.f32.xlu1 %v3620_v61  ;;  %v2294_v10 = vpack.c.bf16 %v3620_v61, %v3614_v56  ;;  %v3622_v49 = vpop.eup %3621 }
 0x619   : > { %3635 = vpow2.f32 %v2078_v32  ;;  %3352 = vmatmul.mubr.bf16.gmra.mxu1 %v2294_v10 }
 0x61a   : > { %v3624_v25 = vpop.eup %3623  ;;  %3637 = vpow2.f32 %v1924_v1 }
 0x61b   : > { %2124 = vadd.xlane.f32.xlu1 %v3618_v12  ;;  %v2295_v39 = vpack.c.bf16 %v3622_v49, %v3624_v25  ;;  %v3626_v42 = vpop.eup %3625  ;;  %3639 = vpow2.f32 %v1926_v31  ;;  %v1952_v12 = vmul.f32 1.442695, %v5103_v11 }
 0x61c   : > { %3641 = vpow2.f32 %v1922_v18  ;;  %v2086_v18 = vld [vmem:[#allocation3 + $0x20] sm:$0xff] }
 0x61d   : > { %3355 = vmatprep.mubr.bf16.mxu1 %v2295_v39  ;;  %3643 = vpow2.f32 %v1930_v43 }
 0x61e   : > { %v3628_v6 = vpop.eup %3627  ;;  %3645 = vpow2.f32 %v1928_v63 }
 0x61f   : > { %2136 = vadd.xlane.f32.xlu1 %v3626_v42  ;;  %2134 = vadd.xlane.f32.xlu0 %v3628_v6  ;;  %v2296_v14 = vpack.c.bf16 %v3626_v42, %v3628_v6  ;;  %v3630_v28 = vpop.eup %3629  ;;  %3647 = vpow2.f32 %v1934_v58  ;;  %v2083_v42 = vld [vmem:[#allocation3 + $0x8] sm:$0xff] }
 0x620   : > { %3649 = vpow2.f32 %v1932_v5 }
 0x621   : > { %3356 = vmatmul.mubr.bf16.gmra.mxu1 %v2296_v14  ;;  %3651 = vpow2.f32 %v1938_v46 }
 0x622   : > { %v3632_v8 = vpop.eup %3631  ;;  %3653 = vpow2.f32 %v1936_v51 }
 0x623   : > { %2132 = vadd.xlane.f32.xlu1 %v3622_v49  ;;  %2130 = vadd.xlane.f32.xlu0 %v3624_v25  ;;  %v2297_v7 = vpack.c.bf16 %v3630_v28, %v3632_v8  ;;  %v3634_v56 = vpop.eup %3633  ;;  %3655 = vpow2.f32 %v1942_v21  ;;  %v2085_v25 = vld [vmem:[#allocation3 + $0x18] sm:$0xff] }
 0x624   : > { %3657 = vpow2.f32 %v1940_v26 }
 0x625   : > { %3359 = vmatprep.mubr.bf16.mxu1 %v2297_v7  ;;  %3659 = vpow2.f32 %v1946_v37  ;;  %v2093_v37 = vld [vmem:[#allocation3 + $0x58] sm:$0xff] }
 0x626   : > { %v3636_v40 = vpop.eup %3635  ;;  %3661 = vpow2.f32 %v1944_v4 }
 0x627   : > { %2140 = vadd.xlane.f32.xlu1 %v3630_v28  ;;  %2138 = vadd.xlane.f32.xlu0 %v3632_v8  ;;  %v2298_v17 = vpack.c.bf16 %v3634_v56, %v3636_v40  ;;  %v4847_v27 = vpop.eup %3637  ;;  %3663 = vpow2.f32 %v1950_v41 }
 0x628   : > { %v3640_v19 = vpop.eup %3639  ;;  %3665 = vpow2.f32 %v1948_v38  ;;  %v2099_v8 = vmul.f32 %v4847_v27, %v2083_v42 }
 0x629   : > { %3360 = vmatmul.mubr.bf16.gmra.mxu1 %v2298_v17  ;;  %v3642_v23 = vpop.eup %3641  ;;  %3667 = vpow2.f32 %v1952_v12  ;;  %v2100_v44 = vmul.f32 %v3640_v19, %v2084_v3 }
 0x62a   : > { %v4862_v62 = vpop.eup %3643  ;;  %v2098_v10 = vmul.f32 %v3642_v23, %v2082_v53  ;;  %v2090_v53 = vld [vmem:[#allocation3 + $0x40] sm:$0xff] }
 0x62b   : > { %2144 = vadd.xlane.f32.xlu1 %v3634_v56  ;;  %2142 = vadd.xlane.f32.xlu0 %v3636_v40  ;;  %v3646_v30 = vpop.eup %3645  ;;  %v2088_v40 = vld [vmem:[#allocation3 + $0x30] sm:$0xff]  ;;  %v2102_v52 = vmul.f32 %v4862_v62, %v2086_v18 }
 0x62c   : > { %v3648_v36 = vpop.eup %3647  ;;  %v2101_v6 = vmul.f32 %v3646_v30, %v2085_v25 }
 0x62d   : > { %v4874_v60 = vpop.eup %3649  ;;  %v2104_v31 = vmul.f32 %v3648_v36, %v2088_v40 }
 0x62e   : > { %v4877_v9 = vpop.eup %3651 }
 0x62f   : > { %v3654_v24 = vpop.eup %3653 }
 0x630   : > { %v4883_v35 = vpop.eup %3655  ;;  %v2105_v46 = vmul.f32 %v3654_v24, %v2089_v22 }
 0x631   : > { %v4885_v47 = vpop.eup %3657 }
 0x632   : > { %v4889_v29 = vpop.eup %3659 }
 0x633   : > { %v4891_v33 = vpop.eup %3661 }
 0x634   : > { %v4895_v59 = vpop.eup %3663  ;;  %v2109_v20 = vmul.f32 %v4891_v33, %v2093_v37 }
 0x635   : > { %v4897_v45 = vpop.eup %3665 }
 0x636   : > { %v4901_v15 = vpop.eup %3667 }
 0x63c   : > { %2202 = vperm.xlu1 %3580, %v4847_v27  }
 0x640   : > { %2207 = vperm.xlu1 %3580, %v3640_v19  }
 0x641   : > { %2197 = vperm.xlu0 %3579, %v3642_v23   ;;  %v2103_v23 = vmul.f32 %v4874_v60, %v2087_v48 }
 0x644   : > { %2217 = vperm.xlu1 %3580, %v4862_v62  }
 0x645   : > { %2212 = vperm.xlu0 %3579, %v3646_v30   ;;  %v2092_v30 = vld [vmem:[#allocation3 + $0x50] sm:$0xff] }
 0x646   : > { %v2108_v38 = vmul.f32 %v4883_v35, %v2092_v30 }
 0x648   : > { %2227 = vperm.xlu1 %3580, %v3648_v36  }
 0x649   : > { %2222 = vperm.xlu0 %3579, %v4874_v60  }
 0x64c   : > { %2237 = vperm.xlu1 %3580, %v4877_v9  }
 0x64d   : > { %2232 = vperm.xlu0 %3579, %v3654_v24  }
 0x650   : > { %2247 = vperm.xlu1 %3580, %v4883_v35   ;;  %v2106_v35 = vmul.f32 %v4877_v9, %v2090_v53  ;;  %v2181_v53 = vld [vmem:[#allocation4 + $0x58] sm:$0xff] }
 0x651   : > { %2242 = vperm.xlu0 %3579, %v4885_v47  }
 0x654   : > { %2257 = vperm.xlu1 %3580, %v4889_v29  }
 0x655   : > { %2252 = vperm.xlu0 %3579, %v4891_v33  }
 0x658   : > { %2267 = vperm.xlu1 %3580, %v4895_v59  }
 0x659   : > { %2262 = vperm.xlu0 %3579, %v4897_v45  }
 0x65d   : > { %2272 = vperm.xlu0 %3579, %v4901_v15  }
 0x686   : > { %v2119_v61 = vpop.xlane.xlu0 %2118 }
 0x687   : > { %v2148_v32 = vadd.f32 %v2119_v61, %v2100_v44  ;;  %v2091_v44 = vld [vmem:[#allocation3 + $0x48] sm:$0xff] }
 0x688   : > { %v2115_v49 = vpop.xlane.xlu1 %2114  ;;  %v2107_v33 = vmul.f32 %v4885_v47, %v2091_v44 }
 0x689   : > { %2165 = vst.msk [vmem:[#allocation3 + $0x10] sm:$0xff] %vm2162_vm2, %v2148_v32  ;;  %v2146_v39 = vadd.f32 %v2115_v49, %v2098_v10 }
 0x68b   : > { %2163 = vst.msk [vmem:[#allocation3] sm:$0xff] %vm2162_vm2, %v2146_v39 }
 0x68c   : > { %v2121_v14 = vpop.xlane.xlu1 %2120 }
 0x68d   : > { %v2149_v28 = vadd.f32 %v2121_v14, %v2101_v6  ;;  %v2094_v14 = vld [vmem:[#allocation3 + $0x60] sm:$0xff] }
 0x68e   : > { %v2117_v7 = vpop.xlane.xlu0 %2116  ;;  %v2110_v9 = vmul.f32 %v4889_v29, %v2094_v14 }
 0x68f   : > { %2166 = vst.msk [vmem:[#allocation3 + $0x18] sm:$0xff] %vm2162_vm2, %v2149_v28  ;;  %v2147_v56 = vadd.f32 %v2117_v7, %v2099_v8  ;;  %v2095_v28 = vld [vmem:[#allocation3 + $0x68] sm:$0xff] }
 0x690   : > { %v2494_v17 = vld [vmem:[#allocation3 + $0x10] sm:$0xff]  ;;  %v2111_v47 = vmul.f32 %v4897_v45, %v2095_v28  ;;  %v2182_v28 = vld [vmem:[#allocation4 + $0x18] sm:$0xff] }
 0x691   : > { %2164 = vst.msk [vmem:[#allocation3 + $0x8] sm:$0xff] %vm2162_vm2, %v2147_v56  ;;  %3669 = vrcp.f32 %v2494_v17 }
 0x692   : > { %v2492_v1 = vld [vmem:[#allocation3] sm:$0xff] }
 0x693   : > { %3671 = vrcp.f32 %v2492_v1 }
 0x694   : > { %v2127_v34 = vpop.xlane.xlu0 %2126 }
 0x695   : > { %v2152_v2 = vadd.f32 %v2127_v34, %v2104_v31 }
 0x696   : > { %v2495_v43 = vld [vmem:[#allocation3 + $0x18] sm:$0xff] }
 0x697   : > { %2169 = vst.msk [vmem:[#allocation3 + $0x30] sm:$0xff] %vm2162_vm2, %v2152_v2  ;;  %3673 = vrcp.f32 %v2495_v43  ;;  %v2096_v2 = vld [vmem:[#allocation3 + $0x70] sm:$0xff] }
 0x698   : > { %v2123_v63 = vpop.xlane.xlu0 %2122  ;;  %v2493_v50 = vld [vmem:[#allocation3 + $0x8] sm:$0xff]  ;;  %v2112_v29 = vmul.f32 %v4895_v59, %v2096_v2 }
 0x699   : > { %v2150_v58 = vadd.f32 %v2123_v63, %v2102_v52  ;;  %3675 = vrcp.f32 %v2493_v50 }
 0x69b   : > { %2167 = vst.msk [vmem:[#allocation3 + $0x20] sm:$0xff] %vm2162_vm2, %v2150_v58 }
 0x69e   : > { %v3670_v5 = vpop.eup %3669  ;;  %v2498_v0 = vld [vmem:[#allocation3 + $0x30] sm:$0xff] }
 0x69f   : > { %v2526_v27 = vmul.f32 %v3670_v5, %v2494_v17  ;;  %3677 = vrcp.f32 %v2498_v0 }
 0x6a0   : > { %v3672_v16 = vpop.eup %3671  ;;  %v2129_v51 = vpop.xlane.xlu1 %2128 }
 0x6a1   : > { %v2153_v21 = vadd.f32 %v2129_v51, %v2105_v46  ;;  %v2542_v19 = vsub.f32 2.0, %v2526_v27  ;;  %v2524_v13 = vmul.f32 %v3672_v16, %v2492_v1 }
 0x6a2   : > { %v2496_v26 = vld [vmem:[#allocation3 + $0x20] sm:$0xff] }
 0x6a3   : > { %2170 = vst.msk [vmem:[#allocation3 + $0x38] sm:$0xff] %vm2162_vm2, %v2153_v21  ;;  %v2558_v57 = vmul.f32 %v3670_v5, %v2542_v19  ;;  %v2540_v62 = vsub.f32 2.0, %v2524_v13  ;;  %3679 = vrcp.f32 %v2496_v26 }
 0x6a4   : > { %v3674_v55 = vpop.eup %3673  ;;  %v2125_v4 = vpop.xlane.xlu1 %2124 }
 0x6a5   : > { %v2151_v54 = vadd.f32 %v2125_v4, %v2103_v23  ;;  %2600 = vperm.xlu1 %3580, %v2558_v57   ;;  %v2527_v41 = vmul.f32 %v3674_v55, %v2495_v43  ;;  %v2556_v11 = vmul.f32 %v3672_v16, %v2540_v62  ;;  %v2097_v43 = vld [vmem:[#allocation3 + $0x78] sm:$0xff] }
 0x6a6   : > { %v3676_v36 = vpop.eup %3675  ;;  %v2113_v45 = vmul.f32 %v4901_v15, %v2097_v43 }
 0x6a7   : > { %2168 = vst.msk [vmem:[#allocation3 + $0x28] sm:$0xff] %vm2162_vm2, %v2151_v54  ;;  %v2543_v12 = vsub.f32 2.0, %v2527_v41  ;;  %v2525_v60 = vmul.f32 %v3676_v36, %v2493_v50 }
 0x6a8   : > { %v2135_v24 = vpop.xlane.xlu0 %2134  ;;  %v2137_v3 = vpop.xlane.xlu1 %2136 }
 0x6a9   : > { %v2156_v61 = vadd.f32 %v2135_v24, %v2108_v38  ;;  %v2157_v32 = vadd.f32 %v2137_v3, %v2109_v20  ;;  %2590 = vperm.xlu1 %3580, %v2556_v11   ;;  %v2559_v10 = vmul.f32 %v3674_v55, %v2543_v12  ;;  %v2541_v49 = vsub.f32 2.0, %v2525_v60 }
 0x6aa   : > { %v2499_v25 = vld [vmem:[#allocation3 + $0x38] sm:$0xff] }
 0x6ab   : > { %2173 = vst.msk [vmem:[#allocation3 + $0x50] sm:$0xff] %vm2162_vm2, %v2156_v61  ;;  %2174 = vst.msk [vmem:[#allocation3 + $0x58] sm:$0xff] %vm2162_vm2, %v2157_v32  ;;  %2605 = vperm.xlu0 %3579, %v2559_v10   ;;  %3681 = vrcp.f32 %v2499_v25  ;;  %v2557_v56 = vmul.f32 %v3676_v36, %v2541_v49 }
 0x6ac   : > { %v3678_v39 = vpop.eup %3677  ;;  %v2131_v42 = vpop.xlane.xlu0 %2130 }
 0x6ad   : > { %v2133_v6 = vpop.xlane.xlu1 %2132  ;;  %v2154_v8 = vadd.f32 %v2131_v42, %v2106_v35  ;;  %v2530_v40 = vmul.f32 %v3678_v39, %v2498_v0 }
 0x6ae   : > { %v2155_v7 = vadd.f32 %v2133_v6, %v2107_v33  ;;  %v2497_v17 = vld [vmem:[#allocation3 + $0x28] sm:$0xff] }
 0x6af   : > { %2171 = vst.msk [vmem:[#allocation3 + $0x40] sm:$0xff] %vm2162_vm2, %v2154_v8  ;;  %2595 = vperm.xlu0 %3579, %v2557_v56   ;;  %v2546_v1 = vsub.f32 2.0, %v2530_v40  ;;  %3683 = vrcp.f32 %v2497_v17 }
 0x6b0   : > { %2172 = vst.msk [vmem:[#allocation3 + $0x48] sm:$0xff] %vm2162_vm2, %v2155_v7  ;;  %v3680_v31 = vpop.eup %3679  ;;  %v2139_v34 = vpop.xlane.xlu0 %2138 }
 0x6b1   : > { %v2141_v18 = vpop.xlane.xlu1 %2140  ;;  %v2158_v52 = vadd.f32 %v2139_v34, %v2110_v9  ;;  %v2562_v50 = vmul.f32 %v3678_v39, %v2546_v1  ;;  %v2528_v58 = vmul.f32 %v3680_v31, %v2496_v26  ;;  %v2180_v1 = vld [vmem:[#allocation4] sm:$0xff] }
 0x6b2   : > { %v2159_v63 = vadd.f32 %v2141_v18, %v2111_v47  ;;  %v2502_v22 = vld [vmem:[#allocation3 + $0x50] sm:$0xff]  ;;  %v2503_v5 = vld [vmem:[#allocation3 + $0x58] sm:$0xff] }
 0x6b3   : > { %2175 = vst.msk [vmem:[#allocation3 + $0x60] sm:$0xff] %vm2162_vm2, %v2158_v52  ;;  %2620 = vperm.xlu1 %3580, %v2562_v50   ;;  %v2544_v0 = vsub.f32 2.0, %v2528_v58  ;;  %3685 = vrcp.f32 %v2502_v22 }
 0x6b4   : > { %2176 = vst.msk [vmem:[#allocation3 + $0x68] sm:$0xff] %vm2162_vm2, %v2159_v63  ;;  %v2143_v46 = vpop.xlane.xlu0 %2142  ;;  %3687 = vrcp.f32 %v2503_v5 }
 0x6b5   : > { %v2145_v27 = vpop.xlane.xlu1 %2144  ;;  %v2160_v16 = vadd.f32 %v2143_v46, %v2112_v29  ;;  %v2560_v48 = vmul.f32 %v3680_v31, %v2544_v0 }
 0x6b6   : > { %v2161_v51 = vadd.f32 %v2145_v27, %v2113_v45  ;;  %v2500_v21 = vld [vmem:[#allocation3 + $0x40] sm:$0xff] }
 0x6b7   : > { %v2501_v19 = vld [vmem:[#allocation3 + $0x48] sm:$0xff]  ;;  %2177 = vst.msk [vmem:[#allocation3 + $0x70] sm:$0xff] %vm2162_vm2, %v2160_v16  ;;  %2610 = vperm.xlu1 %3580, %v2560_v48   ;;  %3689 = vrcp.f32 %v2500_v21 }
 0x6b8   : > { %2178 = vst.msk [vmem:[#allocation3 + $0x78] sm:$0xff] %vm2162_vm2, %v2161_v51  ;;  %v3682_v13 = vpop.eup %3681  ;;  %3691 = vrcp.f32 %v2501_v19 }
 0x6b9   : > { %v2531_v59 = vmul.f32 %v3682_v13, %v2499_v25  ;;  %v2203_v23 = vpop.permute.xlu1 %2202  ;;  %v2179_v25 = vld [vmem:[#allocation4 + $0x30] sm:$0xff] }
 0x6ba   : > { %v2504_v15 = vld [vmem:[#allocation3 + $0x60] sm:$0xff]  ;;  %v2276_v29 = vmul.f32 %v2203_v23, %v2180_v1 }
 0x6bb   : > { %v2505_v26 = vld [vmem:[#allocation3 + $0x68] sm:$0xff]  ;;  %v2547_v57 = vsub.f32 2.0, %v2531_v59  ;;  %3693 = vrcp.f32 %v2504_v15 }
 0x6bc   : > { %v3684_v37 = vpop.eup %3683  ;;  %3695 = vrcp.f32 %v2505_v26  ;;  %v2198_v54 = vpop.permute.xlu0 %2197 }
 0x6bd   : > { %v2563_v62 = vmul.f32 %v3682_v13, %v2547_v57  ;;  %v2529_v55 = vmul.f32 %v3684_v37, %v2497_v17  ;;  %v2208_v38 = vpop.permute.xlu1 %2207  ;;  %v2275_v40 = vmul.f32 %v2198_v54, %v2179_v25  ;;  %v2185_v57 = vld [vmem:[#allocation4 + $0x8] sm:$0xff] }
 0x6be   : > { %v2506_v4 = vld [vmem:[#allocation3 + $0x70] sm:$0xff]  ;;  %v2277_v39 = vmul.f32 %v2208_v38, %v2181_v53 }
 0x6bf   : > { %v2507_v30 = vld [vmem:[#allocation3 + $0x78] sm:$0xff]  ;;  %2625 = vperm.xlu0 %3579, %v2563_v62   ;;  %v2545_v41 = vsub.f32 2.0, %v2529_v55  ;;  %3697 = vrcp.f32 %v2506_v4 }
 0x6c0   : > { %v3686_v36 = vpop.eup %3685  ;;  %3699 = vrcp.f32 %v2507_v30  ;;  %v2213_v32 = vpop.permute.xlu0 %2212 }
 0x6c1   : > { %v3688_v20 = vpop.eup %3687  ;;  %v2561_v11 = vmul.f32 %v3684_v37, %v2545_v41  ;;  %v2534_v12 = vmul.f32 %v3686_v36, %v2502_v22  ;;  %v2218_v42 = vpop.permute.xlu1 %2217  ;;  %v2278_v2 = vmul.f32 %v2213_v32, %v2182_v28  ;;  %v2183_v37 = vld [vmem:[#allocation4 + $0x50] sm:$0xff] }
 0x6c2   : > { %v2535_v60 = vmul.f32 %v3688_v20, %v2503_v5  ;;  %v2279_v41 = vmul.f32 %v2218_v42, %v2183_v37 }
 0x6c3   : > { %2615 = vperm.xlu0 %3579, %v2561_v11   ;;  %v2550_v24 = vsub.f32 2.0, %v2534_v12 }
 0x6c4   : > { %v3690_v3 = vpop.eup %3689  ;;  %v2551_v44 = vsub.f32 2.0, %v2535_v60  ;;  %v2223_v43 = vpop.permute.xlu0 %2222  ;;  %v2189_v60 = vld [vmem:[#allocation4 + $0x10] sm:$0xff] }
 0x6c5   : > { %v3692_v61 = vpop.eup %3691  ;;  %v2566_v10 = vmul.f32 %v3686_v36, %v2550_v24  ;;  %v2532_v49 = vmul.f32 %v3690_v3, %v2500_v21  ;;  %v2228_v45 = vpop.permute.xlu1 %2227 }
 0x6c6   : > { %v2567_v35 = vmul.f32 %v3688_v20, %v2551_v44  ;;  %v2533_v33 = vmul.f32 %v3692_v61, %v2501_v19  ;;  %v2281_v55 = vmul.f32 %v2228_v45, %v2185_v57  ;;  %v2184_v20 = vld [vmem:[#allocation4 + $0x68] sm:$0xff] }
 0x6c7   : > { %2640 = vperm.xlu1 %3580, %v2566_v10   ;;  %v2548_v6 = vsub.f32 2.0, %v2532_v49  ;;  %v2280_v53 = vmul.f32 %v2223_v43, %v2184_v20  ;;  %v2194_v43 = vld [vmem:[#allocation4 + $0x28] sm:$0xff] }
 0x6c8   : > { %v3694_v14 = vpop.eup %3693  ;;  %2645 = vperm.xlu0 %3579, %v2567_v35   ;;  %v3349_v8 = vpop.f32.mrf.mxu1  ;;  %v2549_v7 = vsub.f32 2.0, %v2533_v33  ;;  %v2190_v35 = vld [vmem:[#allocation4 + $0x38] sm:$0xff] }
 0x6c9   : > { %v3696_v56 = vpop.eup %3695  ;;  %v4931_v17 = vadd.f32 %v3349_v8, %v2277_v39  ;;  %v2564_v9 = vmul.f32 %v3690_v3, %v2548_v6  ;;  %v2536_v47 = vmul.f32 %v3694_v14, %v2504_v15  ;;  %v2233_v59 = vpop.permute.xlu0 %2232  ;;  %v2188_v6 = vld [vmem:[#allocation4 + $0x20] sm:$0xff] }
 0x6ca   : > { %v2381_v31 = vpop.f32.mrf.mxu1  ;;  %v2565_v34 = vmul.f32 %v3692_v61, %v2549_v7  ;;  %v2537_v18 = vmul.f32 %v3696_v56, %v2505_v26  ;;  %v2238_v23 = vpop.permute.xlu1 %2237  ;;  %v2187_v61 = vld [vmem:[#allocation4 + $0x40] sm:$0xff] }
 0x6cb   : > { %2462 = vst [vmem:[#allocation4 + $0x58] sm:$0xff] %v4931_v17  ;;  %v4934_v52 = vadd.f32 %v2381_v31, %v2275_v40  ;;  %2630 = vperm.xlu1 %3580, %v2564_v9   ;;  %v2552_v63 = vsub.f32 2.0, %v2536_v47  ;;  %v2283_v39 = vmul.f32 %v2238_v23, %v2187_v61  ;;  %v2191_v31 = vld [vmem:[#allocation4 + $0x60] sm:$0xff] }
 0x6cc   : > { %v3698_v50 = vpop.eup %3697  ;;  %2635 = vperm.xlu0 %3579, %v2565_v34   ;;  %v3350_v58 = vpop.f32.mrf.mxu1  ;;  %v2553_v22 = vsub.f32 2.0, %v2537_v18 }
 0x6cd   : > { %v3700_v5 = vpop.eup %3699  ;;  %2460 = vst [vmem:[#allocation4 + $0x30] sm:$0xff] %v4934_v52  ;;  %v4937_v0 = vadd.f32 %v3350_v58, %v2278_v2  ;;  %v2568_v46 = vmul.f32 %v3694_v14, %v2552_v63  ;;  %v2538_v27 = vmul.f32 %v3698_v50, %v2506_v4  ;;  %v2243_v62 = vpop.permute.xlu0 %2242  ;;  %v2186_v4 = vld [vmem:[#allocation4 + $0x48] sm:$0xff] }
 0x6ce   : > { %v2384_v16 = vpop.f32.mrf.mxu1  ;;  %v2569_v51 = vmul.f32 %v3696_v56, %v2553_v22  ;;  %v2539_v48 = vmul.f32 %v3700_v5, %v2507_v30  ;;  %v2248_v30 = vpop.permute.xlu1 %2247  ;;  %v2282_v11 = vmul.f32 %v2233_v59, %v2186_v4  ;;  %v2193_v56 = vld [vmem:[#allocation4 + $0x78] sm:$0xff]  ;;  %v2284_v47 = vmul.f32 %v2243_v62, %v2188_v6 }
 0x6cf   : > { %2463 = vst [vmem:[#allocation4 + $0x18] sm:$0xff] %v4937_v0  ;;  %v4940_v21 = vadd.f32 %v2384_v16, %v2276_v29  ;;  %2650 = vperm.xlu1 %3580, %v2568_v46   ;;  %v2554_v19 = vsub.f32 2.0, %v2538_v27  ;;  %v2285_v49 = vmul.f32 %v2248_v30, %v2189_v60 }
 0x6d0   : > { %2655 = vperm.xlu0 %3579, %v2569_v51   ;;  %v2555_v13 = vsub.f32 2.0, %v2539_v48 }
 0x6d1   : > { %2461 = vst [vmem:[#allocation4] sm:$0xff] %v4940_v21  ;;  %v2570_v15 = vmul.f32 %v3698_v50, %v2554_v19  ;;  %v2253_v24 = vpop.permute.xlu0 %2252 }
 0x6d2   : > { %v2571_v26 = vmul.f32 %v3700_v5, %v2555_v13  ;;  %v2258_v32 = vpop.permute.xlu1 %2257  ;;  %v2286_v8 = vmul.f32 %v2253_v24, %v2190_v35  ;;  %v2192_v5 = vld [vmem:[#allocation4 + $0x70] sm:$0xff] }
 0x6d3   : > { %2660 = vperm.xlu1 %3580, %v2570_v15   ;;  %v2287_v58 = vmul.f32 %v2258_v32, %v2191_v31 }
 0x6d4   : > { %2665 = vperm.xlu0 %3579, %v2571_v26  }
 0x6d5   : > { %v2263_v14 = vpop.permute.xlu0 %2262 }
 0x6d6   : > { %v2268_v40 = vpop.permute.xlu1 %2267  ;;  %v2288_v16 = vmul.f32 %v2263_v14, %v2192_v5 }
 0x6d7   : > { %v2289_v18 = vmul.f32 %v2268_v40, %v2193_v56 }
 0x6d9   : > { %v3353_v54 = vpop.f32.mrf.mxu1  ;;  %v2273_v63 = vpop.permute.xlu0 %2272 }
 0x6da   : > { %v4943_v36 = vadd.f32 %v3353_v54, %v2281_v55  ;;  %v2290_v45 = vmul.f32 %v2273_v63, %v2194_v43 }
 0x6db   : > { %v2397_v38 = vpop.f32.mrf.mxu1 }
 0x6dc   : > { %2466 = vst [vmem:[#allocation4 + $0x8] sm:$0xff] %v4943_v36  ;;  %v4946_v12 = vadd.f32 %v2397_v38, %v2279_v41 }
 0x6dd   : > { %v3354_v3 = vpop.f32.mrf.mxu1 }
 0x6de   : > { %2464 = vst [vmem:[#allocation4 + $0x50] sm:$0xff] %v4946_v12  ;;  %v4949_v44 = vadd.f32 %v3354_v3, %v2282_v11 }
 0x6df   : > { %v2400_v10 = vpop.f32.mrf.mxu1 }
 0x6e0   : > { %2467 = vst [vmem:[#allocation4 + $0x48] sm:$0xff] %v4949_v44  ;;  %v4952_v25 = vadd.f32 %v2400_v10, %v2280_v53 }
 0x6e1   : > { %v3357_v33 = vpop.f32.mrf.mxu1 }
 0x6e2   : > { %2465 = vst [vmem:[#allocation4 + $0x68] sm:$0xff] %v4952_v25  ;;  %v4955_v42 = vadd.f32 %v3357_v33, %v2285_v49 }
 0x6e3   : > { %v2413_v28 = vpop.f32.mrf.mxu1 }
 0x6e4   : > { %2470 = vst [vmem:[#allocation4 + $0x10] sm:$0xff] %v4955_v42  ;;  %v2452_v7 = vadd.f32 %v2413_v28, %v2283_v39 }
 0x6e5   : > { %v3358_v9 = vpop.f32.mrf.mxu1 }
 0x6e6   : > { %2468 = vst [vmem:[#allocation4 + $0x40] sm:$0xff] %v2452_v7  ;;  %v2455_v1 = vadd.f32 %v3358_v9, %v2286_v8 }
 0x6e7   : > { %v2416_v34 = vpop.f32.mrf.mxu1 }
 0x6e8   : > { %2471 = vst [vmem:[#allocation4 + $0x38] sm:$0xff] %v2455_v1  ;;  %v2453_v2 = vadd.f32 %v2416_v34, %v2284_v47 }
 0x6e9   : > { %v3361_v50 = vpop.f32.mrf.mxu1 }
 0x6ea   : > { %2469 = vst [vmem:[#allocation4 + $0x20] sm:$0xff] %v2453_v2  ;;  %v2458_v22 = vadd.f32 %v3361_v50, %v2289_v18 }
 0x6eb   : > { %v2429_v29 = vpop.f32.mrf.mxu1 }
 0x6ec   : > { %2474 = vst [vmem:[#allocation4 + $0x78] sm:$0xff] %v2458_v22  ;;  %v2456_v46 = vadd.f32 %v2429_v29, %v2287_v58 }
 0x6ed   : > { %v3362_v27 = vpop.f32.mrf.mxu1 }
 0x6ee   : > { %2472 = vst [vmem:[#allocation4 + $0x60] sm:$0xff] %v2456_v46  ;;  %v2459_v51 = vadd.f32 %v3362_v27, %v2290_v45 }
 0x6ef   : > { %v2432_v48 = vpop.f32.mrf.mxu1 }
 0x6f0   : > { %2475 = vst [vmem:[#allocation4 + $0x28] sm:$0xff] %v2459_v51  ;;  %v2457_v19 = vadd.f32 %v2432_v48, %v2288_v16 }
 0x6f2   : > { %2473 = vst [vmem:[#allocation4 + $0x70] sm:$0xff] %v2457_v19 }
 0x720   : > { %v2601_v13 = vpop.permute.xlu1 %2600 }
 0x721   : > { %v2670_v15 = vmul.f32 %v2601_v13, %v4931_v17 }
 0x724   : > { %v2591_v23 = vpop.permute.xlu1 %2590 }
 0x725   : > { %v2668_v62 = vmul.f32 %v2591_v23, %v4934_v52 }
 0x726   : > { %v2606_v59 = vpop.permute.xlu0 %2605 }
 0x727   : > { %v2671_v26 = vmul.f32 %v2606_v59, %v4937_v0 }
 0x729   : > { %v3132_v57 = vpack.c.bf16 %v2671_v26, %v2670_v15 }
 0x72a   : > { %v2596_v37 = vpop.permute.xlu0 %2595 }
 0x72b   : > { %3164 = vst [vmem:[%s4143_s14 + $0x8] sm:$0xff] %v3132_v57   ;;  %v2669_v55 = vmul.f32 %v2596_v37, %v4940_v21 }
 0x72d   : > { %v3127_v4 = vpack.c.bf16 %v2669_v55, %v2668_v62 }
 0x72e   : > { %v2621_v30 = vpop.permute.xlu1 %2620 }
 0x72f   : > { %3128 = vst [vmem:[%s4143_s14] sm:$0xff] %v3127_v4   ;;  %v2674_v41 = vmul.f32 %v2621_v30, %v4943_v36 }
 0x732   : > { %v2611_v20 = vpop.permute.xlu1 %2610 }
 0x733   : > { %v2672_v11 = vmul.f32 %v2611_v20, %v4946_v12 }
 0x73a   : > { %v2626_v54 = vpop.permute.xlu0 %2625 }
 0x73b   : > { %v2675_v17 = vmul.f32 %v2626_v54, %v4949_v44 }
 0x73d   : > { %v3142_v0 = vpack.c.bf16 %v2675_v17, %v2674_v41 }
 0x73e   : > { %v2616_v38 = vpop.permute.xlu0 %2615 }
 0x73f   : > { %3166 = vst [vmem:[%s4143_s14 + $0x18] sm:$0xff] %v3142_v0   ;;  %v2673_v52 = vmul.f32 %v2616_v38, %v4952_v25 }
 0x741   : > { %v3137_v60 = vpack.c.bf16 %v2673_v52, %v2672_v11 }
 0x742   : > { %v2641_v21 = vpop.permute.xlu1 %2640 }
 0x743   : > { %3165 = vst [vmem:[%s4143_s14 + $0x10] sm:$0xff] %v3137_v60   ;;  %v2646_v24 = vpop.permute.xlu0 %2645  ;;  %v2678_v3 = vmul.f32 %v2641_v21, %v4955_v42 }
 0x744   : > { %v2679_v53 = vmul.f32 %v2646_v24, %v2455_v1 }
 0x746   : > { %v3152_v36 = vpack.c.bf16 %v2679_v53, %v2678_v3  ;;  %v2631_v44 = vpop.permute.xlu1 %2630 }
 0x747   : > { %v2636_v61 = vpop.permute.xlu0 %2635  ;;  %v2676_v32 = vmul.f32 %v2631_v44, %v2452_v7 }
 0x748   : > { %3168 = vst [vmem:[%s4143_s14 + $0x28] sm:$0xff] %v3152_v36   ;;  %v2677_v10 = vmul.f32 %v2636_v61, %v2453_v2 }
 0x74a   : > { %v3147_v12 = vpack.c.bf16 %v2677_v10, %v2676_v32  ;;  %v2651_v49 = vpop.permute.xlu1 %2650 }
 0x74b   : > { %v2656_v35 = vpop.permute.xlu0 %2655  ;;  %v2680_v25 = vmul.f32 %v2651_v49, %v2456_v46 }
 0x74c   : > { %3167 = vst [vmem:[%s4143_s14 + $0x20] sm:$0xff] %v3147_v12   ;;  %v2681_v33 = vmul.f32 %v2656_v35, %v2457_v19 }
 0x74e   : > { %v3157_v39 = vpack.c.bf16 %v2681_v33, %v2680_v25  ;;  %v2661_v6 = vpop.permute.xlu1 %2660 }
 0x74f   : > { %v2666_v14 = vpop.permute.xlu0 %2665  ;;  %v2682_v28 = vmul.f32 %v2661_v6, %v2458_v22 }
 0x750   : > { %3169 = vst [vmem:[%s4143_s14 + $0x30] sm:$0xff] %v3157_v39   ;;  %v2683_v42 = vmul.f32 %v2666_v14, %v2459_v51 }
 0x752   : > { %v3162_v8 = vpack.c.bf16 %v2683_v42, %v2682_v28 }
 0x754   : > { %3170 = vst [vmem:[%s4143_s14 + $0x38] sm:$0xff] %v3162_v8  }
 0x755 PF: > { %2770 = sbr.rel (!%p4034_p11) target bundleno = 1902 (0x76e), region = 171  ;;  %s5104_s2 = sld [smem:[#allocation15_spill]] (%p4034_p11)  ;;  %v2795_v7 = vld [vmem:[%s4143_s14] sm:$0xf] (%p4034_p11)  ;;  %v2797_v56 = vld [vmem:[%s4143_s14 + $0x4] sm:$0xf] (%p4034_p11) }
 0x756   : > { %s5105_s1 = sld [smem:[#allocation17_spill]] (%p4034_p11)  ;;  %v2799_v40 = vld [vmem:[%s4143_s14 + $0x8] sm:$0xf] (%p4034_p11)  ;;  %v2801_v9 = vld [vmem:[%s4143_s14 + $0xc] sm:$0xf] (%p4034_p11) }
 0x757   : > { %s5106_s28 = sld [smem:[#allocation16_spill]] (%p4034_p11)  ;;  %v2803_v47 = vld [vmem:[%s4143_s14 + $0x10] sm:$0xf] (%p4034_p11)  ;;  %v2805_v1 = vld [vmem:[%s4143_s14 + $0x14] sm:$0xf] (%p4034_p11) }
 0x758   : > { %v2807_v31 = vld [vmem:[%s4143_s14 + $0x18] sm:$0xf] (%p4034_p11)  ;;  %v2809_v34 = vld [vmem:[%s4143_s14 + $0x1c] sm:$0xf] (%p4034_p11)  ;;  %v2811_v18 = vld [vmem:[%s4143_s14 + $0x20] sm:$0xf] (%p4034_p11) }
 0x759   : > { %v2813_v2 = vld [vmem:[%s4143_s14 + $0x24] sm:$0xf] (%p4034_p11)  ;;  %v2815_v43 = vld [vmem:[%s4143_s14 + $0x28] sm:$0xf] (%p4034_p11)  ;;  %v2817_v63 = vld [vmem:[%s4143_s14 + $0x2c] sm:$0xf] (%p4034_p11) }
 0x75a   : > { %v2819_v50 = vld [vmem:[%s4143_s14 + $0x30] sm:$0xf]  ;;  %v2821_v58 = vld [vmem:[%s4143_s14 + $0x34] sm:$0xf]  ;;  %s5107_s24 = sld [smem:[#allocation26_spill]] }
 0x75b   : > { %s2771_s17 = sld [smem:[#allocation6 + %s5104_s2]]  ;;  %v2823_v22 = vld [vmem:[%s4143_s14 + $0x38] sm:$0xf]  ;;  %v2825_v5 = vld [vmem:[%s4143_s14 + $0x3c] sm:$0xf] }
 0x75c   : > { %s3100_s0 = sshll.u32 %s5105_s1, 6 }
 0x761   : > { %s3123_s10 = sshll.u32 %s2771_s17, 5 }
 0x762   : > { %s2774_s16 = sadd.s32 %s5106_s28, %s3123_s10 }
 0x763   : > { %s2776_s21 = sadd.s32 %s3100_s0, %s2774_s16 }
 0x764   : > { %s3101_s11 = sshll.u32 %s2776_s21, 2 }
 0x765   : > { %s2778_s23 = scalar_lea.vmem %s5107_s24, %s3101_s11 }
 0x766   : > { %2796 = vst [vmem:[%s2778_s23] sm:$0xf] %v2795_v7  ;;  %2798 = vst [vmem:[%s2778_s23 + $0x8] sm:$0xf] %v2797_v56 }
 0x767   : > { %2800 = vst [vmem:[%s2778_s23 + $0x10] sm:$0xf] %v2799_v40  ;;  %2802 = vst [vmem:[%s2778_s23 + $0x18] sm:$0xf] %v2801_v9 }
 0x768   : > { %2804 = vst [vmem:[%s2778_s23 + $0x20] sm:$0xf] %v2803_v47  ;;  %2806 = vst [vmem:[%s2778_s23 + $0x28] sm:$0xf] %v2805_v1 }
 0x769   : > { %2808 = vst [vmem:[%s2778_s23 + $0x30] sm:$0xf] %v2807_v31  ;;  %2810 = vst [vmem:[%s2778_s23 + $0x38] sm:$0xf] %v2809_v34 }
 0x76a   : > { %2812 = vst [vmem:[%s2778_s23 + $0x40] sm:$0xf] %v2811_v18  ;;  %2814 = vst [vmem:[%s2778_s23 + $0x48] sm:$0xf] %v2813_v2 }
 0x76b   : > { %2816 = vst [vmem:[%s2778_s23 + $0x50] sm:$0xf] %v2815_v43  ;;  %2818 = vst [vmem:[%s2778_s23 + $0x58] sm:$0xf] %v2817_v63 }
 0x76c   : > { %2820 = vst [vmem:[%s2778_s23 + $0x60] sm:$0xf] %v2819_v50  ;;  %2822 = vst [vmem:[%s2778_s23 + $0x68] sm:$0xf] %v2821_v58 }
 0x76d   : > { %2824 = vst [vmem:[%s2778_s23 + $0x70] sm:$0xf] %v2823_v22  ;;  %2826 = vst [vmem:[%s2778_s23 + $0x78] sm:$0xf] %v2825_v5 }
 0x76e PF: > { %s25_s15 = sadd.s32 1, %s3845_s15   ;;  %s5109_s19 = smov %s4012_s7 }
 0x76f   : > { %p5000_p6 = scmp.ge.s32.totalorder %s25_s15, 14   ;;  %s5110_s11 = sld [smem:[#allocation18_spill]] }
 0x770   : > { %s5111_s3 = sld [smem:[#allocation19_spill]]  ;;  %s5115_s1 = smov %s3793_s27 }
 0x771   : > { %s5112_s4 = sld [smem:[#allocation20_spill]]  ;;  %s5116_s27 = smov %s4041_s26 }
 0x772   : > { %s5113_s18 = sld [smem:[#allocation21_spill]]  ;;  %s5117_s28 = smov %s3801_s29 }
 0x773   : > { %s5118_s29 = smov %s4028_s22  ;;  %s5119_s30 = smov %s3809_s6 }
 0x774   : > { %s5120_s6 = smov %s4023_s20  ;;  %s5121_s7 = smov %s3817_s8 }
 0x775   : > { %s5122_s8 = smov %s5109_s19  ;;  %s5123_s9 = smov %s3833_s12 }
 0x776   : > { %s5124_s10 = smov %s3837_s13  ;;  %s5125_s12 = smov %s5111_s3 }
 0x777   : > { %s5126_s13 = smov %s5112_s4  ;;  %24 = sbr.rel (!%p5000_p6) target bundleno = 35 (0x23), region = 259 }
 0x778   : > { %s5127_s14 = smov %s5113_s18 }

</bundles_post_ra>
